<compile_context>
chip_gen: v5e
topology: v5e:2x2
jax: 0.10.0
libtpu: 0.0.40
codegen_flags: <defaults>
</compile_context>

<pallas_src>
import numpy as np
import jax
import jax.numpy as jnp
from jax import lax
from jax.experimental import pallas as pl
from jax.experimental.pallas import tpu as pltpu

# ----------------------------- configuration --------------------------------
WINDOW_SIZE = (4, 4)          # 2-D window
DIM = 32                      # feature channels
NUM_HEADS = 4
HEAD_DIM = DIM // NUM_HEADS
SCALE = HEAD_DIM ** (-0.5)
N = WINDOW_SIZE[0] * WINDOW_SIZE[1]   # tokens per window = 16
NW = 4                        # number of distinct window masks
B = 2 * NW                    # total windows in the batch
TOT = B * N                   # total tokens = 128
NEG_INF = -1e9                # blocks cross-window attention (exp underflows to 0)


# ------------------------------- kernel --------------------------------------
def window_attention_kernel(xt_ref, wqkv_ref, wproj_ref, bproj_ref, bm_ref, o_ref):
    # xt_ref:    (DIM, TOT)                 channel-major tokens (lane-dense)
    # wqkv_ref:  (3*DIM, DIM)               qkv weight^T, scale folded into Q rows
    # wproj_ref: (NUM_HEADS, DIM, HEAD_DIM) per-head output-projection slabs
    # bproj_ref: (DIM, 1)                   output projection bias (column)
    # bm_ref:    (NUM_HEADS, TOT, TOT)      block-diag rel-pos bias + mask (-1e9 off-diag)
    # o_ref:     (DIM, TOT)                 channel-major output
    xt = xt_ref[...]                                          # (32, 128)
    # single QKV projection for all windows: (96,32)@(32,128) -> (96,128)
    qkv_t = jnp.dot(wqkv_ref[...], xt, preferred_element_type=jnp.float32)

    acc = jnp.zeros((DIM, TOT), jnp.float32)
    for h in range(NUM_HEADS):                                # unrolled, 4 iters
        q_t = qkv_t[h * HEAD_DIM:(h + 1) * HEAD_DIM, :]                       # (8,128)
        k_t = qkv_t[DIM + h * HEAD_DIM:DIM + (h + 1) * HEAD_DIM, :]           # (8,128)
        v_t = qkv_t[2 * DIM + h * HEAD_DIM:2 * DIM + (h + 1) * HEAD_DIM, :]   # (8,128)

        # scores s[i,j] = q_i . k_j : contract the channel axis of both
        # operands directly (no materialized k.T / q.T copies).
        s = lax.dot_general(q_t, k_t, (((0,), (0,)), ((), ())),
                            preferred_element_type=jnp.float32)      # (128,128)
        # fused rel-pos bias + window mask; cross-window entries get -1e9 and
        # vanish after exp (exact 0 in f32)
        s = s + bm_ref[h]
        s = s - jnp.max(s, axis=-1, keepdims=True)
        p = jnp.exp(s)
        # reciprocal-multiply instead of row-wise divide
        p = p * pl.reciprocal(jnp.sum(p, axis=-1, keepdims=True), approx=False)
        # TODO(synk): attn_drop / proj_drop omitted (rates are 0.0 -> identity)

        # ctx_t[d,i] = sum_j v_t[d,j] * p[i,j]  (trans-rhs contraction, no transpose)
        ctx_t = lax.dot_general(v_t, p, (((1,), (1,)), ((), ())),
                                preferred_element_type=jnp.float32)  # (8,128)
        # accumulate output projection per head: (32,8)@(8,128) -> (32,128)
        acc = acc + jnp.dot(wproj_ref[h], ctx_t, preferred_element_type=jnp.float32)

    o_ref[...] = (acc + bproj_ref[...]).astype(o_ref.dtype)


# ------------------------- host-side constant prep ---------------------------
def _build_attn_bias(rel_bias, mask, num_windows):
    """Block-diagonal (H, num_windows*N, num_windows*N) fused bias+mask;
    off-diagonal (cross-window) entries are NEG_INF."""
    h, n, _ = rel_bias.shape
    nw = mask.shape[0]
    per_win = rel_bias[:, None] + mask[None]                  # (H, NW, N, N)
    big = jnp.full((h, num_windows * n, num_windows * n), NEG_INF, dtype=jnp.float32)
    for w in range(num_windows):
        big = big.at[:, w * n:(w + 1) * n, w * n:(w + 1) * n].set(per_win[:, w % nw])
    return big


def window_attention(x, w_qkv, w_proj, b_proj, rel_bias, mask):
    """x: (B, N, DIM); rel_bias: (NUM_HEADS, N, N); mask: (NW, N, N)."""
    b, n, c = x.shape
    tot = b * n

    # --- constant prep (layout plumbing, done once on host) ---
    # fold attention scale into the Q rows of the transposed qkv weight
    row_scale = jnp.concatenate([jnp.full((c,), SCALE, w_qkv.dtype),
                                 jnp.ones((2 * c,), w_qkv.dtype)])
    w_qkv_t = w_qkv.T * row_scale[:, None]                    # (3c, c)
    # per-head output-projection slabs: slab[h] = w_proj[h*hd:(h+1)*hd, :].T
    w_proj_heads = jnp.transpose(w_proj.reshape(NUM_HEADS, HEAD_DIM, c), (0, 2, 1))
    b_proj_col = b_proj.reshape(c, 1)
    # fused block-diagonal bias + mask over ALL windows
    bias_mask = _build_attn_bias(rel_bias, mask, b)           # (H, tot, tot)
    # channel-major / token-minor activations -> 128-lane-dense loads/stores
    x_t = x.reshape(tot, c).T                                 # (c, tot) = (32, 128)

    flops = (2 * (3 * c) * c * tot
             + NUM_HEADS * (2 * tot * HEAD_DIM * tot      # scores
                            + 2 * HEAD_DIM * tot * tot    # context
                            + 2 * c * HEAD_DIM * tot))    # output proj
    transcendentals = NUM_HEADS * tot * tot
    bytes_accessed = 4 * (x_t.size + w_qkv_t.size + w_proj_heads.size
                          + b_proj_col.size + bias_mask.size + c * tot)

    out_t = pl.pallas_call(
        window_attention_kernel,
        out_shape=jax.ShapeDtypeStruct((c, tot), x.dtype),
        grid_spec=pltpu.PrefetchScalarGridSpec(
            num_scalar_prefetch=0,
            grid=(1,),                     # single step: no per-grid-step overhead
            in_specs=[
                pl.BlockSpec((c, tot), lambda i: (0, 0)),                       # x^T
                pl.BlockSpec((3 * c, c), lambda i: (0, 0)),                     # w_qkv^T
                pl.BlockSpec((NUM_HEADS, c, HEAD_DIM), lambda i: (0, 0, 0)),    # proj slabs
                pl.BlockSpec((c, 1), lambda i: (0, 0)),                         # proj bias
                pl.BlockSpec((NUM_HEADS, tot, tot), lambda i: (0, 0, 0)),       # bias+mask
            ],
            out_specs=pl.BlockSpec((c, tot), lambda i: (0, 0)),
        ),
        compiler_params=pltpu.CompilerParams(
            dimension_semantics=("arbitrary",)),
        cost_estimate=pl.CostEstimate(flops=int(flops),
                                      transcendentals=int(transcendentals),
                                      bytes_accessed=int(bytes_accessed)),
    )(x_t, w_qkv_t, w_proj_heads, b_proj_col, bias_mask)

    return out_t.T.reshape(b, n, c)


# ------------------------- glue: bias table & index --------------------------
def make_relative_position_index(window_size):
    wh, ww = window_size
    coords = np.stack(np.meshgrid(np.arange(wh), np.arange(ww), indexing="ij"))
    coords_flatten = coords.reshape(2, -1)                        # (2, N)
    rel = coords_flatten[:, :, None] - coords_flatten[:, None, :] # (2, N, N)
    rel = rel.transpose(1, 2, 0).astype(np.int64)                 # (N, N, 2)
    rel[:, :, 0] += wh - 1
    rel[:, :, 1] += ww - 1
    rel[:, :, 0] *= 2 * ww - 1
    return rel.sum(-1)                                            # (N, N)


# ------------------------------ reference ------------------------------------
def reference_forward(x, w_qkv, w_proj, b_proj, rel_bias, mask):
    b, n, c = x.shape
    qkv = (x @ w_qkv).reshape(b, n, 3, NUM_HEADS, HEAD_DIM).transpose(2, 0, 3, 1, 4)
    q, k, v = qkv[0], qkv[1], qkv[2]
    q = q * SCALE
    attn = jnp.einsum("bhqd,bhkd->bhqk", q, k)
    attn = attn + rel_bias[None]
    nw = mask.shape[0]
    attn = attn.reshape(b // nw, nw, NUM_HEADS, n, n) + mask[None, :, None]
    attn = attn.reshape(-1, NUM_HEADS, n, n)
    attn = jax.nn.softmax(attn, axis=-1)
    out = jnp.einsum("bhqk,bhkd->bhqd", attn, v)
    out = out.transpose(0, 2, 1, 3).reshape(b, n, c)
    return out @ w_proj + b_proj[0]


# --------------------------------- main ---------------------------------------
if __name__ == "__main__":
    key = jax.random.PRNGKey(0)
    k_x, k_qkv, k_proj, k_bproj, k_tab, k_mask = jax.random.split(key, 6)

    x = jax.random.normal(k_x, (B, N, DIM), dtype=jnp.float32)

    # deterministic parameter init (shapes follow the module __init__)
    w_qkv = jax.random.normal(k_qkv, (DIM, 3 * DIM), dtype=jnp.float32) * 0.05
    w_proj = jax.random.normal(k_proj, (DIM, DIM), dtype=jnp.float32) * 0.05
    b_proj = jax.random.normal(k_bproj, (1, DIM), dtype=jnp.float32) * 0.01
    num_rel = (2 * WINDOW_SIZE[0] - 1) * (2 * WINDOW_SIZE[1] - 1)
    rel_pos_table = jax.random.normal(k_tab, (num_rel, NUM_HEADS),
                                      dtype=jnp.float32) * 0.02  # trunc_normal std=0.02

    # relative position bias (h, n, n) -- pure gather glue, done in host JAX
    rpi = make_relative_position_index(WINDOW_SIZE)               # (N, N)
    rel_bias = rel_pos_table[jnp.asarray(rpi.reshape(-1))].reshape(N, N, NUM_HEADS)
    rel_bias = jnp.transpose(rel_bias, (2, 0, 1)).astype(jnp.float32)

    # attention mask: Swin-style 0 / -100 pattern per window group
    mask_bits = jax.random.bernoulli(k_mask, 0.3, (NW, N, N))
    mask = jnp.where(mask_bits, -100.0, 0.0).astype(jnp.float32)

    out = window_attention(x, w_qkv, w_proj, b_proj, rel_bias, mask)
    out = jax.block_until_ready(out)

    ref = reference_forward(x, w_qkv, w_proj, b_proj, rel_bias, mask)
    np.testing.assert_allclose(np.asarray(out), np.asarray(ref),
                               rtol=1e-4, atol=1e-4)
    print("KERNEL_OK")
</pallas_src>

<mosaic_0001>
module attributes {stable_mosaic.version = 11 : i64} {
  func.func @window_attention_kernel(%arg0: i32, %arg1: memref<32x128xf32, #tpu.memory_space<vmem>>, %arg2: memref<96x32xf32, #tpu.memory_space<vmem>>, %arg3: memref<4x32x8xf32, #tpu.memory_space<vmem>>, %arg4: memref<32x1xf32, #tpu.memory_space<vmem>>, %arg5: memref<4x128x128xf32, #tpu.memory_space<vmem>>, %arg6: memref<32x128xf32, #tpu.memory_space<vmem>>) attributes {dimension_semantics = [#tpu.dimension_semantics<arbitrary>], iteration_bounds = array<i64: 1>, scalar_prefetch = 0 : i64, scratch_operands = 0 : i64, tpu.core_type = #tpu.core_type<tc>, window_params = [{pipeline_mode = #tpu.pipeline_mode<synchronous>, transform_indices = @transform_0, window_bounds = array<i64: 32, 128>}, {pipeline_mode = #tpu.pipeline_mode<synchronous>, transform_indices = @transform_1, window_bounds = array<i64: 96, 32>}, {pipeline_mode = #tpu.pipeline_mode<synchronous>, transform_indices = @transform_2, window_bounds = array<i64: 4, 32, 8>}, {pipeline_mode = #tpu.pipeline_mode<synchronous>, transform_indices = @transform_3, window_bounds = array<i64: 32, 1>}, {pipeline_mode = #tpu.pipeline_mode<synchronous>, transform_indices = @transform_4, window_bounds = array<i64: 4, 128, 128>}, {pipeline_mode = #tpu.pipeline_mode<synchronous>, transform_indices = @transform_5, window_bounds = array<i64: 32, 128>}]} {
    %c0 = arith.constant 0 : index
    %c0_0 = arith.constant 0 : index
    %0 = vector.load %arg1[%c0, %c0_0] : memref<32x128xf32, #tpu.memory_space<vmem>>, vector<32x128xf32>
    %c0_1 = arith.constant 0 : index
    %c0_2 = arith.constant 0 : index
    %1 = vector.load %arg2[%c0_1, %c0_2] : memref<96x32xf32, #tpu.memory_space<vmem>>, vector<96x32xf32>
    %cst = arith.constant dense<0.000000e+00> : vector<96x128xf32>
    %2 = tpu.matmul %1, %0, %cst {dimension_numbers = #tpu.dot_dimension_numbers<[1], [0], [0], [1], [0, 0, 1, 1], [], []>} : vector<96x32xf32>, vector<32x128xf32>, vector<96x128xf32> -> vector<96x128xf32>
    %cst_3 = arith.constant 0.000000e+00 : f32
    %3 = vector.broadcast %cst_3 : f32 to vector<32x128xf32>
    %4 = vector.extract_strided_slice %2 {offsets = [0, 0], sizes = [8, 128], strides = [1, 1]} : vector<96x128xf32> to vector<8x128xf32>
    %5 = vector.extract_strided_slice %2 {offsets = [32, 0], sizes = [8, 128], strides = [1, 1]} : vector<96x128xf32> to vector<8x128xf32>
    %6 = vector.extract_strided_slice %2 {offsets = [64, 0], sizes = [8, 128], strides = [1, 1]} : vector<96x128xf32> to vector<8x128xf32>
    %cst_4 = arith.constant dense<0.000000e+00> : vector<128x128xf32>
    %7 = tpu.matmul %4, %5, %cst_4 {dimension_numbers = #tpu.dot_dimension_numbers<[0], [0], [1], [1], [0, 1, 1, 1], [], []>} : vector<8x128xf32>, vector<8x128xf32>, vector<128x128xf32> -> vector<128x128xf32>
    %c0_5 = arith.constant 0 : index
    %c0_6 = arith.constant 0 : index
    %c0_7 = arith.constant 0 : index
    %8 = vector.load %arg5[%c0_5, %c0_6, %c0_7] : memref<4x128x128xf32, #tpu.memory_space<vmem>>, vector<1x128x128xf32>
    %9 = vector.shape_cast %8 : vector<1x128x128xf32> to vector<128x128xf32>
    %10 = arith.addf %7, %9 : vector<128x128xf32>
    %cst_8 = arith.constant dense<0xFF800000> : vector<128xf32>
    %11 = vector.multi_reduction <maximumf>, %10, %cst_8 [1] : vector<128x128xf32> to vector<128xf32>
    %12 = vector.shape_cast %11 : vector<128xf32> to vector<128x1xf32>
    %13 = vector.broadcast %12 : vector<128x1xf32> to vector<128x128xf32>
    %14 = arith.subf %10, %13 : vector<128x128xf32>
    %15 = math.exp %14 : vector<128x128xf32>
    %cst_9 = arith.constant dense<0.000000e+00> : vector<128xf32>
    %16 = vector.multi_reduction <add>, %15, %cst_9 [1] : vector<128x128xf32> to vector<128xf32>
    %17 = vector.shape_cast %16 : vector<128xf32> to vector<128x1xf32>
    %18 = tpu.reciprocal %17 : vector<128x1xf32> -> vector<128x1xf32>
    %19 = vector.broadcast %18 : vector<128x1xf32> to vector<128x128xf32>
    %20 = arith.mulf %15, %19 : vector<128x128xf32>
    %cst_10 = arith.constant dense<0.000000e+00> : vector<8x128xf32>
    %21 = tpu.matmul %6, %20, %cst_10 {dimension_numbers = #tpu.dot_dimension_numbers<[1], [1], [0], [0], [0, 0, 1, 0], [], []>} : vector<8x128xf32>, vector<128x128xf32>, vector<8x128xf32> -> vector<8x128xf32>
    %c0_11 = arith.constant 0 : index
    %c0_12 = arith.constant 0 : index
    %c0_13 = arith.constant 0 : index
    %22 = vector.load %arg3[%c0_11, %c0_12, %c0_13] : memref<4x32x8xf32, #tpu.memory_space<vmem>>, vector<1x32x8xf32>
    %23 = vector.shape_cast %22 : vector<1x32x8xf32> to vector<32x8xf32>
    %cst_14 = arith.constant dense<0.000000e+00> : vector<32x128xf32>
    %24 = tpu.matmul %23, %21, %cst_14 {dimension_numbers = #tpu.dot_dimension_numbers<[1], [0], [0], [1], [0, 0, 1, 1], [], []>} : vector<32x8xf32>, vector<8x128xf32>, vector<32x128xf32> -> vector<32x128xf32>
    %25 = arith.addf %3, %24 : vector<32x128xf32>
    %26 = vector.extract_strided_slice %2 {offsets = [8, 0], sizes = [8, 128], strides = [1, 1]} : vector<96x128xf32> to vector<8x128xf32>
    %27 = vector.extract_strided_slice %2 {offsets = [40, 0], sizes = [8, 128], strides = [1, 1]} : vector<96x128xf32> to vector<8x128xf32>
    %28 = vector.extract_strided_slice %2 {offsets = [72, 0], sizes = [8, 128], strides = [1, 1]} : vector<96x128xf32> to vector<8x128xf32>
    %cst_15 = arith.constant dense<0.000000e+00> : vector<128x128xf32>
    %29 = tpu.matmul %26, %27, %cst_15 {dimension_numbers = #tpu.dot_dimension_numbers<[0], [0], [1], [1], [0, 1, 1, 1], [], []>} : vector<8x128xf32>, vector<8x128xf32>, vector<128x128xf32> -> vector<128x128xf32>
    %c1 = arith.constant 1 : index
    %c0_16 = arith.constant 0 : index
    %c0_17 = arith.constant 0 : index
    %30 = vector.load %arg5[%c1, %c0_16, %c0_17] : memref<4x128x128xf32, #tpu.memory_space<vmem>>, vector<1x128x128xf32>
    %31 = vector.shape_cast %30 : vector<1x128x128xf32> to vector<128x128xf32>
    %32 = arith.addf %29, %31 : vector<128x128xf32>
    %cst_18 = arith.constant dense<0xFF800000> : vector<128xf32>
    %33 = vector.multi_reduction <maximumf>, %32, %cst_18 [1] : vector<128x128xf32> to vector<128xf32>
    %34 = vector.shape_cast %33 : vector<128xf32> to vector<128x1xf32>
    %35 = vector.broadcast %34 : vector<128x1xf32> to vector<128x128xf32>
    %36 = arith.subf %32, %35 : vector<128x128xf32>
    %37 = math.exp %36 : vector<128x128xf32>
    %cst_19 = arith.constant dense<0.000000e+00> : vector<128xf32>
    %38 = vector.multi_reduction <add>, %37, %cst_19 [1] : vector<128x128xf32> to vector<128xf32>
    %39 = vector.shape_cast %38 : vector<128xf32> to vector<128x1xf32>
    %40 = tpu.reciprocal %39 : vector<128x1xf32> -> vector<128x1xf32>
    %41 = vector.broadcast %40 : vector<128x1xf32> to vector<128x128xf32>
    %42 = arith.mulf %37, %41 : vector<128x128xf32>
    %cst_20 = arith.constant dense<0.000000e+00> : vector<8x128xf32>
    %43 = tpu.matmul %28, %42, %cst_20 {dimension_numbers = #tpu.dot_dimension_numbers<[1], [1], [0], [0], [0, 0, 1, 0], [], []>} : vector<8x128xf32>, vector<128x128xf32>, vector<8x128xf32> -> vector<8x128xf32>
    %c1_21 = arith.constant 1 : index
    %c0_22 = arith.constant 0 : index
    %c0_23 = arith.constant 0 : index
    %44 = vector.load %arg3[%c1_21, %c0_22, %c0_23] : memref<4x32x8xf32, #tpu.memory_space<vmem>>, vector<1x32x8xf32>
    %45 = vector.shape_cast %44 : vector<1x32x8xf32> to vector<32x8xf32>
    %cst_24 = arith.constant dense<0.000000e+00> : vector<32x128xf32>
    %46 = tpu.matmul %45, %43, %cst_24 {dimension_numbers = #tpu.dot_dimension_numbers<[1], [0], [0], [1], [0, 0, 1, 1], [], []>} : vector<32x8xf32>, vector<8x128xf32>, vector<32x128xf32> -> vector<32x128xf32>
    %47 = arith.addf %25, %46 : vector<32x128xf32>
    %48 = vector.extract_strided_slice %2 {offsets = [16, 0], sizes = [8, 128], strides = [1, 1]} : vector<96x128xf32> to vector<8x128xf32>
    %49 = vector.extract_strided_slice %2 {offsets = [48, 0], sizes = [8, 128], strides = [1, 1]} : vector<96x128xf32> to vector<8x128xf32>
    %50 = vector.extract_strided_slice %2 {offsets = [80, 0], sizes = [8, 128], strides = [1, 1]} : vector<96x128xf32> to vector<8x128xf32>
    %cst_25 = arith.constant dense<0.000000e+00> : vector<128x128xf32>
    %51 = tpu.matmul %48, %49, %cst_25 {dimension_numbers = #tpu.dot_dimension_numbers<[0], [0], [1], [1], [0, 1, 1, 1], [], []>} : vector<8x128xf32>, vector<8x128xf32>, vector<128x128xf32> -> vector<128x128xf32>
    %c2 = arith.constant 2 : index
    %c0_26 = arith.constant 0 : index
    %c0_27 = arith.constant 0 : index
    %52 = vector.load %arg5[%c2, %c0_26, %c0_27] : memref<4x128x128xf32, #tpu.memory_space<vmem>>, vector<1x128x128xf32>
    %53 = vector.shape_cast %52 : vector<1x128x128xf32> to vector<128x128xf32>
    %54 = arith.addf %51, %53 : vector<128x128xf32>
    %cst_28 = arith.constant dense<0xFF800000> : vector<128xf32>
    %55 = vector.multi_reduction <maximumf>, %54, %cst_28 [1] : vector<128x128xf32> to vector<128xf32>
    %56 = vector.shape_cast %55 : vector<128xf32> to vector<128x1xf32>
    %57 = vector.broadcast %56 : vector<128x1xf32> to vector<128x128xf32>
    %58 = arith.subf %54, %57 : vector<128x128xf32>
    %59 = math.exp %58 : vector<128x128xf32>
    %cst_29 = arith.constant dense<0.000000e+00> : vector<128xf32>
    %60 = vector.multi_reduction <add>, %59, %cst_29 [1] : vector<128x128xf32> to vector<128xf32>
    %61 = vector.shape_cast %60 : vector<128xf32> to vector<128x1xf32>
    %62 = tpu.reciprocal %61 : vector<128x1xf32> -> vector<128x1xf32>
    %63 = vector.broadcast %62 : vector<128x1xf32> to vector<128x128xf32>
    %64 = arith.mulf %59, %63 : vector<128x128xf32>
    %cst_30 = arith.constant dense<0.000000e+00> : vector<8x128xf32>
    %65 = tpu.matmul %50, %64, %cst_30 {dimension_numbers = #tpu.dot_dimension_numbers<[1], [1], [0], [0], [0, 0, 1, 0], [], []>} : vector<8x128xf32>, vector<128x128xf32>, vector<8x128xf32> -> vector<8x128xf32>
    %c2_31 = arith.constant 2 : index
    %c0_32 = arith.constant 0 : index
    %c0_33 = arith.constant 0 : index
    %66 = vector.load %arg3[%c2_31, %c0_32, %c0_33] : memref<4x32x8xf32, #tpu.memory_space<vmem>>, vector<1x32x8xf32>
    %67 = vector.shape_cast %66 : vector<1x32x8xf32> to vector<32x8xf32>
    %cst_34 = arith.constant dense<0.000000e+00> : vector<32x128xf32>
    %68 = tpu.matmul %67, %65, %cst_34 {dimension_numbers = #tpu.dot_dimension_numbers<[1], [0], [0], [1], [0, 0, 1, 1], [], []>} : vector<32x8xf32>, vector<8x128xf32>, vector<32x128xf32> -> vector<32x128xf32>
    %69 = arith.addf %47, %68 : vector<32x128xf32>
    %70 = vector.extract_strided_slice %2 {offsets = [24, 0], sizes = [8, 128], strides = [1, 1]} : vector<96x128xf32> to vector<8x128xf32>
    %71 = vector.extract_strided_slice %2 {offsets = [56, 0], sizes = [8, 128], strides = [1, 1]} : vector<96x128xf32> to vector<8x128xf32>
    %72 = vector.extract_strided_slice %2 {offsets = [88, 0], sizes = [8, 128], strides = [1, 1]} : vector<96x128xf32> to vector<8x128xf32>
    %cst_35 = arith.constant dense<0.000000e+00> : vector<128x128xf32>
    %73 = tpu.matmul %70, %71, %cst_35 {dimension_numbers = #tpu.dot_dimension_numbers<[0], [0], [1], [1], [0, 1, 1, 1], [], []>} : vector<8x128xf32>, vector<8x128xf32>, vector<128x128xf32> -> vector<128x128xf32>
    %c3 = arith.constant 3 : index
    %c0_36 = arith.constant 0 : index
    %c0_37 = arith.constant 0 : index
    %74 = vector.load %arg5[%c3, %c0_36, %c0_37] : memref<4x128x128xf32, #tpu.memory_space<vmem>>, vector<1x128x128xf32>
    %75 = vector.shape_cast %74 : vector<1x128x128xf32> to vector<128x128xf32>
    %76 = arith.addf %73, %75 : vector<128x128xf32>
    %cst_38 = arith.constant dense<0xFF800000> : vector<128xf32>
    %77 = vector.multi_reduction <maximumf>, %76, %cst_38 [1] : vector<128x128xf32> to vector<128xf32>
    %78 = vector.shape_cast %77 : vector<128xf32> to vector<128x1xf32>
    %79 = vector.broadcast %78 : vector<128x1xf32> to vector<128x128xf32>
    %80 = arith.subf %76, %79 : vector<128x128xf32>
    %81 = math.exp %80 : vector<128x128xf32>
    %cst_39 = arith.constant dense<0.000000e+00> : vector<128xf32>
    %82 = vector.multi_reduction <add>, %81, %cst_39 [1] : vector<128x128xf32> to vector<128xf32>
    %83 = vector.shape_cast %82 : vector<128xf32> to vector<128x1xf32>
    %84 = tpu.reciprocal %83 : vector<128x1xf32> -> vector<128x1xf32>
    %85 = vector.broadcast %84 : vector<128x1xf32> to vector<128x128xf32>
    %86 = arith.mulf %81, %85 : vector<128x128xf32>
    %cst_40 = arith.constant dense<0.000000e+00> : vector<8x128xf32>
    %87 = tpu.matmul %72, %86, %cst_40 {dimension_numbers = #tpu.dot_dimension_numbers<[1], [1], [0], [0], [0, 0, 1, 0], [], []>} : vector<8x128xf32>, vector<128x128xf32>, vector<8x128xf32> -> vector<8x128xf32>
    %c3_41 = arith.constant 3 : index
    %c0_42 = arith.constant 0 : index
    %c0_43 = arith.constant 0 : index
    %88 = vector.load %arg3[%c3_41, %c0_42, %c0_43] : memref<4x32x8xf32, #tpu.memory_space<vmem>>, vector<1x32x8xf32>
    %89 = vector.shape_cast %88 : vector<1x32x8xf32> to vector<32x8xf32>
    %cst_44 = arith.constant dense<0.000000e+00> : vector<32x128xf32>
    %90 = tpu.matmul %89, %87, %cst_44 {dimension_numbers = #tpu.dot_dimension_numbers<[1], [0], [0], [1], [0, 0, 1, 1], [], []>} : vector<32x8xf32>, vector<8x128xf32>, vector<32x128xf32> -> vector<32x128xf32>
    %91 = arith.addf %69, %90 : vector<32x128xf32>
    %c0_45 = arith.constant 0 : index
    %c0_46 = arith.constant 0 : index
    %92 = vector.load %arg4[%c0_45, %c0_46] : memref<32x1xf32, #tpu.memory_space<vmem>>, vector<32x1xf32>
    %93 = vector.broadcast %92 : vector<32x1xf32> to vector<32x128xf32>
    %94 = arith.addf %91, %93 : vector<32x128xf32>
    %c0_47 = arith.constant 0 : index
    %c0_48 = arith.constant 0 : index
    %95 = vector.load %arg6[%c0_47, %c0_48] : memref<32x128xf32, #tpu.memory_space<vmem>>, vector<32x128xf32>
    tpu.vector_store %arg6[%c0_47, %c0_48], %94 {strides = array<i32>} : memref<32x128xf32, #tpu.memory_space<vmem>>, vector<32x128xf32>,
    return
  }
  func.func @transform_0(%arg0: i32) -> (i32, i32) {
    %c0_i32 = arith.constant 0 : i32
    %c0_i32_0 = arith.constant 0 : i32
    %c0_i32_1 = arith.constant 0 : i32
    return %c0_i32, %c0_i32_0 : i32, i32
  }
  func.func @transform_1(%arg0: i32) -> (i32, i32) {
    %c0_i32 = arith.constant 0 : i32
    %c0_i32_0 = arith.constant 0 : i32
    %c0_i32_1 = arith.constant 0 : i32
    return %c0_i32, %c0_i32_0 : i32, i32
  }
  func.func @transform_2(%arg0: i32) -> (i32, i32, i32) {
    %c0_i32 = arith.constant 0 : i32
    %c0_i32_0 = arith.constant 0 : i32
    %c0_i32_1 = arith.constant 0 : i32
    %c0_i32_2 = arith.constant 0 : i32
    return %c0_i32, %c0_i32_0, %c0_i32_1 : i32, i32, i32
  }
  func.func @transform_3(%arg0: i32) -> (i32, i32) {
    %c0_i32 = arith.constant 0 : i32
    %c0_i32_0 = arith.constant 0 : i32
    %c0_i32_1 = arith.constant 0 : i32
    return %c0_i32, %c0_i32_0 : i32, i32
  }
  func.func @transform_4(%arg0: i32) -> (i32, i32, i32) {
    %c0_i32 = arith.constant 0 : i32
    %c0_i32_0 = arith.constant 0 : i32
    %c0_i32_1 = arith.constant 0 : i32
    %c0_i32_2 = arith.constant 0 : i32
    return %c0_i32, %c0_i32_0, %c0_i32_1 : i32, i32, i32
  }
  func.func @transform_5(%arg0: i32) -> (i32, i32) {
    %c0_i32 = arith.constant 0 : i32
    %c0_i32_0 = arith.constant 0 : i32
    %c0_i32_1 = arith.constant 0 : i32
    return %c0_i32, %c0_i32_0 : i32, i32
  }
}

</mosaic_0001>

<bundles_post_ra>
// kernel: tpu_custom_call.1
= control target key start
LH: loop header
LB: loop body
LE: loop exit
PB: predicated region body
PF: predicated region fallthrough
CT: control target
= control target key end

     0   :  { %10 = vsyncpa [#allocation3], 0  ;;  %s4731_s0 = inlined_call_operand.vmem [shape: f32[32,128], index: 0, kind: input, shape index: {}]   ;;  %s4732_s1 = inlined_call_operand.vmem [shape: f32[96,32], index: 1, kind: input, shape index: {}]   ;;  %s4733_s2 = inlined_call_operand.vmem [shape: f32[4,32,8], index: 2, kind: input, shape index: {}]   ;;  %s4734_s3 = inlined_call_operand.vmem [shape: f32[32,1], index: 3, kind: input, shape index: {}]   ;;  %s4735_s4 = inlined_call_operand.hbm [shape: f32[4,128,128], index: 4, kind: input, shape index: {}]   ;;  %s4736_s5 = inlined_call_operand.hbm [shape: f32[32,128], index: 5, kind: output, shape index: {}]  }
   0x1   :  { %11 = vsyncpa [#allocation4], 0  ;;  %s24_s20 = sshll.u32 %s4735_s4, 4  ;;  %s2946_s21 = smov [#allocation2]   ;;  %s25_s20 = int_to_ptr.hbm [resolvable:$true] %s24_s20 }
   0x2   :  { %s26_s22 = sshll.u32 %s2946_s21, 4  ;;  %s2947_s23 = smov 128   ;;  %s27_s22 = int_to_ptr.vmem [resolvable:$true] %s26_s22 }
   0x3   :  { %s2948_s24 = smov 8  }
   0x4   :  { %32 = dma.hbm_to_vmem [thread:$0]  %s25_s20, 8192, %s27_s22, [#allocation3], %s2947_s23, %s2947_s23, %s2948_s24  }
   0x5   :  { %2942 = dma.done.wait [#allocation3], 8192  }
   0x6   :  { %2943 = vsyncadd [#allocation3], 4294959104  ;;  %v40_v0 = vld [vmem:[%s4731_s0 + $0x18] sm:$0xff]  ;;  %v39_v1 = vld [vmem:[%s4731_s0 + $0x10] sm:$0xff]  ;;  %vm53_vm0 = vcmask 261120   ;;  %vm191_vm1 = vcmask 64512  }
   0x7   :  { %102 = vmatpush.msra.mxu0 %v40_v0  ;;  %2625 = vmatpush.msra.mxu1 %v40_v0  ;;  %v38_v2 = vld [vmem:[%s4731_s0 + $0x8] sm:$0xff]  ;;  %v37_v3 = vld [vmem:[%s4731_s0] sm:$0xff]  ;;  %v43_v6 = vld [vmem:[%s4732_s1 + $0x10] sm:$0xff]  ;;  %s2508_s20 = sshll.u32 %s4736_s5, 4  ;;  %s2509_s20 = int_to_ptr.hbm [resolvable:$true] %s2508_s20 }
   0x8   :  { %v41_v4 = vld [vmem:[%s4732_s1] sm:$0xff]  ;;  %v42_v5 = vld [vmem:[%s4732_s1 + $0x8] sm:$0xff]  ;;  %v44_v7 = vld [vmem:[%s4732_s1 + $0x18] sm:$0xff] }
   0x9   :  { %103 = vmatpush.msra.mxu0 %v39_v1  ;;  %2626 = vmatpush.msra.mxu1 %v39_v1  ;;  %v45_v8 = vld [vmem:[%s4732_s1 + $0x20] sm:$0xff]  ;;  %v52_v11 = vld [vmem:[%s4732_s1 + $0x58] sm:$0xff]  ;;  %v46_v15 = vld [vmem:[%s4732_s1 + $0x28] sm:$0xff] }
   0xa   :  { %v155_v58 = vld [vmem:[#allocation2 + $0x60] sm:$0xff]  ;;  %v156_v62 = vld [vmem:[#allocation2 + $0x68] sm:$0xff] }
   0xb   :  { %104 = vmatpush.msra.mxu0 %v38_v2  ;;  %2627 = vmatpush.msra.mxu1 %v38_v2  ;;  %v153_v2 = vld [vmem:[#allocation2 + $0x50] sm:$0xff] }
   0xd   :  { %105 = vmatpush.msra.mxu0 %v37_v3  ;;  %2628 = vmatpush.msra.mxu1 %v37_v3  ;;  %v157_v3 = vld [vmem:[#allocation2 + $0x70] sm:$0xff] }
   0xe   :  { %2521 = vmatmul.msk.f32.vlgmr.msra.gmra.mxu0 %vm53_vm0, %v41_v4  ;;  %2532 = vmatmul.msk.f32.vlgmr.msra.gmra.mxu1 %vm53_vm0, %v52_v11 }
  0x16   :  { %2522 = vmatmul.msk.f32.gmra.mxu0 %vm53_vm0, %v42_v5 }
  0x1e   :  { %2523 = vmatmul.msk.f32.gmra.mxu0 %vm53_vm0, %v43_v6 }
  0x26   :  { %2524 = vmatmul.msk.f32.gmra.mxu0 %vm53_vm0, %v44_v7  ;;  %v151_v7 = vld [vmem:[#allocation2 + $0x40] sm:$0xff] }
  0x2e   :  { %2525 = vmatmul.msk.f32.gmra.mxu0 %vm53_vm0, %v45_v8  ;;  %v158_v8 = vld [vmem:[#allocation2 + $0x78] sm:$0xff] }
  0x36   :  { %2526 = vmatmul.msk.f32.gmra.mxu0 %vm53_vm0, %v46_v15  ;;  %v154_v15 = vld [vmem:[#allocation2 + $0x58] sm:$0xff] }
  0x8b   :  { %v107_v9 = vpop.f32.mrf.mxu0  ;;  %v3046_v32 = vpop.f32.mrf.mxu1 }
  0x8c   :  { %159 = vxpose.xlu0.b32.start.end [1/1] (short) %v107_v9, 128  ;;  %4739 = vst [vmem:[#allocation8_spill] sm:$0xff] %v3046_v32 }
  0x93   :  { %v110_v10 = vpop.f32.mrf.mxu0 }
  0x9b   :  { %v3023_v12 = vpop.f32.mrf.mxu0 }
  0xa3   :  { %v3025_v13 = vpop.f32.mrf.mxu0 }
  0xab   :  { %v119_v14 = vpop.f32.mrf.mxu0 }
  0xac   :  { %255 = vmatpush.msrb.mxu1 %v119_v14  ;;  %v149_v14 = vld [vmem:[#allocation2 + $0x30] sm:$0xff] }
  0xb3   :  { %v122_v28 = vpop.f32.mrf.mxu0 }
  0xb4   :  { %793 = vmatpush.msra.mxu3 %v122_v28  ;;  %v148_v28 = vld [vmem:[#allocation2 + $0x28] sm:$0xff] }
 0x10c   :  { %698 = vxpose.xlu0.b32.start.end [1/1] (short) %v110_v10, 128 }
 0x130   :  { %v175_v16 = vpop.trf.xlu0 }
 0x131   :  { %2533 = vmatmul.msk.f32.vlgmr.msrb.gmra.mxu1 %vm191_vm1, %v175_v16 }
 0x138   :  { %v176_v17 = vpop.trf.xlu0 }
 0x139   :  { %2534 = vmatmul.msk.f32.gmra.mxu1 %vm191_vm1, %v176_v17 }
 0x140   :  { %v177_v18 = vpop.trf.xlu0 }
 0x141   :  { %2535 = vmatmul.msk.f32.gmra.mxu1 %vm191_vm1, %v177_v18  ;;  %v147_v18 = vld [vmem:[#allocation2 + $0x20] sm:$0xff] }
 0x148   :  { %v178_v19 = vpop.trf.xlu0 }
 0x149   :  { %2536 = vmatmul.msk.f32.gmra.mxu1 %vm191_vm1, %v178_v19  ;;  %v152_v19 = vld [vmem:[#allocation2 + $0x48] sm:$0xff] }
 0x150   :  { %v179_v20 = vpop.trf.xlu0 }
 0x151   :  { %2537 = vmatmul.msk.f32.gmra.mxu1 %vm191_vm1, %v179_v20 }
 0x158   :  { %v180_v21 = vpop.trf.xlu0 }
 0x159   :  { %2538 = vmatmul.msk.f32.gmra.mxu1 %vm191_vm1, %v180_v21 }
 0x160   :  { %v181_v22 = vpop.trf.xlu0 }
 0x161   :  { %2539 = vmatmul.msk.f32.gmra.mxu1 %vm191_vm1, %v181_v22 }
 0x168   :  { %v182_v23 = vpop.trf.xlu0 }
 0x169   :  { %2540 = vmatmul.msk.f32.gmra.mxu1 %vm191_vm1, %v182_v23 }
 0x170   :  { %v183_v24 = vpop.trf.xlu0 }
 0x171   :  { %2541 = vmatmul.msk.f32.gmra.mxu1 %vm191_vm1, %v183_v24  ;;  %v150_v24 = vld [vmem:[#allocation2 + $0x38] sm:$0xff] }
 0x178   :  { %v184_v25 = vpop.trf.xlu0 }
 0x179   :  { %2542 = vmatmul.msk.f32.gmra.mxu1 %vm191_vm1, %v184_v25 }
 0x180   :  { %v185_v26 = vpop.trf.xlu0 }
 0x181   :  { %2543 = vmatmul.msk.f32.gmra.mxu1 %vm191_vm1, %v185_v26 }
 0x188   :  { %v186_v27 = vpop.trf.xlu0 }
 0x189   :  { %2544 = vmatmul.msk.f32.gmra.mxu1 %vm191_vm1, %v186_v27 }
 0x190   :  { %v187_v29 = vpop.trf.xlu0 }
 0x191   :  { %2545 = vmatmul.msk.f32.gmra.mxu1 %vm191_vm1, %v187_v29 }
 0x198   :  { %v188_v30 = vpop.trf.xlu0 }
 0x199   :  { %2546 = vmatmul.msk.f32.gmra.mxu1 %vm191_vm1, %v188_v30 }
 0x1a0   :  { %v189_v31 = vpop.trf.xlu0 }
 0x1a1   :  { %2547 = vmatmul.msk.f32.gmra.mxu1 %vm191_vm1, %v189_v31  ;;  %v146_v31 = vld [vmem:[#allocation2 + $0x18] sm:$0xff] }
 0x1a8   :  { %v190_v33 = vpop.trf.xlu0 }
 0x1a9   :  { %2548 = vmatmul.msk.f32.gmra.mxu1 %vm191_vm1, %v190_v33 }
 0x1ae   :  { %v3049_v34 = vpop.f32.mrf.mxu1 }
 0x1b0   :  { %v714_v35 = vpop.trf.xlu0 }
 0x1b1   :  { %2549 = vmatmul.msk.f32.vlgmr.msra.gmra.mxu3 %vm191_vm1, %v714_v35 }
 0x1b6   :  { %v3052_v36 = vpop.f32.mrf.mxu1 }
 0x1b8   :  { %v715_v37 = vpop.trf.xlu0 }
 0x1b9   :  { %2550 = vmatmul.msk.f32.gmra.mxu3 %vm191_vm1, %v715_v37  ;;  %v145_v37 = vld [vmem:[#allocation2 + $0x10] sm:$0xff] }
 0x1be   :  { %v3055_v38 = vpop.f32.mrf.mxu1 }
 0x1c0   :  { %v716_v39 = vpop.trf.xlu0 }
 0x1c1   :  { %2551 = vmatmul.msk.f32.gmra.mxu3 %vm191_vm1, %v716_v39 }
 0x1c6   :  { %v3058_v40 = vpop.f32.mrf.mxu1 }
 0x1c7   :  { %v3115_v35 = vadd.f32 %v3058_v40, %v146_v31  ;;  %v143_v40 = vld [vmem:[#allocation2] sm:$0xff] }
 0x1c8   :  { %v717_v41 = vpop.trf.xlu0 }
 0x1c9   :  { %2552 = vmatmul.msk.f32.gmra.mxu3 %vm191_vm1, %v717_v41  ;;  %v3121_v41 = vadd.f32 %v3055_v38, %v145_v37 }
 0x1ce   :  { %v269_v42 = vpop.f32.mrf.mxu1 }
 0x1cf   :  { %v3094_v22 = vadd.f32 %v269_v42, %v147_v18  ;;  %v144_v42 = vld [vmem:[#allocation2 + $0x8] sm:$0xff] }
 0x1d0   :  { %v718_v43 = vpop.trf.xlu0 }
 0x1d1   :  { %2553 = vmatmul.msk.f32.gmra.mxu3 %vm191_vm1, %v718_v43 }
 0x1d6   :  { %v3062_v44 = vpop.f32.mrf.mxu1 }
 0x1d7   :  { %v3109_v30 = vadd.f32 %v3062_v44, %v148_v28  ;;  %v3127_v44 = vadd.f32 %v3052_v36, %v144_v42 }
 0x1d8   :  { %v719_v45 = vpop.trf.xlu0 }
 0x1d9   :  { %2554 = vmatmul.msk.f32.gmra.mxu3 %vm191_vm1, %v719_v45 }
 0x1de   :  { %v275_v46 = vpop.f32.mrf.mxu1 }
 0x1df   :  { %v3085_v16 = vadd.f32 %v275_v46, %v149_v14  ;;  %v3133_v46 = vadd.f32 %v3049_v34, %v143_v40  ;;  %v695_v34 = vld [vmem:[#allocation2 + $0xe8] sm:$0xff] }
 0x1e0   :  { %v720_v47 = vpop.trf.xlu0 }
 0x1e1   :  { %2555 = vmatmul.msk.f32.gmra.mxu3 %vm191_vm1, %v720_v47 }
 0x1e6   :  { %v278_v48 = vpop.f32.mrf.mxu1 }
 0x1e7   :  { %v3103_v27 = vadd.f32 %v278_v48, %v150_v24 }
 0x1e8   :  { %v721_v49 = vpop.trf.xlu0 }
 0x1e9   :  { %2556 = vmatmul.msk.f32.gmra.mxu3 %vm191_vm1, %v721_v49 }
 0x1ee   :  { %v281_v50 = vpop.f32.mrf.mxu1 }
 0x1ef   :  { %v3082_v10 = vadd.f32 %v281_v50, %v151_v7 }
 0x1f0   :  { %v722_v51 = vpop.trf.xlu0 }
 0x1f1   :  { %2557 = vmatmul.msk.f32.gmra.mxu3 %vm191_vm1, %v722_v51 }
 0x1f6   :  { %v284_v52 = vpop.f32.mrf.mxu1 }
 0x1f7   :  { %v3096_v23 = vadd.f32 %v284_v52, %v152_v19 }
 0x1f8   :  { %v723_v53 = vpop.trf.xlu0 }
 0x1f9   :  { %2558 = vmatmul.msk.f32.gmra.mxu3 %vm191_vm1, %v723_v53 }
 0x1fe   :  { %v287_v54 = vpop.f32.mrf.mxu1 }
 0x1ff   :  { %v3079_v5 = vadd.f32 %v287_v54, %v153_v2 }
 0x200   :  { %v724_v55 = vpop.trf.xlu0 }
 0x201   :  { %2559 = vmatmul.msk.f32.gmra.mxu3 %vm191_vm1, %v724_v55 }
 0x206   :  { %v290_v56 = vpop.f32.mrf.mxu1 }
 0x207   :  { %v3087_v17 = vadd.f32 %v290_v56, %v154_v15 }
 0x208   :  { %v725_v57 = vpop.trf.xlu0 }
 0x209   :  { %2560 = vmatmul.msk.f32.gmra.mxu3 %vm191_vm1, %v725_v57 }
 0x20e   :  { %v293_v59 = vpop.f32.mrf.mxu1 }
 0x20f   :  { %v3071_v60 = vadd.f32 %v293_v59, %v155_v58 }
 0x210   :  { %v726_v61 = vpop.trf.xlu0 }
 0x211   :  { %329 = vmax.xlane.f32.xlu2 %v3071_v60  ;;  %2561 = vmatmul.msk.f32.gmra.mxu3 %vm191_vm1, %v726_v61 }
 0x216   :  { %v296_v63 = vpop.f32.mrf.mxu1 }
 0x217   :  { %v3075_v0 = vadd.f32 %v296_v63, %v156_v62 }
 0x218   :  { %v727_v1 = vpop.trf.xlu0 }
 0x219   :  { %331 = vmax.xlane.f32.xlu2 %v3075_v0  ;;  %2562 = vmatmul.msk.f32.gmra.mxu3 %vm191_vm1, %v727_v1 }
 0x21e   :  { %v299_v4 = vpop.f32.mrf.mxu1 }
 0x21f   :  { %v300_v6 = vadd.f32 %v299_v4, %v157_v3 }
 0x220   :  { %v728_v21 = vpop.trf.xlu0 }
 0x221   :  { %333 = vmax.xlane.f32.xlu1 %v300_v6  ;;  %325 = vmax.xlane.f32.xlu2 %v3079_v5 }
 0x222   :  { %2563 = vmatmul.msk.f32.gmra.mxu3 %vm191_vm1, %v728_v21 }
 0x226   :  { %v302_v9 = vpop.f32.mrf.mxu1 }
 0x227   :  { %v303_v11 = vadd.f32 %v302_v9, %v158_v8 }
 0x228   :  { %v729_v26 = vpop.trf.xlu0 }
 0x229   :  { %335 = vmax.xlane.f32.xlu1 %v303_v11  ;;  %321 = vmax.xlane.f32.xlu2 %v3082_v10 }
 0x22a   :  { %2564 = vmatmul.msk.f32.gmra.mxu3 %vm191_vm1, %v729_v26 }
 0x231   :  { %327 = vmax.xlane.f32.xlu1 %v3087_v17  ;;  %317 = vmax.xlane.f32.xlu2 %v3085_v16 }
 0x234   :  { %v3091_v20 = vpop.f32.mrf.mxu3 }
 0x239   :  { %323 = vmax.xlane.f32.xlu1 %v3096_v23  ;;  %313 = vmax.xlane.f32.xlu2 %v3094_v22 }
 0x23c   :  { %v3100_v25 = vpop.f32.mrf.mxu3 }
 0x241   :  { %319 = vmax.xlane.f32.xlu1 %v3103_v27 }
 0x244   :  { %v3106_v29 = vpop.f32.mrf.mxu3 }
 0x249   :  { %315 = vmax.xlane.f32.xlu1 %v3109_v30 }
 0x24c   :  { %v3112_v33 = vpop.f32.mrf.mxu3 }
 0x251   :  { %311 = vmax.xlane.f32.xlu1 %v3115_v35 }
 0x254   :  { %v3118_v39 = vpop.f32.mrf.mxu3 }
 0x259   :  { %309 = vmax.xlane.f32.xlu1 %v3121_v41 }
 0x25c   :  { %v3124_v43 = vpop.f32.mrf.mxu3 }
 0x261   :  { %307 = vmax.xlane.f32.xlu1 %v3127_v44 }
 0x264   :  { %v3130_v45 = vpop.f32.mrf.mxu3 }
 0x269   :  { %305 = vmax.xlane.f32.xlu1 %v3133_v46 }
 0x26c   :  { %v3136_v38 = vpop.f32.mrf.mxu3 }
 0x274   :  { %v3138_v47 = vpop.f32.mrf.mxu3 }
 0x27c   :  { %v3140_v48 = vpop.f32.mrf.mxu3 }
 0x284   :  { %v3142_v49 = vpop.f32.mrf.mxu3  ;;  %v330_v50 = vpop.xlane.xlu2 %329 }
 0x285   :  { %v349_v7 = vsub.f32 %v3071_v60, %v330_v50 }
 0x28c   :  { %v3144_v36 = vpop.f32.mrf.mxu3  ;;  %v332_v56 = vpop.xlane.xlu2 %331 }
 0x28d   :  { %v350_v63 = vsub.f32 %v3075_v0, %v332_v56  ;;  %v377_v0 = vmul.f32 1.442695, %v349_v7 }
 0x28f   :  { %v379_v1 = vmul.f32 1.442695, %v350_v63 }
 0x294   :  { %v334_v51 = vpop.xlane.xlu1 %333  ;;  %v3146_v53 = vpop.f32.mrf.mxu3 }
 0x295   :  { %v351_v52 = vsub.f32 %v300_v6, %v334_v51  ;;  %v326_v8 = vpop.xlane.xlu2 %325 }
 0x297   :  { %v381_v54 = vmul.f32 1.442695, %v351_v52 }
 0x299   :  { %2638 = vpow2.f32 %v381_v54 }
 0x29c   :  { %v336_v55 = vpop.xlane.xlu1 %335  ;;  %v834_v58 = vpop.f32.mrf.mxu3 }
 0x29d   :  { %v352_v57 = vsub.f32 %v303_v11, %v336_v55  ;;  %v3148_v59 = vadd.f32 %v834_v58, %v695_v34  ;;  %v322_v60 = vpop.xlane.xlu2 %321 }
 0x29e   :  { %v345_v31 = vsub.f32 %v3082_v10, %v322_v60 }
 0x29f   :  { %v3150_v61 = vpop.eup %2638  ;;  %v383_v62 = vmul.f32 1.442695, %v352_v57  ;;  %869 = vmax.xlane.f32.xlu0 %v3148_v59 }
 0x2a0   :  { %413 = vadd.xlane.f32.xlu2 %v3150_v61 }
 0x2a1   :  { %2640 = vpow2.f32 %v383_v62 }
 0x2a2   :  { %2642 = vpow2.f32 %v379_v1 }
 0x2a4   :  { %v328_v2 = vpop.xlane.xlu1 %327 }
 0x2a5   :  { %v348_v3 = vsub.f32 %v3087_v17, %v328_v2  ;;  %v347_v17 = vsub.f32 %v3079_v5, %v326_v8  ;;  %v369_v5 = vmul.f32 1.442695, %v345_v31  ;;  %v318_v37 = vpop.xlane.xlu2 %317  ;;  %v837_v8 = vpop.f32.mrf.mxu3  ;;  %v692_v31 = vld [vmem:[#allocation2 + $0xd0] sm:$0xff] }
 0x2a6   :  { %v343_v52 = vsub.f32 %v3085_v16, %v318_v37  ;;  %v3224_v37 = vadd.f32 %v3142_v49, %v692_v31  ;;  %v688_v49 = vld [vmem:[#allocation2 + $0xb0] sm:$0xff] }
 0x2a7   :  { %v3156_v4 = vpop.eup %2640  ;;  %v375_v6 = vmul.f32 1.442695, %v348_v3  ;;  %v373_v19 = vmul.f32 1.442695, %v347_v17 }
 0x2a8   :  { %415 = vadd.xlane.f32.xlu2 %v3156_v4  ;;  %v3161_v14 = vpop.eup %2642  ;;  %v365_v10 = vmul.f32 1.442695, %v343_v52 }
 0x2a9   :  { %2644 = vpow2.f32 %v375_v6 }
 0x2aa   :  { %2646 = vpow2.f32 %v377_v0 }
 0x2ac   :  { %v324_v9 = vpop.xlane.xlu1 %323 }
 0x2ad   :  { %v346_v11 = vsub.f32 %v3096_v23, %v324_v9  ;;  %v840_v17 = vpop.f32.mrf.mxu3 }
 0x2af   :  { %v3163_v15 = vpop.eup %2644  ;;  %v371_v18 = vmul.f32 1.442695, %v346_v11 }
 0x2b0   :  { %411 = vadd.xlane.f32.xlu2 %v3161_v14  ;;  %407 = vadd.xlane.f32.xlu1 %v3163_v15  ;;  %v3169_v26 = vpop.eup %2646 }
 0x2b1   :  { %2648 = vpow2.f32 %v371_v18 }
 0x2b2   :  { %2650 = vpow2.f32 %v373_v19 }
 0x2b4   :  { %v320_v21 = vpop.xlane.xlu1 %319 }
 0x2b5   :  { %v344_v24 = vsub.f32 %v3103_v27, %v320_v21  ;;  %v694_v21 = vld [vmem:[#allocation2 + $0xe0] sm:$0xff] }
 0x2b7   :  { %v3171_v23 = vpop.eup %2648  ;;  %v367_v28 = vmul.f32 1.442695, %v344_v24 }
 0x2b8   :  { %409 = vadd.xlane.f32.xlu2 %v3169_v26  ;;  %403 = vadd.xlane.f32.xlu1 %v3171_v23  ;;  %v3177_v50 = vpop.eup %2650 }
 0x2b9   :  { %2652 = vpow2.f32 %v367_v28  ;;  %v3219_v28 = vadd.f32 %v3146_v53, %v694_v21 }
 0x2ba   :  { %2654 = vpow2.f32 %v369_v5  ;;  %v693_v5 = vld [vmem:[#allocation2 + $0xd8] sm:$0xff] }
 0x2bc   :  { %v316_v42 = vpop.xlane.xlu1 %315 }
 0x2bd   :  { %v342_v40 = vsub.f32 %v3109_v30, %v316_v42  ;;  %v314_v30 = vpop.xlane.xlu2 %313  ;;  %v3227_v42 = vadd.f32 %v3144_v36, %v693_v5  ;;  %v3240_v36 = vadd.f32 %v3130_v45, %v688_v49 }
 0x2be   :  { %v341_v16 = vsub.f32 %v3094_v22, %v314_v30 }
 0x2bf   :  { %v3179_v27 = vpop.eup %2652  ;;  %v363_v51 = vmul.f32 1.442695, %v342_v40  ;;  %v690_v40 = vld [vmem:[#allocation2 + $0xc0] sm:$0xff] }
 0x2c0   :  { %405 = vadd.xlane.f32.xlu2 %v3177_v50  ;;  %399 = vadd.xlane.f32.xlu1 %v3179_v27  ;;  %v3185_v55 = vpop.eup %2654  ;;  %v361_v62 = vmul.f32 1.442695, %v341_v16  ;;  %v3232_v53 = vadd.f32 %v3138_v47, %v690_v40  ;;  %v686_v47 = vld [vmem:[#allocation2 + $0xa0] sm:$0xff] }
 0x2c1   :  { %2656 = vpow2.f32 %v363_v51  ;;  %v691_v51 = vld [vmem:[#allocation2 + $0xc8] sm:$0xff] }
 0x2c2   :  { %2658 = vpow2.f32 %v365_v10  ;;  %v3235_v52 = vadd.f32 %v3140_v48, %v691_v51  ;;  %v689_v10 = vld [vmem:[#allocation2 + $0xb8] sm:$0xff]  ;;  %v3248_v48 = vadd.f32 %v3118_v39, %v686_v47 }
 0x2c4   :  { %v312_v54 = vpop.xlane.xlu1 %311 }
 0x2c5   :  { %v340_v34 = vsub.f32 %v3115_v35, %v312_v54  ;;  %v3243_v54 = vadd.f32 %v3136_v38, %v689_v10  ;;  %v47_v38 = vld [vmem:[%s4732_s1 + $0x30] sm:$0xff] }
 0x2c6   :  { %2527 = vmatmul.msk.f32.gmra.mxu0 %vm53_vm0, %v47_v38 }
 0x2c7   :  { %v3187_v56 = vpop.eup %2656  ;;  %v359_v57 = vmul.f32 1.442695, %v340_v34  ;;  %v687_v34 = vld [vmem:[#allocation2 + $0xa8] sm:$0xff] }
 0x2c8   :  { %401 = vadd.xlane.f32.xlu2 %v3185_v55  ;;  %395 = vadd.xlane.f32.xlu1 %v3187_v56  ;;  %v3192_v63 = vpop.eup %2658  ;;  %v3251_v30 = vadd.f32 %v3124_v43, %v687_v34 }
 0x2c9   :  { %2660 = vpow2.f32 %v359_v57  ;;  %v685_v57 = vld [vmem:[#allocation2 + $0x98] sm:$0xff] }
 0x2ca   :  { %2662 = vpow2.f32 %v361_v62  ;;  %v3260_v16 = vadd.f32 %v3112_v33, %v685_v57  ;;  %v684_v62 = vld [vmem:[#allocation2 + $0x90] sm:$0xff] }
 0x2cc   :  { %v310_v58 = vpop.xlane.xlu1 %309 }
 0x2cd   :  { %v339_v35 = vsub.f32 %v3121_v41, %v310_v58 }
 0x2cf   :  { %v3194_v1 = vpop.eup %2660  ;;  %v357_v2 = vmul.f32 1.442695, %v339_v35  ;;  %v48_v35 = vld [vmem:[%s4732_s1 + $0x38] sm:$0xff] }
 0x2d0   :  { %397 = vadd.xlane.f32.xlu2 %v3192_v63  ;;  %391 = vadd.xlane.f32.xlu1 %v3194_v1  ;;  %v3200_v7 = vpop.eup %2662 }
 0x2d1   :  { %2664 = vpow2.f32 %v357_v2  ;;  %2528 = vmatmul.msk.f32.gmra.mxu0 %vm53_vm0, %v48_v35  ;;  %v3268_v2 = vadd.f32 %v3106_v29, %v684_v62  ;;  %v682_v62 = vld [vmem:[#allocation2 + $0x80] sm:$0xff] }
 0x2d4   :  { %v308_v3 = vpop.xlane.xlu1 %307 }
 0x2d5   :  { %v338_v6 = vsub.f32 %v3127_v44, %v308_v3  ;;  %v697_v44 = vld [vmem:[#allocation2 + $0xf8] sm:$0xff] }
 0x2d6   :  { %v3210_v60 = vadd.f32 %v840_v17, %v697_v44 }
 0x2d7   :  { %v355_v22 = vmul.f32 1.442695, %v338_v6  ;;  %v3204_v9 = vpop.eup %2664 }
 0x2d8   :  { %393 = vadd.xlane.f32.xlu2 %v3200_v7 }
 0x2d9   :  { %2666 = vpow2.f32 %v355_v22 }
 0x2dc   :  { %v306_v0 = vpop.xlane.xlu1 %305 }
 0x2dd   :  { %v337_v41 = vsub.f32 %v3133_v46, %v306_v0  ;;  %v696_v46 = vld [vmem:[#allocation2 + $0xf0] sm:$0xff]  ;;  %v683_v0 = vld [vmem:[#allocation2 + $0x88] sm:$0xff] }
 0x2de   :  { %v3216_v24 = vadd.f32 %v837_v8, %v696_v46  ;;  %v3282_v44 = vadd.f32 %v3100_v25, %v683_v0 }
 0x2df   :  { %v3206_v11 = vpop.eup %2666  ;;  %v353_v18 = vmul.f32 1.442695, %v337_v41 }
 0x2e0   :  { %389 = vadd.xlane.f32.xlu2 %v3204_v9  ;;  %387 = vadd.xlane.f32.xlu1 %v3206_v11 }
 0x2e1   :  { %2668 = vpow2.f32 %v353_v18  ;;  %v49_v18 = vld [vmem:[%s4732_s1 + $0x40] sm:$0xff] }
 0x2e2   :  { %2529 = vmatmul.msk.f32.gmra.mxu0 %vm53_vm0, %v49_v18 }
 0x2e7   :  { %v3212_v19 = vpop.eup %2668 }
 0x2e8   :  { %385 = vadd.xlane.f32.xlu2 %v3212_v19  ;;  %873 = vmax.xlane.f32.xlu1 %v3210_v60 }
 0x2f0   :  { %871 = vmax.xlane.f32.xlu2 %v3216_v24  ;;  %867 = vmax.xlane.f32.xlu1 %v3219_v28 }
 0x2f8   :  { %865 = vmax.xlane.f32.xlu2 %v3227_v42  ;;  %863 = vmax.xlane.f32.xlu1 %v3224_v37 }
 0x300   :  { %861 = vmax.xlane.f32.xlu2 %v3235_v52  ;;  %859 = vmax.xlane.f32.xlu1 %v3232_v53 }
 0x308   :  { %857 = vmax.xlane.f32.xlu2 %v3243_v54  ;;  %855 = vmax.xlane.f32.xlu1 %v3240_v36 }
 0x310   :  { %853 = vmax.xlane.f32.xlu2 %v3251_v30  ;;  %851 = vmax.xlane.f32.xlu1 %v3248_v48 }
 0x313   :  { %v414_v45 = vpop.xlane.xlu2 %413 }
 0x314   :  { %2670 = vrcp.f32 %v414_v45  ;;  %vm618_vm4 = vweird.f32 %v414_v45  ;;  %v624_v5 = vand.u32 2147483648, %v414_v45  ;;  %v622_v49 = vand.u32 2147483647, %v414_v45 }
 0x316   :  { %vm623_vm9 = vcmp.eq.f32.partialorder %v622_v49, 8.507059e+37 }
 0x318   :  { %849 = vmax.xlane.f32.xlu2 %v3260_v16 }
 0x31a   :  { %v2671_v39 = vpop.eup %2670 }
 0x31b   :  { %v614_v43 = vmul.f32 %v2671_v39, %v414_v45  ;;  %v416_v58 = vpop.xlane.xlu2 %415  ;;  %vm619_vm2 = vweird.f32 %v2671_v39 }
 0x31c   :  { %2672 = vrcp.f32 %v416_v58  ;;  %v638_v17 = vand.u32 2147483648, %v416_v58  ;;  %v636_v21 = vand.u32 2147483647, %v416_v58  ;;  %vm632_vm5 = vweird.f32 %v416_v58  ;;  %vm3285_vm6 = vmor %vm618_vm4, %vm619_vm2 }
 0x31d   :  { %v615_v3 = vsub.f32 1.0, %v614_v43 }
 0x31e   :  { %v639_v25 = vor.u32 1.1754944e-38, %v638_v17  ;;  %vm637_vm8 = vcmp.eq.f32.partialorder %v636_v21, 8.507059e+37 }
 0x31f   :  { %v616_v41 = vmul.f32 %v2671_v39, %v615_v3  ;;  %v625_v3 = vor.u32 1.1754944e-38, %v624_v5 }
 0x320   :  { %847 = vmax.xlane.f32.xlu2 %v3268_v2 }
 0x321   :  { %v617_v31 = vadd.f32 %v2671_v39, %v616_v41  ;;  %v3301_v41 = vadd.f32 %v3091_v20, %v682_v62 }
 0x322   :  { %v2673_v33 = vpop.eup %2672 }
 0x323   :  { %v628_v6 = vmul.f32 %v2673_v33, %v416_v58  ;;  %v3271_v22 = vpop.xlane.xlu2 %411  ;;  %v3273_v8 = vpop.xlane.xlu1 %407  ;;  %vm633_vm3 = vweird.f32 %v2673_v33  ;;  %v621_v58 = vsel %vm3285_vm6, %v2671_v39, %v617_v31 }
 0x324   :  { %2674 = vrcp.f32 %v3271_v22  ;;  %vm634_vm7 = vmor %vm632_vm5, %vm633_vm3  ;;  %v610_v18 = vand.u32 2147483648, %v3271_v22  ;;  %v608_v17 = vand.u32 2147483647, %v3271_v22  ;;  %vm604_vm11 = vweird.f32 %v3271_v22 }
 0x325   :  { %2676 = vrcp.f32 %v3273_v8  ;;  %v629_v29 = vsub.f32 1.0, %v628_v6  ;;  %vm576_vm2 = vweird.f32 %v3273_v8 }
 0x326   :  { %v611_v20 = vor.u32 1.1754944e-38, %v610_v18  ;;  %vm609_vm13 = vcmp.eq.f32.partialorder %v608_v17, 8.507059e+37 }
 0x327   :  { %v630_v46 = vmul.f32 %v2673_v33, %v629_v29 }
 0x328   :  { %845 = vmax.xlane.f32.xlu2 %v3282_v44 }
 0x329   :  { %v631_v40 = vadd.f32 %v2673_v33, %v630_v46 }
 0x32a   :  { %v2675_v10 = vpop.eup %2674 }
 0x32b   :  { %v3289_v47 = vpop.eup %2676  ;;  %v600_v34 = vmul.f32 %v2675_v10, %v3271_v22  ;;  %v410_v57 = vpop.xlane.xlu2 %409  ;;  %v635_v43 = vsel %vm634_vm7, %v2673_v33, %v631_v40  ;;  %v626_v33 = vsel %vm623_vm9, %v625_v3, %v621_v58  ;;  %vm605_vm10 = vweird.f32 %v2675_v10 }
 0x32c   :  { %v3292_v38 = vpop.xlane.xlu1 %403  ;;  %v572_v35 = vmul.f32 %v3289_v47, %v3273_v8  ;;  %2678 = vrcp.f32 %v410_v57  ;;  %v640_v45 = vsel %vm637_vm8, %v639_v25, %v635_v43  ;;  %v655_v46 = vmul.f32 %v3150_v61, %v626_v33  ;;  %vm606_vm12 = vmor %vm604_vm11, %vm605_vm10 }
 0x32d   :  { %v601_v6 = vsub.f32 1.0, %v600_v34  ;;  %2680 = vrcp.f32 %v3292_v38  ;;  %v656_v0 = vmul.f32 %v3156_v4, %v640_v45  ;;  %v594_v62 = vand.u32 2147483647, %v410_v57 }
 0x32e   :  { %v573_v29 = vsub.f32 1.0, %v572_v35  ;;  %v596_v58 = vand.u32 2147483648, %v410_v57  ;;  %vm577_vm14 = vweird.f32 %v3289_v47  ;;  %v582_v3 = vand.u32 2147483648, %v3273_v8 }
 0x32f   :  { %657 = vmatpush.xpose.msra.mxu2 %v656_v0  ;;  %v602_v39 = vmul.f32 %v2675_v10, %v601_v6  ;;  %vm590_vm3 = vweird.f32 %v410_v57  ;;  %vm3324_vm4 = vmor %vm576_vm2, %vm577_vm14  ;;  %vm595_vm6 = vcmp.eq.f32.partialorder %v594_v62, 8.507059e+37  ;;  %vm548_vm10 = vweird.f32 %v3292_v38 }
 0x330   :  { %843 = vmax.xlane.f32.xlu2 %v3301_v41  ;;  %v574_v25 = vmul.f32 %v3289_v47, %v573_v29  ;;  %v597_v18 = vor.u32 1.1754944e-38, %v596_v58  ;;  %v554_v58 = vand.u32 2147483648, %v3292_v38 }
 0x331   :  { %v603_v21 = vadd.f32 %v2675_v10, %v602_v39 }
 0x332   :  { %v2679_v4 = vpop.eup %2678  ;;  %v575_v45 = vadd.f32 %v3289_v47, %v574_v25 }
 0x333   :  { %v3308_v31 = vpop.eup %2680  ;;  %v586_v5 = vmul.f32 %v2679_v4, %v410_v57  ;;  %658 = vmatpush.xpose.msra.mxu2 %v655_v46  ;;  %v3310_v40 = vpop.xlane.xlu2 %405  ;;  %v607_v49 = vsel %vm606_vm12, %v2675_v10, %v603_v21  ;;  %vm591_vm15 = vweird.f32 %v2679_v4 }
 0x334   :  { %v3312_v51 = vpop.xlane.xlu1 %399  ;;  %v544_v61 = vmul.f32 %v3308_v31, %v3292_v38  ;;  %2682 = vrcp.f32 %v3310_v40  ;;  %v612_v22 = vsel %vm609_vm13, %v611_v20, %v607_v49  ;;  %vm592_vm5 = vmor %vm590_vm3, %vm591_vm15  ;;  %v579_v57 = vsel %vm3324_vm4, %v3289_v47, %v575_v45 }
 0x335   :  { %v587_v34 = vsub.f32 1.0, %v586_v5  ;;  %2684 = vrcp.f32 %v3312_v51  ;;  %v654_v43 = vmul.f32 %v3161_v14, %v612_v22  ;;  %v580_v14 = vand.u32 2147483647, %v3273_v8 }
 0x336   :  { %v545_v35 = vsub.f32 1.0, %v544_v61  ;;  %v583_v49 = vor.u32 1.1754944e-38, %v582_v3  ;;  %v566_v22 = vand.u32 2147483647, %v3310_v40  ;;  %v568_v47 = vand.u32 2147483648, %v3310_v40 }
 0x337   :  { %659 = vmatpush.xpose.msra.mxu2 %v654_v43  ;;  %v588_v10 = vmul.f32 %v2679_v4, %v587_v34  ;;  %vm581_vm7 = vcmp.eq.f32.partialorder %v580_v14, 8.507059e+37  ;;  %vm549_vm8 = vweird.f32 %v3308_v31  ;;  %vm562_vm11 = vweird.f32 %v3310_v40 }
 0x338   :  { %v546_v20 = vmul.f32 %v3308_v31, %v545_v35  ;;  %vm3353_vm12 = vmor %vm548_vm10, %vm549_vm8  ;;  %v552_v45 = vand.u32 2147483647, %v3292_v38  ;;  %vm567_vm14 = vcmp.eq.f32.partialorder %v566_v22, 8.507059e+37  ;;  %vm520_vm4 = vweird.f32 %v3312_v51 }
 0x339   :  { %v589_v6 = vadd.f32 %v2679_v4, %v588_v10  ;;  %v526_v22 = vand.u32 2147483648, %v3312_v51 }
 0x33a   :  { %v2683_v33 = vpop.eup %2682  ;;  %v547_v62 = vadd.f32 %v3308_v31, %v546_v20  ;;  %v555_v20 = vor.u32 1.1754944e-38, %v554_v58  ;;  %vm553_vm15 = vcmp.eq.f32.partialorder %v552_v45, 8.507059e+37 }
 0x33b   :  { %v3329_v29 = vpop.eup %2684  ;;  %v558_v39 = vmul.f32 %v2683_v33, %v3310_v40  ;;  %v3332_v17 = vpop.xlane.xlu2 %401  ;;  %v593_v21 = vsel %vm592_vm5, %v2679_v4, %v589_v6  ;;  %v584_v4 = vsel %vm581_vm7, %v583_v49, %v579_v57  ;;  %vm563_vm9 = vweird.f32 %v2683_v33 }
 0x33c   :  { %v3334_v46 = vpop.xlane.xlu1 %395  ;;  %v516_v8 = vmul.f32 %v3329_v29, %v3312_v51  ;;  %2686 = vrcp.f32 %v3332_v17  ;;  %v598_v5 = vsel %vm595_vm6, %v597_v18, %v593_v21  ;;  %vm564_vm13 = vmor %vm562_vm11, %vm563_vm9  ;;  %v569_v6 = vor.u32 1.1754944e-38, %v568_v47 }
 0x33d   :  { %v559_v25 = vsub.f32 1.0, %v558_v39  ;;  %2688 = vrcp.f32 %v3334_v46  ;;  %v653_v61 = vmul.f32 %v3169_v26, %v598_v5  ;;  %v652_v26 = vmul.f32 %v3163_v15, %v584_v4 }
 0x33e   :  { %v517_v34 = vsub.f32 1.0, %v516_v8  ;;  %v551_v39 = vsel %vm3353_vm12, %v3308_v31, %v547_v62  ;;  %v538_v49 = vand.u32 2147483647, %v3332_v17  ;;  %v540_v31 = vand.u32 2147483648, %v3332_v17 }
 0x33f   :  { %660 = vmatpush.xpose.msra.mxu2 %v653_v61  ;;  %v560_v43 = vmul.f32 %v2683_v33, %v559_v25  ;;  %vm521_vm2 = vweird.f32 %v3329_v29  ;;  %vm534_vm5 = vweird.f32 %v3332_v17  ;;  %vm492_vm12 = vweird.f32 %v3334_v46 }
 0x340   :  { %v518_v38 = vmul.f32 %v3329_v29, %v517_v34  ;;  %vm3382_vm6 = vmor %vm520_vm4, %vm521_vm2  ;;  %vm539_vm8 = vcmp.eq.f32.partialorder %v538_v49, 8.507059e+37  ;;  %v541_v58 = vor.u32 1.1754944e-38, %v540_v31  ;;  %v496_v49 = vand.u32 2147483647, %v3334_v46 }
 0x341   :  { %v561_v35 = vadd.f32 %v2683_v33, %v560_v43  ;;  %v524_v43 = vand.u32 2147483647, %v3312_v51 }
 0x342   :  { %v2687_v3 = vpop.eup %2686  ;;  %v519_v4 = vadd.f32 %v3329_v29, %v518_v38 }
 0x343   :  { %v3358_v0 = vpop.eup %2688  ;;  %v530_v14 = vmul.f32 %v2687_v3, %v3332_v17  ;;  %v3361_v18 = vpop.xlane.xlu2 %397  ;;  %661 = vmatpush.xpose.msra.mxu2 %v652_v26  ;;  %v565_v40 = vsel %vm564_vm13, %v2683_v33, %v561_v35  ;;  %v556_v33 = vsel %vm553_vm15, %v555_v20, %v551_v39  ;;  %vm535_vm3 = vweird.f32 %v2687_v3 }
 0x344   :  { %v3363_v15 = vpop.xlane.xlu1 %391  ;;  %v488_v21 = vmul.f32 %v3358_v0, %v3334_v46  ;;  %2690 = vrcp.f32 %v3361_v18  ;;  %v570_v57 = vsel %vm567_vm14, %v569_v6, %v565_v40  ;;  %vm536_vm7 = vmor %vm534_vm5, %vm535_vm3  ;;  %v523_v17 = vsel %vm3382_vm6, %v3329_v29, %v519_v4 }
 0x345   :  { %v531_v8 = vsub.f32 1.0, %v530_v14  ;;  %2692 = vrcp.f32 %v3363_v15  ;;  %v651_v5 = vmul.f32 %v3177_v50, %v570_v57  ;;  %v650_v50 = vmul.f32 %v3171_v23, %v556_v33 }
 0x346   :  { %v489_v25 = vsub.f32 1.0, %v488_v21  ;;  %v527_v14 = vor.u32 1.1754944e-38, %v526_v22  ;;  %vm525_vm9 = vcmp.eq.f32.partialorder %v524_v43, 8.507059e+37  ;;  %v512_v21 = vand.u32 2147483648, %v3361_v18 }
 0x347   :  { %662 = vmatpush.xpose.msra.mxu2 %v651_v5  ;;  %v532_v61 = vmul.f32 %v2687_v3, %v531_v8  ;;  %vm493_vm10 = vweird.f32 %v3358_v0  ;;  %v498_v8 = vand.u32 2147483648, %v3334_v46  ;;  %vm506_vm13 = vweird.f32 %v3361_v18 }
 0x348   :  { %v490_v45 = vmul.f32 %v3358_v0, %v489_v25  ;;  %v528_v38 = vsel %vm525_vm9, %v527_v14, %v523_v17  ;;  %vm3408_vm14 = vmor %vm492_vm12, %vm493_vm10  ;;  %v513_v25 = vor.u32 1.1754944e-38, %v512_v21  ;;  %vm497_vm3 = vcmp.eq.f32.partialorder %v496_v49, 8.507059e+37 }
 0x349   :  { %v533_v47 = vadd.f32 %v2687_v3, %v532_v61  ;;  %vm464_vm6 = vweird.f32 %v3363_v15  ;;  %v470_v17 = vand.u32 2147483648, %v3363_v15 }
 0x34a   :  { %v2691_v62 = vpop.eup %2690  ;;  %v491_v20 = vadd.f32 %v3358_v0, %v490_v45 }
 0x34b   :  { %v3387_v26 = vpop.eup %2692  ;;  %v502_v35 = vmul.f32 %v2691_v62, %v3361_v18  ;;  %v3390_v10 = vpop.xlane.xlu2 %393  ;;  %663 = vmatpush.xpose.msra.mxu2 %v650_v50  ;;  %v537_v23 = vsel %vm536_vm7, %v2687_v3, %v533_v47  ;;  %v510_v3 = vand.u32 2147483647, %v3361_v18  ;;  %vm507_vm11 = vweird.f32 %v2691_v62 }
 0x34c   :  { %v460_v51 = vmul.f32 %v3387_v26, %v3363_v15  ;;  %2694 = vrcp.f32 %v3390_v10  ;;  %v542_v6 = vsel %vm539_vm8, %v541_v58, %v537_v23  ;;  %vm508_vm15 = vmor %vm506_vm13, %vm507_vm11  ;;  %v495_v18 = vsel %vm3408_vm14, %v3358_v0, %v491_v20 }
 0x34d   :  { %v503_v40 = vsub.f32 1.0, %v502_v35  ;;  %v649_v39 = vmul.f32 %v3185_v55, %v542_v6  ;;  %v648_v55 = vmul.f32 %v3179_v27, %v528_v38  ;;  %vm511_vm2 = vcmp.eq.f32.partialorder %v510_v3, 8.507059e+37 }
 0x34e   :  { %v461_v29 = vsub.f32 1.0, %v460_v51  ;;  %v499_v47 = vor.u32 1.1754944e-38, %v498_v8  ;;  %v484_v35 = vand.u32 2147483648, %v3390_v10  ;;  %vm465_vm4 = vweird.f32 %v3387_v26 }
 0x34f   :  { %664 = vmatpush.xpose.msra.mxu2 %v649_v39  ;;  %v504_v57 = vmul.f32 %v2691_v62, %v503_v40  ;;  %v482_v0 = vand.u32 2147483647, %v3390_v10  ;;  %vm478_vm7 = vweird.f32 %v3390_v10  ;;  %vm3433_vm8 = vmor %vm464_vm6, %vm465_vm4  ;;  %v468_v6 = vand.u32 2147483647, %v3363_v15 }
 0x350   :  { %v462_v50 = vmul.f32 %v3387_v26, %v461_v29  ;;  %v500_v58 = vsel %vm497_vm3, %v499_v47, %v495_v18  ;;  %v485_v40 = vor.u32 1.1754944e-38, %v484_v35  ;;  %v471_v29 = vor.u32 1.1754944e-38, %v470_v17 }
 0x351   :  { %v505_v5 = vadd.f32 %v2691_v62, %v504_v57  ;;  %v646_v45 = vmul.f32 %v3187_v56, %v500_v58  ;;  %vm483_vm10 = vcmp.eq.f32.partialorder %v482_v0, 8.507059e+37  ;;  %vm469_vm11 = vcmp.eq.f32.partialorder %v468_v6, 8.507059e+37 }
 0x352   :  { %v2695_v31 = vpop.eup %2694  ;;  %v463_v23 = vadd.f32 %v3387_v26, %v462_v50 }
 0x353   :  { %v474_v61 = vmul.f32 %v2695_v31, %v3390_v10  ;;  %v3414_v4 = vpop.xlane.xlu2 %389  ;;  %665 = vmatpush.xpose.msra.mxu2 %v648_v55  ;;  %v3416_v22 = vpop.xlane.xlu1 %387  ;;  %v509_v27 = vsel %vm508_vm15, %v2691_v62, %v505_v5  ;;  %vm479_vm5 = vweird.f32 %v2695_v31 }
 0x354   :  { %2696 = vrcp.f32 %v3414_v4  ;;  %v514_v46 = vsel %vm511_vm2, %v513_v25, %v509_v27  ;;  %vm480_vm9 = vmor %vm478_vm7, %vm479_vm5  ;;  %v467_v56 = vsel %vm3433_vm8, %v3387_v26, %v463_v23  ;;  %v456_v5 = vand.u32 2147483648, %v3414_v4 }
 0x355   :  { %v475_v34 = vsub.f32 1.0, %v474_v61  ;;  %2698 = vrcp.f32 %v3416_v22  ;;  %v647_v43 = vmul.f32 %v3192_v63, %v514_v46  ;;  %v472_v55 = vsel %vm469_vm11, %v471_v29, %v467_v56 }
 0x356   :  { %v454_v49 = vand.u32 2147483647, %v3414_v4  ;;  %v644_v25 = vmul.f32 %v3194_v1, %v472_v55  ;;  %vm450_vm14 = vweird.f32 %v3414_v4  ;;  %v457_v50 = vor.u32 1.1754944e-38, %v456_v5 }
 0x357   :  { %666 = vmatpush.xpose.msra.mxu2 %v647_v43  ;;  %v476_v62 = vmul.f32 %v2695_v31, %v475_v34  ;;  %vm436_vm2 = vweird.f32 %v3416_v22 }
 0x358   :  { %vm455_vm3 = vcmp.eq.f32.partialorder %v454_v49, 8.507059e+37 }
 0x359   :  { %v477_v63 = vadd.f32 %v2695_v31, %v476_v62 }
 0x35a   :  { %v2697_v14 = vpop.eup %2696 }
 0x35b   :  { %v2699_v39 = vpop.eup %2698  ;;  %v446_v38 = vmul.f32 %v2697_v14, %v3414_v4  ;;  %v3439_v3 = vpop.xlane.xlu2 %385  ;;  %667 = vmatpush.xpose.msra.mxu2 %v646_v45  ;;  %v481_v21 = vsel %vm480_vm9, %v2695_v31, %v477_v63  ;;  %vm451_vm12 = vweird.f32 %v2697_v14  ;;  %v442_v31 = vand.u32 2147483648, %v3416_v22 }
 0x35c   :  { %v432_v10 = vmul.f32 %v2699_v39, %v3416_v22  ;;  %2700 = vrcp.f32 %v3439_v3  ;;  %v486_v15 = vsel %vm483_vm10, %v485_v40, %v481_v21  ;;  %vm437_vm13 = vweird.f32 %v2699_v39  ;;  %v874_v18 = vpop.xlane.xlu1 %873  ;;  %vm452_vm15 = vmor %vm450_vm14, %vm451_vm12 }
 0x35d   :  { %v447_v57 = vsub.f32 1.0, %v446_v38  ;;  %v645_v20 = vmul.f32 %v3200_v7, %v486_v15  ;;  %v440_v7 = vand.u32 2147483647, %v3416_v22  ;;  %vm438_vm4 = vmor %vm436_vm2, %vm437_vm13  ;;  %v443_v35 = vor.u32 1.1754944e-38, %v442_v31  ;;  %v870_v38 = vpop.xlane.xlu0 %869 }
 0x35e   :  { %v433_v8 = vsub.f32 1.0, %v432_v10  ;;  %v428_v22 = vand.u32 2147483648, %v3439_v3  ;;  %v890_v63 = vsub.f32 %v3210_v60, %v874_v18  ;;  %v426_v51 = vand.u32 2147483647, %v3439_v3 }
 0x35f   :  { %668 = vmatpush.xpose.msra.mxu2 %v645_v20  ;;  %v448_v33 = vmul.f32 %v2697_v14, %v447_v57  ;;  %vm441_vm5 = vcmp.eq.f32.partialorder %v440_v7, 8.507059e+37  ;;  %vm422_vm7 = vweird.f32 %v3439_v3  ;;  %v888_v29 = vsub.f32 %v3148_v59, %v870_v38 }
 0x360   :  { %v434_v26 = vmul.f32 %v2699_v39, %v433_v8  ;;  %vm427_vm9 = vcmp.eq.f32.partialorder %v426_v51, 8.507059e+37 }
 0x361   :  { %v449_v61 = vadd.f32 %v2697_v14, %v448_v33 }
 0x362   :  { %v2701_v27 = vpop.eup %2700  ;;  %v435_v46 = vadd.f32 %v2699_v39, %v434_v26 }
 0x363   :  { %v418_v47 = vmul.f32 %v2701_v27, %v3439_v3  ;;  %669 = vmatpush.xpose.msra.mxu2 %v644_v25  ;;  %v872_v34 = vpop.xlane.xlu2 %871  ;;  %v453_v43 = vsel %vm452_vm15, %v2697_v14, %v449_v61  ;;  %vm423_vm6 = vweird.f32 %v2701_v27  ;;  %v921_v14 = vmul.f32 1.442695, %v890_v63 }
 0x364   :  { %v889_v1 = vsub.f32 %v3216_v24, %v872_v34  ;;  %v458_v4 = vsel %vm455_vm3, %v457_v50, %v453_v43  ;;  %v439_v58 = vsel %vm438_vm4, %v2699_v39, %v435_v46  ;;  %vm424_vm8 = vmor %vm422_vm7, %vm423_vm6  ;;  %v868_v21 = vpop.xlane.xlu1 %867  ;;  %v917_v3 = vmul.f32 1.442695, %v888_v29 }
 0x365   :  { %v419_v62 = vsub.f32 1.0, %v418_v47  ;;  %v643_v0 = vmul.f32 %v3204_v9, %v458_v4  ;;  %v444_v17 = vsel %vm441_vm5, %v443_v35, %v439_v58  ;;  %v429_v9 = vor.u32 1.1754944e-38, %v428_v22  ;;  %v3501_v58 = vpop.f32.mrf.mxu0 }
 0x366   :  { %v919_v23 = vmul.f32 1.442695, %v889_v1  ;;  %v642_v24 = vmul.f32 %v3206_v11, %v444_v17  ;;  %v887_v5 = vsub.f32 %v3219_v28, %v868_v21 }
 0x367   :  { %v420_v45 = vmul.f32 %v2701_v27, %v419_v62  ;;  %670 = vmatpush.xpose.msra.mxu2 %v643_v0 }
 0x368   :  { %2702 = vpow2.f32 %v919_v23  ;;  %v915_v59 = vmul.f32 1.442695, %v887_v5 }
 0x369   :  { %v421_v6 = vadd.f32 %v2701_v27, %v420_v45  ;;  %2704 = vpow2.f32 %v921_v14 }
 0x36b   :  { %671 = vmatpush.xpose.msra.mxu2 %v642_v24  ;;  %v866_v40 = vpop.xlane.xlu2 %865  ;;  %v425_v39 = vsel %vm424_vm8, %v2701_v27, %v421_v6 }
 0x36c   :  { %v886_v60 = vsub.f32 %v3227_v42, %v866_v40  ;;  %v430_v56 = vsel %vm427_vm9, %v429_v9, %v425_v39  ;;  %v864_v55 = vpop.xlane.xlu1 %863 }
 0x36d   :  { %v641_v10 = vmul.f32 %v3212_v19, %v430_v56  ;;  %v885_v25 = vsub.f32 %v3224_v37, %v864_v55  ;;  %v3510_v22 = vpop.f32.mrf.mxu0 }
 0x36e   :  { %v3465_v15 = vpop.eup %2702  ;;  %v913_v11 = vmul.f32 1.442695, %v886_v60 }
 0x36f   :  { %672 = vmatpush.xpose.msra.mxu2 %v641_v10  ;;  %951 = vadd.xlane.f32.xlu1 %v3465_v15  ;;  %v3470_v8 = vpop.eup %2704  ;;  %v911_v61 = vmul.f32 1.442695, %v885_v25 }
 0x370   :  { %2706 = vpow2.f32 %v913_v11 }
 0x371   :  { %2708 = vpow2.f32 %v917_v3 }
 0x373   :  { %v862_v57 = vpop.xlane.xlu2 %861 }
 0x374   :  { %v884_v20 = vsub.f32 %v3235_v52, %v862_v57  ;;  %v860_v28 = vpop.xlane.xlu1 %859 }
 0x375   :  { %v883_v46 = vsub.f32 %v3232_v53, %v860_v28 }
 0x376   :  { %v3472_v42 = vpop.eup %2706  ;;  %v909_v19 = vmul.f32 1.442695, %v884_v20 }
 0x377   :  { %953 = vadd.xlane.f32.xlu1 %v3470_v8  ;;  %945 = vadd.xlane.f32.xlu2 %v3472_v42  ;;  %v3478_v26 = vpop.eup %2708  ;;  %v907_v47 = vmul.f32 1.442695, %v883_v46 }
 0x378   :  { %2710 = vpow2.f32 %v909_v19 }
 0x379   :  { %2712 = vpow2.f32 %v915_v59 }
 0x37b   :  { %v858_v33 = vpop.xlane.xlu2 %857 }
 0x37c   :  { %v882_v49 = vsub.f32 %v3243_v54, %v858_v33  ;;  %v856_v37 = vpop.xlane.xlu1 %855 }
 0x37d   :  { %v881_v53 = vsub.f32 %v3240_v36, %v856_v37 }
 0x37e   :  { %v3480_v52 = vpop.eup %2710  ;;  %v905_v31 = vmul.f32 1.442695, %v882_v49 }
 0x37f   :  { %949 = vadd.xlane.f32.xlu1 %v3478_v26  ;;  %941 = vadd.xlane.f32.xlu2 %v3480_v52  ;;  %v3486_v18 = vpop.eup %2712  ;;  %v903_v62 = vmul.f32 1.442695, %v881_v53 }
 0x380   :  { %2714 = vpow2.f32 %v905_v31 }
 0x381   :  { %2716 = vpow2.f32 %v911_v61 }
 0x383   :  { %v854_v7 = vpop.xlane.xlu2 %853 }
 0x384   :  { %v880_v27 = vsub.f32 %v3251_v30, %v854_v7  ;;  %v852_v0 = vpop.xlane.xlu1 %851 }
 0x385   :  { %v879_v17 = vsub.f32 %v3248_v48, %v852_v0  ;;  %v131_v48 = vpop.f32.mrf.mxu0 }
 0x386   :  { %v3488_v54 = vpop.eup %2714  ;;  %v901_v50 = vmul.f32 1.442695, %v880_v27  ;;  %673 = vmatmul.f32.vlgmr.msra.gmra.mxu2 %v131_v48 }
 0x387   :  { %947 = vadd.xlane.f32.xlu1 %v3486_v18  ;;  %937 = vadd.xlane.f32.xlu2 %v3488_v54  ;;  %v3494_v1 = vpop.eup %2716  ;;  %v899_v36 = vmul.f32 1.442695, %v879_v17 }
 0x388   :  { %2718 = vpow2.f32 %v901_v50 }
 0x389   :  { %2720 = vpow2.f32 %v907_v47 }
 0x38b   :  { %v850_v34 = vpop.xlane.xlu2 %849 }
 0x38c   :  { %v878_v43 = vsub.f32 %v3260_v16, %v850_v34 }
 0x38e   :  { %v3496_v30 = vpop.eup %2718  ;;  %v897_v4 = vmul.f32 1.442695, %v878_v43 }
 0x38f   :  { %943 = vadd.xlane.f32.xlu1 %v3494_v1  ;;  %933 = vadd.xlane.f32.xlu2 %v3496_v30  ;;  %v3503_v23 = vpop.eup %2720 }
 0x390   :  { %2722 = vpow2.f32 %v897_v4 }
 0x391   :  { %2724 = vpow2.f32 %v903_v62 }
 0x392   :  { %2726 = vpow2.f32 %v899_v36 }
 0x393   :  { %v848_v35 = vpop.xlane.xlu2 %847 }
 0x394   :  { %v877_v6 = vsub.f32 %v3268_v2, %v848_v35  ;;  %v50_v2 = vld [vmem:[%s4732_s1 + $0x48] sm:$0xff] }
 0x395   :  { %2530 = vmatmul.msk.f32.gmra.mxu0 %vm53_vm0, %v50_v2 }
 0x396   :  { %v3505_v16 = vpop.eup %2722  ;;  %v895_v9 = vmul.f32 1.442695, %v877_v6 }
 0x397   :  { %939 = vadd.xlane.f32.xlu1 %v3503_v23  ;;  %929 = vadd.xlane.f32.xlu2 %v3505_v16  ;;  %v3513_v51 = vpop.eup %2724 }
 0x398   :  { %v3517_v14 = vpop.eup %2726 }
 0x39b   :  { %v846_v45 = vpop.xlane.xlu2 %845 }
 0x39c   :  { %v876_v63 = vsub.f32 %v3282_v44, %v846_v45 }
 0x39e   :  { %v893_v24 = vmul.f32 1.442695, %v876_v63 }
 0x39f   :  { %935 = vadd.xlane.f32.xlu1 %v3513_v51 }
 0x3a0   :  { %2728 = vpow2.f32 %v893_v24 }
 0x3a1   :  { %2730 = vpow2.f32 %v895_v9 }
 0x3a3   :  { %v844_v40 = vpop.xlane.xlu2 %843 }
 0x3a4   :  { %v875_v44 = vsub.f32 %v3301_v41, %v844_v40 }
 0x3a6   :  { %v3519_v39 = vpop.eup %2728  ;;  %v891_v38 = vmul.f32 1.442695, %v875_v44 }
 0x3a7   :  { %931 = vadd.xlane.f32.xlu1 %v3517_v14  ;;  %925 = vadd.xlane.f32.xlu2 %v3519_v39  ;;  %v3524_v21 = vpop.eup %2730 }
 0x3a8   :  { %2732 = vpow2.f32 %v891_v38 }
 0x3ae   :  { %v3531_v60 = vpop.eup %2732 }
 0x3af   :  { %927 = vadd.xlane.f32.xlu1 %v3524_v21 }
 0x3b7   :  { %923 = vadd.xlane.f32.xlu1 %v3531_v60 }
 0x3d0   :  { %1319 = vxpose.xlu2.b32.start.end [1/1] (short) %v3023_v12, 128 }
 0x3e2   :  { %v952_v56 = vpop.xlane.xlu1 %951 }
 0x3e3   :  { %2734 = vrcp.f32 %v952_v56  ;;  %vm1156_vm12 = vweird.f32 %v952_v56  ;;  %v1162_v28 = vand.u32 2147483648, %v952_v56  ;;  %v1160_v7 = vand.u32 2147483647, %v952_v56 }
 0x3e5   :  { %v1163_v35 = vor.u32 1.1754944e-38, %v1162_v28  ;;  %vm1161_vm3 = vcmp.eq.f32.partialorder %v1160_v7, 8.507059e+37 }
 0x3e9   :  { %v2735_v41 = vpop.eup %2734 }
 0x3ea   :  { %v1152_v10 = vmul.f32 %v2735_v41, %v952_v56  ;;  %v954_v11 = vpop.xlane.xlu1 %953  ;;  %v3535_v29 = vpop.xlane.xlu2 %945  ;;  %vm1157_vm10 = vweird.f32 %v2735_v41 }
 0x3eb   :  { %2736 = vrcp.f32 %v954_v11  ;;  %v1176_v59 = vand.u32 2147483648, %v954_v11  ;;  %v1174_v31 = vand.u32 2147483647, %v954_v11  ;;  %vm1170_vm13 = vweird.f32 %v954_v11  ;;  %vm3543_vm14 = vmor %vm1156_vm12, %vm1157_vm10 }
 0x3ec   :  { %v1153_v3 = vsub.f32 1.0, %v1152_v10  ;;  %2738 = vrcp.f32 %v3535_v29  ;;  %vm1114_vm10 = vweird.f32 %v3535_v29 }
 0x3ed   :  { %v1177_v46 = vor.u32 1.1754944e-38, %v1176_v59  ;;  %vm1175_vm2 = vcmp.eq.f32.partialorder %v1174_v31, 8.507059e+37 }
 0x3ee   :  { %v1154_v20 = vmul.f32 %v2735_v41, %v1153_v3 }
 0x3f0   :  { %v1155_v25 = vadd.f32 %v2735_v41, %v1154_v20 }
 0x3f1   :  { %v2737_v57 = vpop.eup %2736  ;;  %1903 = vxpose.xlu1.b32.start.end [1/1] (short) %v3025_v13, 128 }
 0x3f2   :  { %v1166_v55 = vmul.f32 %v2737_v57, %v954_v11  ;;  %v950_v19 = vpop.xlane.xlu1 %949  ;;  %v3539_v5 = vpop.xlane.xlu2 %941  ;;  %vm1171_vm11 = vweird.f32 %v2737_v57  ;;  %v1159_v4 = vsel %vm3543_vm14, %v2735_v41, %v1155_v25  ;;  %v1118_v25 = vand.u32 2147483647, %v3535_v29 }
 0x3f3   :  { %2740 = vrcp.f32 %v950_v19  ;;  %v3541_v33 = vpop.eup %2738  ;;  %vm1172_vm15 = vmor %vm1170_vm13, %vm1171_vm11  ;;  %v1164_v36 = vsel %vm1161_vm3, %v1163_v35, %v1159_v4  ;;  %v1148_v45 = vand.u32 2147483648, %v950_v19  ;;  %v1146_v24 = vand.u32 2147483647, %v950_v19 }
 0x3f4   :  { %v1167_v12 = vsub.f32 1.0, %v1166_v55  ;;  %v1110_v50 = vmul.f32 %v3541_v33, %v3535_v29  ;;  %2742 = vrcp.f32 %v3539_v5  ;;  %v1193_v48 = vmul.f32 %v3465_v15, %v1164_v36 }
 0x3f5   :  { %vm1142_vm5 = vweird.f32 %v950_v19  ;;  %vm1147_vm7 = vcmp.eq.f32.partialorder %v1146_v24, 8.507059e+37  ;;  %vm1115_vm8 = vweird.f32 %v3541_v33 }
 0x3f6   :  { %v1168_v49 = vmul.f32 %v2737_v57, %v1167_v12  ;;  %v1111_v17 = vsub.f32 1.0, %v1110_v50  ;;  %vm3582_vm12 = vmor %vm1114_vm10, %vm1115_vm8 }
 0x3f8   :  { %v1169_v61 = vadd.f32 %v2737_v57, %v1168_v49  ;;  %v1112_v44 = vmul.f32 %v3541_v33, %v1111_v17  ;;  %v1120_v49 = vand.u32 2147483648, %v3535_v29 }
 0x3f9   :  { %v2741_v27 = vpop.eup %2740 }
 0x3fa   :  { %v1138_v37 = vmul.f32 %v2741_v27, %v950_v19  ;;  %v3550_v47 = vpop.xlane.xlu1 %947  ;;  %v3552_v34 = vpop.xlane.xlu2 %937  ;;  %v1173_v43 = vsel %vm1172_vm15, %v2737_v57, %v1169_v61  ;;  %vm1143_vm4 = vweird.f32 %v2741_v27  ;;  %v1113_v20 = vadd.f32 %v3541_v33, %v1112_v44 }
 0x3fb   :  { %2744 = vrcp.f32 %v3550_v47  ;;  %v1178_v53 = vsel %vm1175_vm2, %v1177_v46, %v1173_v43  ;;  %v3558_v6 = vpop.eup %2742  ;;  %vm1144_vm6 = vmor %vm1142_vm5, %vm1143_vm4  ;;  %v1134_v57 = vand.u32 2147483648, %v3550_v47  ;;  %v1132_v59 = vand.u32 2147483647, %v3550_v47 }
 0x3fc   :  { %v1139_v62 = vsub.f32 1.0, %v1138_v37  ;;  %v1194_v0 = vmul.f32 %v3470_v8, %v1178_v53  ;;  %2746 = vrcp.f32 %v3552_v34  ;;  %v1149_v8 = vor.u32 1.1754944e-38, %v1148_v45 }
 0x3fd   :  { %v1082_v38 = vmul.f32 %v3558_v6, %v3539_v5  ;;  %vm1128_vm11 = vweird.f32 %v3550_v47  ;;  %v1135_v13 = vor.u32 1.1754944e-38, %v1134_v57  ;;  %v1117_v7 = vsel %vm3582_vm12, %v3541_v33, %v1113_v20 }
 0x3fe   :  { %v1140_v63 = vmul.f32 %v2741_v27, %v1139_v62  ;;  %1195 = vmatpush.xpose.msrb.mxu0 %v1194_v0  ;;  %vm1133_vm14 = vcmp.eq.f32.partialorder %v1132_v59, 8.507059e+37  ;;  %vm1119_vm15 = vcmp.eq.f32.partialorder %v1118_v25, 8.507059e+37  ;;  %vm1087_vm2 = vweird.f32 %v3558_v6 }
 0x3ff   :  { %v1083_v19 = vsub.f32 1.0, %v1082_v38  ;;  %vm1086_vm4 = vweird.f32 %v3539_v5  ;;  %vm1058_vm12 = vweird.f32 %v3552_v34 }
 0x400   :  { %v1141_v9 = vadd.f32 %v2741_v27, %v1140_v63 }
 0x401   :  { %v2745_v40 = vpop.eup %2744 }
 0x402   :  { %v1124_v2 = vmul.f32 %v2745_v40, %v3550_v47  ;;  %1196 = vmatpush.xpose.msrb.mxu0 %v1193_v48  ;;  %v3566_v56 = vpop.xlane.xlu1 %943  ;;  %v1145_v41 = vsel %vm1144_vm6, %v2741_v27, %v1141_v9  ;;  %v3569_v11 = vpop.xlane.xlu2 %933  ;;  %vm1129_vm9 = vweird.f32 %v2745_v40  ;;  %v1084_v27 = vmul.f32 %v3558_v6, %v1083_v19  ;;  %vm3610_vm6 = vmor %vm1086_vm4, %vm1087_vm2 }
 0x403   :  { %2748 = vrcp.f32 %v3566_v56  ;;  %v1150_v15 = vsel %vm1147_vm7, %v1149_v8, %v1145_v41  ;;  %v3575_v55 = vpop.eup %2746  ;;  %vm1130_vm13 = vmor %vm1128_vm11, %vm1129_vm9  ;;  %v1121_v47 = vor.u32 1.1754944e-38, %v1120_v49  ;;  %v1106_v33 = vand.u32 2147483648, %v3566_v56 }
 0x404   :  { %v1125_v10 = vsub.f32 1.0, %v1124_v2  ;;  %v1192_v3 = vmul.f32 %v3478_v26, %v1150_v15  ;;  %2750 = vrcp.f32 %v3569_v11  ;;  %v1054_v61 = vmul.f32 %v3575_v55, %v3552_v34 }
 0x405   :  { %v1122_v35 = vsel %vm1119_vm15, %v1121_v47, %v1117_v7  ;;  %v1104_v36 = vand.u32 2147483647, %v3566_v56  ;;  %v1085_v45 = vadd.f32 %v3558_v6, %v1084_v27  ;;  %vm1100_vm5 = vweird.f32 %v3566_v56 }
 0x406   :  { %v1126_v12 = vmul.f32 %v2745_v40, %v1125_v10  ;;  %1197 = vmatpush.xpose.msrb.mxu0 %v1192_v3  ;;  %v1055_v53 = vsub.f32 1.0, %v1054_v61  ;;  %v1190_v63 = vmul.f32 %v3472_v42, %v1122_v35  ;;  %v1090_v9 = vand.u32 2147483647, %v3539_v5 }
 0x407   :  { %v1107_v38 = vor.u32 1.1754944e-38, %v1106_v33  ;;  %vm1105_vm8 = vcmp.eq.f32.partialorder %v1104_v36, 8.507059e+37  ;;  %vm1059_vm10 = vweird.f32 %v3575_v55  ;;  %v1034_v48 = vand.u32 2147483647, %v3569_v11 }
 0x408   :  { %v1127_v26 = vadd.f32 %v2745_v40, %v1126_v12  ;;  %v1056_v44 = vmul.f32 %v3575_v55, %v1055_v53  ;;  %vm1091_vm9 = vcmp.eq.f32.partialorder %v1090_v9, 8.507059e+37 }
 0x409   :  { %v2749_v28 = vpop.eup %2748 }
 0x40a   :  { %v1096_v50 = vmul.f32 %v2749_v28, %v3566_v56  ;;  %v3594_v46 = vpop.xlane.xlu1 %939  ;;  %v1131_v37 = vsel %vm1130_vm13, %v2745_v40, %v1127_v26  ;;  %v3600_v62 = vpop.eup %2750  ;;  %vm1101_vm3 = vweird.f32 %v2749_v28  ;;  %v1057_v12 = vadd.f32 %v3575_v55, %v1056_v44 }
 0x40b   :  { %2752 = vrcp.f32 %v3594_v46  ;;  %v1136_v29 = vsel %vm1133_vm14, %v1135_v13, %v1131_v37  ;;  %v3602_v17 = vpop.xlane.xlu2 %929  ;;  %v1026_v8 = vmul.f32 %v3600_v62, %v3569_v11  ;;  %vm1102_vm7 = vmor %vm1100_vm5, %vm1101_vm3  ;;  %v1078_v19 = vand.u32 2147483648, %v3594_v46 }
 0x40c   :  { %v1097_v43 = vsub.f32 1.0, %v1096_v50  ;;  %v1191_v4 = vmul.f32 %v3486_v18, %v1136_v29  ;;  %v1092_v18 = vand.u32 2147483648, %v3539_v5  ;;  %2754 = vrcp.f32 %v3602_v17  ;;  %vm3639_vm14 = vmor %vm1058_vm12, %vm1059_vm10 }
 0x40d   :  { %v1089_v5 = vsel %vm3610_vm6, %v3558_v6, %v1085_v45  ;;  %v1027_v57 = vsub.f32 1.0, %v1026_v8  ;;  %v1076_v6 = vand.u32 2147483647, %v3594_v46  ;;  %vm1072_vm13 = vweird.f32 %v3594_v46 }
 0x40e   :  { %v1098_v0 = vmul.f32 %v2749_v28, %v1097_v43  ;;  %1198 = vmatpush.xpose.msrb.mxu0 %v1191_v4  ;;  %v1093_v15 = vor.u32 1.1754944e-38, %v1092_v18  ;;  %v1079_v7 = vor.u32 1.1754944e-38, %v1078_v19  ;;  %vm1031_vm4 = vweird.f32 %v3600_v62 }
 0x40f   :  { %v1028_v13 = vmul.f32 %v3600_v62, %v1027_v57  ;;  %vm1077_vm2 = vcmp.eq.f32.partialorder %v1076_v6, 8.507059e+37  ;;  %vm1030_vm6 = vweird.f32 %v3569_v11  ;;  %v1036_v45 = vand.u32 2147483648, %v3569_v11 }
 0x410   :  { %v1099_v24 = vadd.f32 %v2749_v28, %v1098_v0  ;;  %v1094_v20 = vsel %vm1091_vm9, %v1093_v15, %v1089_v5 }
 0x411   :  { %v2753_v40 = vpop.eup %2752  ;;  %v1188_v26 = vmul.f32 %v3480_v52, %v1094_v20  ;;  %v1061_v52 = vsel %vm3639_vm14, %v3575_v55, %v1057_v12  ;;  %v1029_v35 = vadd.f32 %v3600_v62, %v1028_v13  ;;  %v1037_v5 = vor.u32 1.1754944e-38, %v1036_v45  ;;  %v674_v12 = vpop.f32.mrf.mxu2 }
 0x412   :  { %v1068_v42 = vmul.f32 %v2753_v40, %v3594_v46  ;;  %v3620_v2 = vpop.xlane.xlu1 %935  ;;  %1199 = vmatpush.xpose.msrb.mxu0 %v1190_v63  ;;  %v1103_v56 = vsel %vm1102_vm7, %v2749_v28, %v1099_v24  ;;  %vm1073_vm11 = vweird.f32 %v2753_v40  ;;  %v3631_v49 = vpop.eup %2754  ;;  %v1062_v28 = vand.u32 2147483647, %v3552_v34  ;;  %1288 = vmatpush.msrb.mxu2 %v674_v12 }
 0x413   :  { %2756 = vrcp.f32 %v3620_v2  ;;  %v1108_v41 = vsel %vm1105_vm8, %v1107_v38, %v1103_v56  ;;  %vm1074_vm15 = vmor %vm1072_vm13, %vm1073_vm11  ;;  %v998_v27 = vmul.f32 %v3631_v49, %v3602_v17  ;;  %v1050_v53 = vand.u32 2147483648, %v3620_v2 }
 0x414   :  { %v1069_v10 = vsub.f32 1.0, %v1068_v42  ;;  %v1189_v3 = vmul.f32 %v3494_v1, %v1108_v41  ;;  %v1064_v1 = vand.u32 2147483648, %v3552_v34  ;;  %vm1063_vm3 = vcmp.eq.f32.partialorder %v1062_v28, 8.507059e+37  ;;  %vm3669_vm8 = vmor %vm1030_vm6, %vm1031_vm4  ;;  %1998 = vmatpush.msra.mxu2 %v3510_v22 }
 0x415   :  { %v999_v33 = vsub.f32 1.0, %v998_v27  ;;  %v1048_v36 = vand.u32 2147483647, %v3620_v2  ;;  %vm1044_vm7 = vweird.f32 %v3620_v2  ;;  %v1033_v44 = vsel %vm3669_vm8, %v3600_v62, %v1029_v35 }
 0x416   :  { %v1070_v59 = vmul.f32 %v2753_v40, %v1069_v10  ;;  %1200 = vmatpush.xpose.msrb.mxu0 %v1189_v3  ;;  %v1065_v47 = vor.u32 1.1754944e-38, %v1064_v1  ;;  %vm1003_vm11 = vweird.f32 %v3631_v49  ;;  %vm1002_vm13 = vweird.f32 %v3602_v17 }
 0x417   :  { %vm1049_vm10 = vcmp.eq.f32.partialorder %v1048_v36, 8.507059e+37 }
 0x418   :  { %v1071_v31 = vadd.f32 %v2753_v40, %v1070_v59  ;;  %v1066_v4 = vsel %vm1063_vm3, %v1065_v47, %v1061_v52  ;;  %v1008_v59 = vand.u32 2147483648, %v3602_v17 }
 0x419   :  { %v2757_v61 = vpop.eup %2756  ;;  %v1186_v18 = vmul.f32 %v3488_v54, %v1066_v4  ;;  %v1000_v54 = vmul.f32 %v3631_v49, %v999_v33 }
 0x41a   :  { %v1040_v50 = vmul.f32 %v2757_v61, %v3620_v2  ;;  %v3651_v46 = vpop.xlane.xlu1 %931  ;;  %1201 = vmatpush.xpose.msrb.mxu0 %v1188_v26  ;;  %v3653_v37 = vpop.xlane.xlu2 %925  ;;  %v1075_v34 = vsel %vm1074_vm15, %v2753_v40, %v1071_v31  ;;  %vm1045_vm5 = vweird.f32 %v2757_v61  ;;  %v1051_v40 = vor.u32 1.1754944e-38, %v1050_v53  ;;  %vm3696_vm15 = vmor %vm1002_vm13, %vm1003_vm11 }
 0x41b   :  { %2758 = vrcp.f32 %v3651_v46  ;;  %v1080_v29 = vsel %vm1077_vm2, %v1079_v7, %v1075_v34  ;;  %vm1046_vm9 = vmor %vm1044_vm7, %vm1045_vm5  ;;  %v1020_v10 = vand.u32 2147483647, %v3651_v46  ;;  %v1022_v3 = vand.u32 2147483648, %v3651_v46 }
 0x41c   :  { %v1041_v43 = vsub.f32 1.0, %v1040_v50  ;;  %2760 = vrcp.f32 %v3653_v37  ;;  %v1187_v55 = vmul.f32 %v3503_v23, %v1080_v29  ;;  %v51_v23 = vld [vmem:[%s4732_s1 + $0x50] sm:$0xff]  ;;  %v1001_v19 = vadd.f32 %v3631_v49, %v1000_v54 }
 0x41d   :  { %2531 = vmatmul.msk.f32.gmra.mxu0 %vm53_vm0, %v51_v23  ;;  %vm1035_vm0 = vcmp.eq.f32.partialorder %v1034_v48, 8.507059e+37  ;;  %vm1016_vm14 = vweird.f32 %v3651_v46  ;;  %v1006_v26 = vand.u32 2147483647, %v3602_v17  ;;  %vm1021_vm3 = vcmp.eq.f32.partialorder %v1020_v10, 8.507059e+37 }
 0x41e   :  { %v1042_v0 = vmul.f32 %v2757_v61, %v1041_v43  ;;  %1202 = vmatpush.xpose.msrb.mxu0 %v1187_v55  ;;  %v1038_v15 = vsel %vm1035_vm0, %v1037_v5, %v1033_v44  ;;  %v1023_v25 = vor.u32 1.1754944e-38, %v1022_v3  ;;  %v1005_v7 = vsel %vm3696_vm15, %v3631_v49, %v1001_v19  ;;  %v679_v5 = vld [vmem:[%s4733_s2 + $0x10] sm:$0xff] }
 0x41f   :  { %v1009_v17 = vor.u32 1.1754944e-38, %v1008_v59  ;;  %vm1007_vm4 = vcmp.eq.f32.partialorder %v1006_v26, 8.507059e+37  ;;  %vm974_vm7 = vweird.f32 %v3653_v37  ;;  %v980_v49 = vand.u32 2147483648, %v3653_v37  ;;  %v2565_v26 = vld [vmem:[%s4733_s2 + $0x20] sm:$0xff] }
 0x420   :  { %v1043_v63 = vadd.f32 %v2757_v61, %v1042_v0  ;;  %v978_v4 = vand.u32 2147483647, %v3653_v37 }
 0x421   :  { %v2759_v9 = vpop.eup %2758  ;;  %v1010_v50 = vsel %vm1007_vm4, %v1009_v17, %v1005_v7  ;;  %v981_v45 = vor.u32 1.1754944e-38, %v980_v49  ;;  %v2567_v7 = vld [vmem:[%s4733_s2 + $0x30] sm:$0xff] }
 0x422   :  { %v3678_v8 = vpop.eup %2760  ;;  %v1012_v38 = vmul.f32 %v2759_v9, %v3651_v46  ;;  %v3682_v42 = vpop.xlane.xlu1 %927  ;;  %1203 = vmatpush.xpose.msrb.mxu0 %v1186_v18  ;;  %v1047_v2 = vsel %vm1046_vm9, %v2757_v61, %v1043_v63  ;;  %vm1017_vm12 = vweird.f32 %v2759_v9  ;;  %v1182_v43 = vmul.f32 %v3505_v16, %v1010_v50 }
 0x423   :  { %v970_v11 = vmul.f32 %v3678_v8, %v3653_v37  ;;  %2762 = vrcp.f32 %v3682_v42  ;;  %v1052_v56 = vsel %vm1049_vm10, %v1051_v40, %v1047_v2  ;;  %vm1018_vm2 = vmor %vm1016_vm14, %vm1017_vm12  ;;  %v994_v46 = vand.u32 2147483648, %v3682_v42 }
 0x424   :  { %v1013_v41 = vsub.f32 1.0, %v1012_v38  ;;  %v1185_v62 = vmul.f32 %v3513_v51, %v1052_v56  ;;  %v1184_v51 = vmul.f32 %v3496_v30, %v1038_v15  ;;  %vm975_vm5 = vweird.f32 %v3678_v8 }
 0x425   :  { %v971_v20 = vsub.f32 1.0, %v970_v11  ;;  %v992_v29 = vand.u32 2147483647, %v3682_v42  ;;  %vm988_vm8 = vweird.f32 %v3682_v42  ;;  %vm3716_vm9 = vmor %vm974_vm7, %vm975_vm5  ;;  %v995_v35 = vor.u32 1.1754944e-38, %v994_v46  ;;  %v677_v11 = vld [vmem:[%s4733_s2] sm:$0xff] }
 0x426   :  { %v1014_v57 = vmul.f32 %v2759_v9, %v1013_v41  ;;  %1204 = vmatpush.xpose.msrb.mxu0 %v1185_v62  ;;  %vm979_vm11 = vcmp.eq.f32.partialorder %v978_v4, 8.507059e+37  ;;  %2573 = vmatmul.msk.f32.vlgmr.msrb.gmra.mxu2 %vm191_vm1, %v677_v11  ;;  %v680_v62 = vld [vmem:[%s4733_s2 + $0x18] sm:$0xff]  ;;  %v1315_v11 = vld [vmem:[#allocation2 + $0x160] sm:$0xff] }
 0x427   :  { %v972_v28 = vmul.f32 %v3678_v8, %v971_v20  ;;  %vm993_vm0 = vcmp.eq.f32.partialorder %v992_v29, 8.507059e+37 }
 0x428   :  { %v1015_v6 = vadd.f32 %v2759_v9, %v1014_v57 }
 0x429   :  { %v2763_v31 = vpop.eup %2762  ;;  %v973_v47 = vadd.f32 %v3678_v8, %v972_v28 }
 0x42a   :  { %v984_v61 = vmul.f32 %v2763_v31, %v3682_v42  ;;  %v924_v30 = vpop.xlane.xlu1 %923  ;;  %1205 = vmatpush.xpose.msrb.mxu0 %v1184_v51  ;;  %v1019_v13 = vsel %vm1018_vm2, %v2759_v9, %v1015_v6  ;;  %vm989_vm6 = vweird.f32 %v2763_v31 }
 0x42b   :  { %2764 = vrcp.f32 %v924_v30  ;;  %v1024_v52 = vsel %vm1021_vm3, %v1023_v25, %v1019_v13  ;;  %vm990_vm10 = vmor %vm988_vm8, %vm989_vm6  ;;  %v977_v16 = vsel %vm3716_vm9, %v3678_v8, %v973_v47  ;;  %v966_v24 = vand.u32 2147483648, %v924_v30 }
 0x42c   :  { %v985_v27 = vsub.f32 1.0, %v984_v61  ;;  %v1183_v22 = vmul.f32 %v3517_v14, %v1024_v52  ;;  %v982_v63 = vsel %vm979_vm11, %v981_v45, %v977_v16  ;;  %v964_v48 = vand.u32 2147483647, %v924_v30  ;;  %v2566_v61 = vld [vmem:[%s4733_s2 + $0x28] sm:$0xff] }
 0x42d   :  { %v1180_v9 = vmul.f32 %v3519_v39, %v982_v63  ;;  %vm960_vm13 = vweird.f32 %v924_v30  ;;  %v967_v44 = vor.u32 1.1754944e-38, %v966_v24 }
 0x42e   :  { %v986_v34 = vmul.f32 %v2763_v31, %v985_v27  ;;  %1206 = vmatpush.xpose.msrb.mxu0 %v1183_v22  ;;  %vm965_vm15 = vcmp.eq.f32.partialorder %v964_v48, 8.507059e+37  ;;  %v2568_v27 = vld [vmem:[%s4733_s2 + $0x38] sm:$0xff] }
 0x430   :  { %v987_v14 = vadd.f32 %v2763_v31, %v986_v34 }
 0x431   :  { %v2765_v53 = vpop.eup %2764 }
 0x432   :  { %v956_v33 = vmul.f32 %v2765_v53, %v924_v30  ;;  %1207 = vmatpush.xpose.msrb.mxu0 %v1182_v43  ;;  %v991_v0 = vsel %vm990_vm10, %v2763_v31, %v987_v14  ;;  %vm961_vm12 = vweird.f32 %v2765_v53 }
 0x433   :  { %v996_v36 = vsel %vm993_vm0, %v995_v35, %v991_v0  ;;  %vm962_vm14 = vmor %vm960_vm13, %vm961_vm12 }
 0x434   :  { %v957_v23 = vsub.f32 1.0, %v956_v33  ;;  %v1181_v18 = vmul.f32 %v3524_v21, %v996_v36  ;;  %v134_v21 = vpop.f32.mrf.mxu0 }
 0x436   :  { %v958_v37 = vmul.f32 %v2765_v53, %v957_v23  ;;  %1208 = vmatpush.xpose.msrb.mxu0 %v1181_v18 }
 0x438   :  { %v959_v40 = vadd.f32 %v2765_v53, %v958_v37 }
 0x43a   :  { %1209 = vmatpush.xpose.msrb.mxu0 %v1180_v9  ;;  %v963_v8 = vsel %vm962_vm14, %v2765_v53, %v959_v40 }
 0x43b   :  { %v968_v54 = vsel %vm965_vm15, %v967_v44, %v963_v8 }
 0x43c   :  { %v1179_v38 = vmul.f32 %v3531_v60, %v968_v54 }
 0x43e   :  { %1210 = vmatpush.xpose.msrb.mxu0 %v1179_v38 }
 0x441   :  { %1211 = vmatmul.f32.vlgmr.msrb.gmra.mxu0 %v134_v21  ;;  %v1316_v21 = vld [vmem:[#allocation2 + $0x168] sm:$0xff] }
 0x442   :  { %1414 = vmatpush.msra.mxu0 %v3501_v58  ;;  %v678_v58 = vld [vmem:[%s4733_s2 + $0x8] sm:$0xff] }
 0x443   :  { %2574 = vmatmul.msk.f32.gmra.mxu2 %vm191_vm1, %v678_v58 }
 0x44b   :  { %2575 = vmatmul.msk.f32.gmra.mxu2 %vm191_vm1, %v679_v5 }
 0x453   :  { %2576 = vmatmul.msk.f32.gmra.mxu2 %vm191_vm1, %v680_v62  ;;  %v1314_v62 = vld [vmem:[#allocation2 + $0x158] sm:$0xff] }
 0x469   :  { %v1335_v42 = vpop.trf.xlu2 }
 0x46a   :  { %2577 = vmatmul.msk.f32.vlgmr.msra.gmra.mxu0 %vm191_vm1, %v1335_v42 }
 0x471   :  { %v1336_v2 = vpop.trf.xlu2 }
 0x472   :  { %2578 = vmatmul.msk.f32.gmra.mxu0 %vm191_vm1, %v1336_v2 }
 0x479   :  { %v1337_v39 = vpop.trf.xlu2 }
 0x47a   :  { %2579 = vmatmul.msk.f32.gmra.mxu0 %vm191_vm1, %v1337_v39 }
 0x481   :  { %v1338_v60 = vpop.trf.xlu2 }
 0x482   :  { %2580 = vmatmul.msk.f32.gmra.mxu0 %vm191_vm1, %v1338_v60  ;;  %v1317_v60 = vld [vmem:[#allocation2 + $0x170] sm:$0xff] }
 0x489   :  { %v1339_v56 = vpop.trf.xlu2 }
 0x48a   :  { %2581 = vmatmul.msk.f32.gmra.mxu0 %vm191_vm1, %v1339_v56 }
 0x491   :  { %v1340_v41 = vpop.trf.xlu2 }
 0x492   :  { %2582 = vmatmul.msk.f32.gmra.mxu0 %vm191_vm1, %v1340_v41 }
 0x495   :  { %v1919_v10 = vpop.trf.xlu1 }
 0x496   :  { %2601 = vmatmul.msk.f32.vlgmr.msra.gmra.mxu2 %vm191_vm1, %v1919_v10 }
 0x499   :  { %v1341_v15 = vpop.trf.xlu2 }
 0x49a   :  { %2583 = vmatmul.msk.f32.gmra.mxu0 %vm191_vm1, %v1341_v15  ;;  %v3758_v51 = vpop.f32.mrf.mxu0  ;;  %v1318_v15 = vld [vmem:[#allocation2 + $0x178] sm:$0xff] }
 0x49d   :  { %v1920_v57 = vpop.trf.xlu1 }
 0x49e   :  { %2602 = vmatmul.msk.f32.gmra.mxu2 %vm191_vm1, %v1920_v57 }
 0x4a1   :  { %v1342_v3 = vpop.trf.xlu2 }
 0x4a2   :  { %2584 = vmatmul.msk.f32.gmra.mxu0 %vm191_vm1, %v1342_v3 }
 0x4a5   :  { %v1921_v19 = vpop.trf.xlu1 }
 0x4a6   :  { %2603 = vmatmul.msk.f32.gmra.mxu2 %vm191_vm1, %v1921_v19  ;;  %v1304_v19 = vld [vmem:[#allocation2 + $0x108] sm:$0xff] }
 0x4a9   :  { %v1343_v20 = vpop.trf.xlu2  ;;  %v3793_v43 = vpop.f32.mrf.mxu2 }
 0x4aa   :  { %2585 = vmatmul.msk.f32.gmra.mxu0 %vm191_vm1, %v1343_v20  ;;  %4766 = vst [vmem:[#allocation9_spill] sm:$0xff] %v3793_v43 }
 0x4ad   :  { %v1922_v59 = vpop.trf.xlu1 }
 0x4ae   :  { %2604 = vmatmul.msk.f32.gmra.mxu2 %vm191_vm1, %v1922_v59 }
 0x4b1   :  { %v1344_v12 = vpop.trf.xlu2 }
 0x4b2   :  { %2586 = vmatmul.msk.f32.gmra.mxu0 %vm191_vm1, %v1344_v12  ;;  %v1313_v12 = vld [vmem:[#allocation2 + $0x150] sm:$0xff] }
 0x4b5   :  { %v1923_v1 = vpop.trf.xlu1 }
 0x4b6   :  { %2605 = vmatmul.msk.f32.gmra.mxu2 %vm191_vm1, %v1923_v1 }
 0x4b9   :  { %v1345_v6 = vpop.trf.xlu2 }
 0x4ba   :  { %2587 = vmatmul.msk.f32.gmra.mxu0 %vm191_vm1, %v1345_v6 }
 0x4bd   :  { %v1924_v28 = vpop.trf.xlu1 }
 0x4be   :  { %v1212_v31 = vpop.f32.mrf.mxu0  ;;  %2606 = vmatmul.msk.f32.gmra.mxu2 %vm191_vm1, %v1924_v28 }
 0x4bf   :  { %1247 = vmatpush.msrb.mxu3 %v1212_v31  ;;  %v1312_v31 = vld [vmem:[#allocation2 + $0x148] sm:$0xff] }
 0x4c0   :  { %2569 = vmatmul.msk.f32.vlgmr.msrb.gmra.mxu3 %vm191_vm1, %v2565_v26  ;;  %v1303_v26 = vld [vmem:[#allocation2 + $0x100] sm:$0xff] }
 0x4c1   :  { %v1346_v25 = vpop.trf.xlu2 }
 0x4c2   :  { %2588 = vmatmul.msk.f32.gmra.mxu0 %vm191_vm1, %v1346_v25 }
 0x4c5   :  { %v1925_v13 = vpop.trf.xlu1 }
 0x4c6   :  { %2607 = vmatmul.msk.f32.gmra.mxu2 %vm191_vm1, %v1925_v13  ;;  %v3800_v53 = vpop.f32.mrf.mxu2  ;;  %v1311_v13 = vld [vmem:[#allocation2 + $0x140] sm:$0xff] }
 0x4c7   :  { %4767 = vst [vmem:[#allocation10_spill] sm:$0xff] %v3800_v53 }
 0x4c8   :  { %2570 = vmatmul.msk.f32.gmra.mxu3 %vm191_vm1, %v2566_v61  ;;  %v1894_v61 = vld [vmem:[#allocation2 + $0x1b8] sm:$0xff] }
 0x4c9   :  { %v1347_v30 = vpop.trf.xlu2 }
 0x4ca   :  { %2589 = vmatmul.msk.f32.gmra.mxu0 %vm191_vm1, %v1347_v30 }
 0x4cd   :  { %v1926_v17 = vpop.trf.xlu1 }
 0x4ce   :  { %2608 = vmatmul.msk.f32.gmra.mxu2 %vm191_vm1, %v1926_v17  ;;  %v3805_v16 = vpop.f32.mrf.mxu2  ;;  %v1310_v17 = vld [vmem:[#allocation2 + $0x138] sm:$0xff] }
 0x4cf   :  { %4768 = vst [vmem:[#allocation11_spill] sm:$0xff] %v3805_v16 }
 0x4d0   :  { %2571 = vmatmul.msk.f32.gmra.mxu3 %vm191_vm1, %v2567_v7 }
 0x4d1   :  { %v1348_v52 = vpop.trf.xlu2 }
 0x4d2   :  { %2590 = vmatmul.msk.f32.gmra.mxu0 %vm191_vm1, %v1348_v52 }
 0x4d5   :  { %v1927_v49 = vpop.trf.xlu1 }
 0x4d6   :  { %2609 = vmatmul.msk.f32.gmra.mxu2 %vm191_vm1, %v1927_v49  ;;  %v3808_v45 = vpop.f32.mrf.mxu2  ;;  %v1307_v49 = vld [vmem:[#allocation2 + $0x120] sm:$0xff] }
 0x4d7   :  { %4769 = vst [vmem:[#allocation12_spill] sm:$0xff] %v3808_v45 }
 0x4d8   :  { %2572 = vmatmul.msk.f32.gmra.mxu3 %vm191_vm1, %v2568_v27 }
 0x4d9   :  { %v1349_v22 = vpop.trf.xlu2 }
 0x4da   :  { %2591 = vmatmul.msk.f32.gmra.mxu0 %vm191_vm1, %v1349_v22  ;;  %v1309_v22 = vld [vmem:[#allocation2 + $0x130] sm:$0xff] }
 0x4dd   :  { %v1928_v55 = vpop.trf.xlu1 }
 0x4de   :  { %2610 = vmatmul.msk.f32.gmra.mxu2 %vm191_vm1, %v1928_v55 }
 0x4e1   :  { %v1350_v50 = vpop.trf.xlu2 }
 0x4e2   :  { %2592 = vmatmul.msk.f32.gmra.mxu0 %vm191_vm1, %v1350_v50 }
 0x4e5   :  { %v1929_v35 = vpop.trf.xlu1 }
 0x4e6   :  { %2611 = vmatmul.msk.f32.gmra.mxu2 %vm191_vm1, %v1929_v35  ;;  %v1306_v35 = vld [vmem:[#allocation2 + $0x118] sm:$0xff] }
 0x4e7   :  { %v3786_v46 = vpop.f32.mrf.mxu0 }
 0x4e8   :  { %v3850_v25 = vadd.f32 %v3786_v46, %v1303_v26  ;;  %v1308_v46 = vld [vmem:[#allocation2 + $0x128] sm:$0xff] }
 0x4ed   :  { %v1930_v0 = vpop.trf.xlu1 }
 0x4ee   :  { %2612 = vmatmul.msk.f32.gmra.mxu2 %vm191_vm1, %v1930_v0 }
 0x4ef   :  { %v1419_v34 = vpop.f32.mrf.mxu0 }
 0x4f0   :  { %v3841_v59 = vadd.f32 %v1419_v34, %v1304_v19 }
 0x4f5   :  { %v1931_v48 = vpop.trf.xlu1 }
 0x4f6   :  { %2613 = vmatmul.msk.f32.gmra.mxu2 %vm191_vm1, %v1931_v48  ;;  %v1897_v48 = vld [vmem:[#allocation2 + $0x1d0] sm:$0xff] }
 0x4f7   :  { %v3788_v29 = vpop.f32.mrf.mxu0 }
 0x4fd   :  { %v1932_v44 = vpop.trf.xlu1 }
 0x4fe   :  { %2614 = vmatmul.msk.f32.gmra.mxu2 %vm191_vm1, %v1932_v44 }
 0x4ff   :  { %v3790_v47 = vpop.f32.mrf.mxu0 }
 0x505   :  { %v1933_v54 = vpop.trf.xlu1 }
 0x506   :  { %2615 = vmatmul.msk.f32.gmra.mxu2 %vm191_vm1, %v1933_v54 }
 0x507   :  { %v3795_v14 = vpop.f32.mrf.mxu0 }
 0x508   :  { %v3874_v55 = vadd.f32 %v3795_v14, %v1307_v49 }
 0x50d   :  { %v1934_v39 = vpop.trf.xlu1 }
 0x50e   :  { %2616 = vmatmul.msk.f32.gmra.mxu2 %vm191_vm1, %v1934_v39 }
 0x50f   :  { %v3798_v4 = vpop.f32.mrf.mxu0 }
 0x510   :  { %v3870_v34 = vadd.f32 %v3798_v4, %v1308_v46 }
 0x517   :  { %v3803_v33 = vpop.f32.mrf.mxu0 }
 0x518   :  { %v3866_v50 = vadd.f32 %v3803_v33, %v1309_v22  ;;  %v3880_v33 = vadd.f32 %v3790_v47, %v1306_v35  ;;  %v1898_v47 = vld [vmem:[#allocation2 + $0x1d8] sm:$0xff] }
 0x519   :  { %v3810_v18 = vpop.f32.mrf.mxu2 }
 0x51f   :  { %v1437_v36 = vpop.f32.mrf.mxu0 }
 0x520   :  { %v3862_v27 = vadd.f32 %v1437_v36, %v1310_v17  ;;  %v1305_v36 = vld [vmem:[#allocation2 + $0x110] sm:$0xff] }
 0x521   :  { %v3812_v37 = vpop.f32.mrf.mxu2  ;;  %v3884_v4 = vadd.f32 %v3788_v29, %v1305_v36 }
 0x527   :  { %v1440_v23 = vpop.f32.mrf.mxu0 }
 0x528   :  { %v3858_v52 = vadd.f32 %v1440_v23, %v1311_v13 }
 0x529   :  { %v3815_v40 = vpop.f32.mrf.mxu2 }
 0x52f   :  { %v1443_v63 = vpop.f32.mrf.mxu0 }
 0x530   :  { %v3852_v28 = vadd.f32 %v1443_v63, %v1312_v31  ;;  %v1896_v63 = vld [vmem:[#allocation2 + $0x1c8] sm:$0xff]  ;;  %v1893_v31 = vld [vmem:[#allocation2 + $0x1b0] sm:$0xff] }
 0x531   :  { %v3818_v38 = vpop.f32.mrf.mxu2 }
 0x537   :  { %v1446_v24 = vpop.f32.mrf.mxu0 }
 0x538   :  { %v3843_v6 = vadd.f32 %v1446_v24, %v1313_v12 }
 0x539   :  { %v3825_v58 = vpop.f32.mrf.mxu2 }
 0x53f   :  { %v1449_v9 = vpop.f32.mrf.mxu0 }
 0x540   :  { %v3835_v57 = vadd.f32 %v1449_v9, %v1314_v62 }
 0x541   :  { %v3833_v3 = vpop.f32.mrf.mxu2 }
 0x547   :  { %v1452_v8 = vpop.f32.mrf.mxu0 }
 0x548   :  { %v3827_v5 = vadd.f32 %v1452_v8, %v1315_v11 }
 0x549   :  { %v3845_v1 = vpop.f32.mrf.mxu2 }
 0x54a   :  { %v3915_v22 = vadd.f32 %v3845_v1, %v1893_v31  ;;  %v1891_v1 = vld [vmem:[#allocation2 + $0x1a0] sm:$0xff] }
 0x54f   :  { %v1455_v42 = vpop.f32.mrf.mxu0 }
 0x550   :  { %v3821_v2 = vadd.f32 %v1455_v42, %v1316_v21 }
 0x551   :  { %v2021_v30 = vpop.f32.mrf.mxu2 }
 0x552   :  { %1490 = vmax.xlane.f32.xlu0 %v3821_v2  ;;  %v3856_v7 = vadd.f32 %v2021_v30, %v1894_v61 }
 0x557   :  { %v1458_v56 = vpop.f32.mrf.mxu0 }
 0x558   :  { %v3829_v41 = vadd.f32 %v1458_v56, %v1317_v60 }
 0x559   :  { %v3877_v0 = vpop.f32.mrf.mxu2 }
 0x55a   :  { %1492 = vmax.xlane.f32.xlu1 %v3829_v41  ;;  %1488 = vmax.xlane.f32.xlu0 %v3827_v5 }
 0x55f   :  { %v1461_v10 = vpop.f32.mrf.mxu0 }
 0x560   :  { %v3837_v20 = vadd.f32 %v1461_v10, %v1318_v15 }
 0x561   :  { %v2027_v23 = vpop.f32.mrf.mxu2 }
 0x562   :  { %1494 = vmax.xlane.f32.xlu2 %v3837_v20  ;;  %1486 = vmax.xlane.f32.xlu0 %v3835_v57  ;;  %v3887_v14 = vadd.f32 %v2027_v23, %v1896_v63 }
 0x569   :  { %v2030_v24 = vpop.f32.mrf.mxu2 }
 0x56a   :  { %1484 = vmax.xlane.f32.xlu0 %v3843_v6  ;;  %1466 = vmax.xlane.f32.xlu2 %v3841_v59  ;;  %v3890_v9 = vadd.f32 %v2030_v24, %v1897_v48 }
 0x571   :  { %v2033_v44 = vpop.f32.mrf.mxu2 }
 0x572   :  { %1482 = vmax.xlane.f32.xlu0 %v3852_v28  ;;  %1464 = vmax.xlane.f32.xlu2 %v3850_v25  ;;  %v3893_v8 = vadd.f32 %v2033_v44, %v1898_v47 }
 0x57a   :  { %1480 = vmax.xlane.f32.xlu0 %v3858_v52  ;;  %2062 = vmax.xlane.f32.xlu2 %v3856_v7 }
 0x582   :  { %1478 = vmax.xlane.f32.xlu0 %v3862_v27 }
 0x58a   :  { %1476 = vmax.xlane.f32.xlu0 %v3866_v50 }
 0x592   :  { %1474 = vmax.xlane.f32.xlu0 %v3870_v34 }
 0x59a   :  { %1472 = vmax.xlane.f32.xlu0 %v3874_v55 }
 0x5a2   :  { %1470 = vmax.xlane.f32.xlu0 %v3880_v33 }
 0x5aa   :  { %1468 = vmax.xlane.f32.xlu0 %v3884_v4 }
 0x5b2   :  { %2066 = vmax.xlane.f32.xlu0 %v3887_v14 }
 0x5ba   :  { %2068 = vmax.xlane.f32.xlu0 %v3890_v9 }
 0x5c2   :  { %2070 = vmax.xlane.f32.xlu0 %v3893_v8 }
 0x5c5   :  { %v1491_v29 = vpop.xlane.xlu0 %1490 }
 0x5c6   :  { %v1509_v54 = vsub.f32 %v3821_v2, %v1491_v29  ;;  %v1901_v29 = vld [vmem:[#allocation2 + $0x1f0] sm:$0xff] }
 0x5c8   :  { %v1538_v21 = vmul.f32 1.442695, %v1509_v54  ;;  %v1890_v54 = vld [vmem:[#allocation2 + $0x198] sm:$0xff] }
 0x5ca   :  { %2766 = vpow2.f32 %v1538_v21 }
 0x5cd   :  { %v1493_v42 = vpop.xlane.xlu1 %1492  ;;  %v1489_v39 = vpop.xlane.xlu0 %1488 }
 0x5ce   :  { %v1510_v11 = vsub.f32 %v3829_v41, %v1493_v42  ;;  %v1508_v60 = vsub.f32 %v3827_v5, %v1489_v39  ;;  %v1899_v5 = vld [vmem:[#allocation2 + $0x1e0] sm:$0xff]  ;;  %v2036_v41 = vpop.f32.mrf.mxu2 }
 0x5cf   :  { %v3911_v13 = vadd.f32 %v2036_v41, %v1899_v5 }
 0x5d0   :  { %v3899_v56 = vpop.eup %2766  ;;  %v1540_v62 = vmul.f32 1.442695, %v1510_v11  ;;  %v1536_v15 = vmul.f32 1.442695, %v1508_v60  ;;  %v3940_v11 = vadd.f32 %v3818_v38, %v1890_v54 }
 0x5d1   :  { %1570 = vadd.xlane.f32.xlu1 %v3899_v56 }
 0x5d2   :  { %2768 = vpow2.f32 %v1540_v62 }
 0x5d3   :  { %2770 = vpow2.f32 %v1536_v15  ;;  %v1889_v15 = vld [vmem:[#allocation2 + $0x190] sm:$0xff] }
 0x5d4   :  { %v3948_v41 = vadd.f32 %v3815_v40, %v1889_v15 }
 0x5d5   :  { %v3902_v10 = vpop.xlane.xlu0 %1486  ;;  %v1495_v19 = vpop.xlane.xlu2 %1494 }
 0x5d6   :  { %v1511_v26 = vsub.f32 %v3837_v20, %v1495_v19  ;;  %v2039_v35 = vpop.f32.mrf.mxu2  ;;  %v1507_v31 = vsub.f32 %v3835_v57, %v3902_v10 }
 0x5d8   :  { %v3904_v2 = vpop.eup %2768  ;;  %v1542_v61 = vmul.f32 1.442695, %v1511_v26 }
 0x5d9   :  { %v3906_v12 = vpop.eup %2770  ;;  %1572 = vadd.xlane.f32.xlu0 %v3904_v2 }
 0x5da   :  { %1568 = vadd.xlane.f32.xlu1 %v3906_v12  ;;  %2772 = vpow2.f32 %v1542_v61  ;;  %v1888_v61 = vld [vmem:[#allocation2 + $0x188] sm:$0xff] }
 0x5dd   :  { %v1485_v30 = vpop.xlane.xlu0 %1484 }
 0x5de   :  { %v1506_v17 = vsub.f32 %v3843_v6, %v1485_v30  ;;  %v1900_v6 = vld [vmem:[#allocation2 + $0x1e8] sm:$0xff]  ;;  %v2042_v44 = vpop.f32.mrf.mxu2  ;;  %v1895_v30 = vld [vmem:[#allocation2 + $0x1c0] sm:$0xff] }
 0x5df   :  { %v3926_v48 = vadd.f32 %v2039_v35, %v1900_v6  ;;  %v3936_v42 = vadd.f32 %v2042_v44, %v1901_v29  ;;  %v1892_v44 = vld [vmem:[#allocation2 + $0x1a8] sm:$0xff] }
 0x5e0   :  { %v1532_v46 = vmul.f32 1.442695, %v1506_v17  ;;  %v3920_v36 = vpop.eup %2772  ;;  %v1534_v17 = vmul.f32 1.442695, %v1507_v31 }
 0x5e1   :  { %2072 = vmax.xlane.f32.xlu0 %v3911_v13 }
 0x5e2   :  { %2774 = vpow2.f32 %v1532_v46  ;;  %2060 = vmax.xlane.f32.xlu1 %v3915_v22  ;;  %v3959_v46 = vadd.f32 %v3812_v37, %v1888_v61 }
 0x5e5   :  { %v1483_v20 = vpop.xlane.xlu0 %1482 }
 0x5e6   :  { %v1505_v49 = vsub.f32 %v3852_v28, %v1483_v20  ;;  %v3931_v28 = vadd.f32 %v3825_v58, %v1891_v1  ;;  %v1902_v58 = vld [vmem:[#allocation2 + $0x1f8] sm:$0xff]  ;;  %v2045_v62 = vpop.f32.mrf.mxu2  ;;  %v3962_v20 = vadd.f32 %v3877_v0, %v1895_v30 }
 0x5e7   :  { %v3944_v26 = vadd.f32 %v2045_v62, %v1902_v58 }
 0x5e8   :  { %v3922_v23 = vpop.eup %2774  ;;  %v1530_v63 = vmul.f32 1.442695, %v1505_v49  ;;  %v1887_v49 = vld [vmem:[#allocation2 + $0x180] sm:$0xff] }
 0x5e9   :  { %1574 = vadd.xlane.f32.xlu0 %v3920_v36  ;;  %1564 = vadd.xlane.f32.xlu2 %v3922_v23  ;;  %v3973_v0 = vadd.f32 %v3810_v18, %v1887_v49  ;;  %v3983_v18 = vadd.f32 %v3833_v3, %v1892_v44  ;;  %v1467_v3 = vpop.xlane.xlu2 %1466 }
 0x5ea   :  { %2776 = vpow2.f32 %v1530_v63 }
 0x5ed   :  { %v1481_v24 = vpop.xlane.xlu0 %1480 }
 0x5ee   :  { %v1504_v1 = vsub.f32 %v3858_v52, %v1481_v24 }
 0x5f0   :  { %v3928_v47 = vpop.eup %2776  ;;  %v1528_v29 = vmul.f32 1.442695, %v1504_v1 }
 0x5f1   :  { %1562 = vadd.xlane.f32.xlu1 %v3928_v47  ;;  %2074 = vmax.xlane.f32.xlu0 %v3926_v48  ;;  %v1465_v62 = vpop.xlane.xlu2 %1464 }
 0x5f2   :  { %2056 = vmax.xlane.f32.xlu2 %v3931_v28 }
 0x5f5   :  { %v1479_v21 = vpop.xlane.xlu0 %1478 }
 0x5f6   :  { %v1503_v39 = vsub.f32 %v3862_v27, %v1479_v21 }
 0x5f8   :  { %v1526_v60 = vmul.f32 1.442695, %v1503_v39 }
 0x5f9   :  { %2054 = vmax.xlane.f32.xlu1 %v3940_v11  ;;  %2076 = vmax.xlane.f32.xlu0 %v3936_v42 }
 0x5fa   :  { %2778 = vpow2.f32 %v1526_v60 }
 0x5fd   :  { %v1477_v19 = vpop.xlane.xlu0 %1476 }
 0x5fe   :  { %v1502_v5 = vsub.f32 %v3866_v50, %v1477_v19 }
 0x600   :  { %v3950_v27 = vpop.eup %2778  ;;  %v1524_v38 = vmul.f32 1.442695, %v1502_v5  ;;  %v1496_v5 = vsub.f32 %v3850_v25, %v1465_v62 }
 0x601   :  { %2052 = vmax.xlane.f32.xlu1 %v3948_v41  ;;  %2078 = vmax.xlane.f32.xlu0 %v3944_v26 }
 0x602   :  { %2780 = vpow2.f32 %v1524_v38  ;;  %1558 = vadd.xlane.f32.xlu2 %v3950_v27  ;;  %v1512_v38 = vmul.f32 1.442695, %v1496_v5 }
 0x603   :  { %2782 = vpow2.f32 %v1534_v17 }
 0x605   :  { %v1475_v50 = vpop.xlane.xlu0 %1474 }
 0x606   :  { %v1501_v40 = vsub.f32 %v3870_v34, %v1475_v50  ;;  %v1497_v50 = vsub.f32 %v3841_v59, %v1467_v3 }
 0x608   :  { %v3964_v57 = vpop.eup %2780  ;;  %v1522_v10 = vmul.f32 1.442695, %v1501_v40  ;;  %v1514_v40 = vmul.f32 1.442695, %v1497_v50 }
 0x609   :  { %2050 = vmax.xlane.f32.xlu1 %v3959_v46  ;;  %2064 = vmax.xlane.f32.xlu0 %v3962_v20  ;;  %v3970_v37 = vpop.eup %2782 }
 0x60a   :  { %2784 = vpow2.f32 %v1522_v10  ;;  %1556 = vadd.xlane.f32.xlu2 %v3964_v57 }
 0x60d   :  { %v1473_v35 = vpop.xlane.xlu0 %1472 }
 0x60e   :  { %v1500_v34 = vsub.f32 %v3874_v55, %v1473_v35 }
 0x610   :  { %v3975_v63 = vpop.eup %2784  ;;  %v1520_v6 = vmul.f32 1.442695, %v1500_v34 }
 0x611   :  { %2048 = vmax.xlane.f32.xlu1 %v3973_v0  ;;  %1566 = vadd.xlane.f32.xlu0 %v3970_v37 }
 0x612   :  { %2786 = vpow2.f32 %v1520_v6  ;;  %1554 = vadd.xlane.f32.xlu2 %v3975_v63 }
 0x613   :  { %2788 = vpow2.f32 %v1528_v29 }
 0x615   :  { %v1471_v55 = vpop.xlane.xlu0 %1470 }
 0x616   :  { %v1499_v54 = vsub.f32 %v3880_v33, %v1471_v55 }
 0x618   :  { %v3985_v21 = vpop.eup %2786  ;;  %v1518_v39 = vmul.f32 1.442695, %v1499_v54 }
 0x619   :  { %2058 = vmax.xlane.f32.xlu0 %v3983_v18  ;;  %v3991_v24 = vpop.eup %2788 }
 0x61a   :  { %2790 = vpow2.f32 %v1518_v39  ;;  %1552 = vadd.xlane.f32.xlu2 %v3985_v21  ;;  %v4033_v39 = vpop.xlane.xlu2 %2062 }
 0x61d   :  { %v3989_v52 = vpop.xlane.xlu0 %1468 }
 0x620   :  { %v3993_v60 = vpop.eup %2790 }
 0x621   :  { %1550 = vadd.xlane.f32.xlu1 %v3993_v60  ;;  %1560 = vadd.xlane.f32.xlu0 %v3991_v24 }
 0x625   :  { %v3997_v33 = vpop.xlane.xlu0 %2066 }
 0x62d   :  { %v2069_v58 = vpop.xlane.xlu0 %2068 }
 0x62e   :  { %v2090_v15 = vsub.f32 %v3890_v9, %v2069_v58 }
 0x630   :  { %v2116_v19 = vmul.f32 1.442695, %v2090_v15 }
 0x632   :  { %2792 = vpow2.f32 %v2116_v19 }
 0x633   :  { %2794 = vpow2.f32 %v1512_v38 }
 0x635   :  { %v2071_v31 = vpop.xlane.xlu0 %2070 }
 0x636   :  { %v2091_v61 = vsub.f32 %v3893_v8, %v2071_v31 }
 0x638   :  { %v4002_v30 = vpop.eup %2792  ;;  %v2118_v17 = vmul.f32 1.442695, %v2091_v61 }
 0x639   :  { %4770 = vst [vmem:[#allocation13_spill] sm:$0xff] %v4002_v30  ;;  %2148 = vadd.xlane.f32.xlu1 %v4002_v30  ;;  %v4006_v10 = vpop.eup %2794 }
 0x63a   :  { %2796 = vpow2.f32 %v2118_v17 }
 0x63b   :  { %2798 = vpow2.f32 %v1514_v40 }
 0x640   :  { %v4008_v9 = vpop.eup %2796 }
 0x641   :  { %2150 = vadd.xlane.f32.xlu2 %v4008_v9  ;;  %1544 = vadd.xlane.f32.xlu1 %v4006_v10  ;;  %v4014_v8 = vpop.eup %2798 }
 0x644   :  { %v4012_v25 = vpop.xlane.xlu1 %1570 }
 0x645   :  { %v1769_v53 = vand.u32 2147483648, %v4012_v25  ;;  %vm1763_vm10 = vweird.f32 %v4012_v25 }
 0x649   :  { %1546 = vadd.xlane.f32.xlu2 %v4014_v8 }
 0x64c   :  { %v4017_v49 = vpop.xlane.xlu0 %1572 }
 0x64d   :  { %v4019_v59 = vpop.xlane.xlu1 %1568  ;;  %2800 = vrcp.f32 %v4017_v49  ;;  %vm1777_vm4 = vweird.f32 %v4017_v49  ;;  %v1783_v43 = vand.u32 2147483648, %v4017_v49 }
 0x64e   :  { %2802 = vrcp.f32 %v4012_v25  ;;  %vm1749_vm14 = vweird.f32 %v4019_v59 }
 0x64f   :  { %2804 = vrcp.f32 %v4019_v59  ;;  %v1784_v32 = vor.u32 1.1754944e-38, %v1783_v43 }
 0x653   :  { %v4026_v1 = vpop.eup %2800 }
 0x654   :  { %v4022_v35 = vpop.xlane.xlu0 %2072  ;;  %v4029_v29 = vpop.eup %2802  ;;  %v1773_v55 = vmul.f32 %v4026_v1, %v4017_v49  ;;  %vm1778_vm2 = vweird.f32 %v4026_v1 }
 0x655   :  { %v2061_v34 = vpop.xlane.xlu1 %2060  ;;  %v1759_v3 = vmul.f32 %v4029_v29, %v4012_v25  ;;  %v4037_v58 = vpop.eup %2804  ;;  %vm4056_vm6 = vmor %vm1777_vm4, %vm1778_vm2  ;;  %vm1764_vm8 = vweird.f32 %v4029_v29 }
 0x656   :  { %v2086_v6 = vsub.f32 %v3915_v22, %v2061_v34  ;;  %v1774_v22 = vsub.f32 1.0, %v1773_v55  ;;  %v1745_v5 = vmul.f32 %v4037_v58, %v4019_v59  ;;  %vm4076_vm11 = vmor %vm1763_vm10, %vm1764_vm8  ;;  %vm1750_vm12 = vweird.f32 %v4037_v58 }
 0x657   :  { %v1760_v15 = vsub.f32 1.0, %v1759_v3  ;;  %vm1751_vm15 = vmor %vm1749_vm14, %vm1750_vm12 }
 0x658   :  { %v2108_v44 = vmul.f32 1.442695, %v2086_v6  ;;  %v1775_v38 = vmul.f32 %v4026_v1, %v1774_v22 }
 0x659   :  { %v1761_v40 = vmul.f32 %v4029_v29, %v1760_v15 }
 0x65a   :  { %2806 = vpow2.f32 %v2108_v44  ;;  %v1746_v44 = vsub.f32 1.0, %v1745_v5  ;;  %v1776_v3 = vadd.f32 %v4026_v1, %v1775_v38  ;;  %v1781_v5 = vand.u32 2147483647, %v4017_v49 }
 0x65c   :  { %v1575_v54 = vpop.xlane.xlu0 %1574  ;;  %v4047_v50 = vpop.xlane.xlu2 %1564  ;;  %vm1782_vm0 = vcmp.eq.f32.partialorder %v1781_v5, 8.507059e+37 }
 0x65d   :  { %2808 = vrcp.f32 %v1575_v54  ;;  %v1797_v55 = vand.u32 2147483648, %v1575_v54  ;;  %v1795_v22 = vand.u32 2147483647, %v1575_v54  ;;  %vm1791_vm5 = vweird.f32 %v1575_v54 }
 0x65f   :  { %v1798_v38 = vor.u32 1.1754944e-38, %v1797_v55  ;;  %vm1796_vm9 = vcmp.eq.f32.partialorder %v1795_v22, 8.507059e+37 }
 0x660   :  { %v4039_v62 = vpop.eup %2806 }
 0x661   :  { %4771 = vst [vmem:[#allocation14_spill] sm:$0xff] %v4039_v62  ;;  %2140 = vadd.xlane.f32.xlu1 %v4039_v62 }
 0x663   :  { %v2809_v19 = vpop.eup %2808 }
 0x664   :  { %v1787_v31 = vmul.f32 %v2809_v19, %v1575_v54  ;;  %v4045_v61 = vpop.xlane.xlu1 %1562  ;;  %v2075_v17 = vpop.xlane.xlu0 %2074  ;;  %vm1792_vm3 = vweird.f32 %v2809_v19 }
 0x665   :  { %v2093_v6 = vsub.f32 %v3926_v48, %v2075_v17  ;;  %vm1793_vm7 = vmor %vm1791_vm5, %vm1792_vm3  ;;  %v1767_v17 = vand.u32 2147483647, %v4012_v25 }
 0x666   :  { %v1788_v34 = vsub.f32 1.0, %v1787_v31  ;;  %v1762_v31 = vadd.f32 %v4029_v29, %v1761_v40 }
 0x667   :  { %v2122_v16 = vmul.f32 1.442695, %v2093_v6  ;;  %v1780_v6 = vsel %vm4056_vm6, %v4026_v1, %v1776_v3  ;;  %vm1768_vm13 = vcmp.eq.f32.partialorder %v1767_v17, 8.507059e+37  ;;  %vm1721_vm6 = vweird.f32 %v4047_v50 }
 0x668   :  { %v1789_v45 = vmul.f32 %v2809_v19, %v1788_v34  ;;  %v1747_v34 = vmul.f32 %v4037_v58, %v1746_v44  ;;  %v4072_v44 = vpop.xlane.xlu2 %2056 }
 0x669   :  { %2810 = vpow2.f32 %v2122_v16 }
 0x66a   :  { %v1790_v15 = vadd.f32 %v2809_v19, %v1789_v45 }
 0x66c   :  { %v2055_v45 = vpop.xlane.xlu1 %2054  ;;  %v2077_v54 = vpop.xlane.xlu0 %2076  ;;  %v1794_v16 = vsel %vm1793_vm7, %v2809_v19, %v1790_v15  ;;  %v1785_v19 = vsel %vm1782_vm0, %v1784_v32, %v1780_v6  ;;  %v1755_v32 = vand.u32 2147483648, %v4019_v59 }
 0x66d   :  { %v2083_v49 = vsub.f32 %v3940_v11, %v2055_v45  ;;  %v2094_v55 = vsub.f32 %v3936_v42, %v2077_v54  ;;  %v1799_v40 = vsel %vm1796_vm9, %v1798_v38, %v1794_v16  ;;  %v1766_v42 = vsel %vm4076_vm11, %v4029_v29, %v1762_v31 }
 0x66e   :  { %v1815_v62 = vmul.f32 %v3920_v36, %v1799_v40  ;;  %v1748_v36 = vadd.f32 %v4037_v58, %v1747_v34  ;;  %v1770_v11 = vor.u32 1.1754944e-38, %v1769_v53  ;;  %v1814_v25 = vmul.f32 %v3904_v2, %v1785_v19 }
 0x66f   :  { %v2102_v22 = vmul.f32 1.442695, %v2083_v49  ;;  %v2124_v30 = vmul.f32 1.442695, %v2094_v55  ;;  %v4080_v43 = vpop.eup %2810  ;;  %v1756_v48 = vor.u32 1.1754944e-38, %v1755_v32  ;;  %vm1707_vm11 = vweird.f32 %v4045_v61 }
 0x670   :  { %1816 = vmatpush.xpose.msra.mxu1 %v1815_v62  ;;  %2154 = vadd.xlane.f32.xlu0 %v4080_v43  ;;  %v1753_v62 = vand.u32 2147483647, %v4019_v59  ;;  %v1771_v3 = vsel %vm1768_vm13, %v1770_v11, %v1766_v42  ;;  %v1752_v53 = vsel %vm1751_vm15, %v4037_v58, %v1748_v36  ;;  %v2092_v58 = vsub.f32 %v3911_v13, %v4022_v35 }
 0x671   :  { %2812 = vpow2.f32 %v2102_v22  ;;  %v1813_v38 = vmul.f32 %v3899_v56, %v1771_v3  ;;  %v1498_v13 = vsub.f32 %v3884_v4, %v3989_v52 }
 0x672   :  { %2814 = vpow2.f32 %v2124_v30  ;;  %vm1754_vm2 = vcmp.eq.f32.partialorder %v1753_v62, 8.507059e+37  ;;  %v2120_v45 = vmul.f32 1.442695, %v2092_v58 }
 0x673   :  { %v1757_v59 = vsel %vm1754_vm2, %v1756_v48, %v1752_v53  ;;  %v1516_v49 = vmul.f32 1.442695, %v1498_v13 }
 0x674   :  { %v4092_v29 = vpop.xlane.xlu1 %2052  ;;  %1817 = vmatpush.xpose.msra.mxu1 %v1814_v25  ;;  %v2079_v15 = vpop.xlane.xlu0 %2078  ;;  %v1812_v56 = vmul.f32 %v3906_v12, %v1757_v59 }
 0x675   :  { %v2095_v5 = vsub.f32 %v3944_v26, %v2079_v15  ;;  %v4099_v2 = vpop.xlane.xlu2 %1558 }
 0x676   :  { %vm1679_vm15 = vweird.f32 %v4099_v2 }
 0x677   :  { %v4097_v31 = vpop.eup %2812  ;;  %v2126_v30 = vmul.f32 1.442695, %v2095_v5  ;;  %v2087_v5 = vsub.f32 %v3856_v7, %v4033_v39 }
 0x678   :  { %v4101_v17 = vpop.eup %2814  ;;  %1818 = vmatpush.xpose.msra.mxu1 %v1813_v38  ;;  %2134 = vadd.xlane.f32.xlu1 %v4097_v31 }
 0x679   :  { %2156 = vadd.xlane.f32.xlu0 %v4101_v17  ;;  %2816 = vpow2.f32 %v2126_v30  ;;  %v2110_v13 = vmul.f32 1.442695, %v2087_v5 }
 0x67a   :  { %2818 = vrcp.f32 %v4047_v50 }
 0x67b   :  { %2820 = vrcp.f32 %v4045_v61 }
 0x67c   :  { %v4109_v26 = vpop.xlane.xlu1 %2050  ;;  %1819 = vmatpush.xpose.msra.mxu1 %v1812_v56  ;;  %v2065_v34 = vpop.xlane.xlu0 %2064  ;;  %2822 = vpow2.f32 %v2120_v45 }
 0x67d   :  { %v2088_v54 = vsub.f32 %v3962_v20, %v2065_v34  ;;  %v4119_v12 = vpop.xlane.xlu2 %1556  ;;  %v2082_v34 = vsub.f32 %v3948_v41, %v4092_v29 }
 0x67f   :  { %v2112_v16 = vmul.f32 1.442695, %v2088_v54  ;;  %v4112_v6 = vpop.eup %2816 }
 0x680   :  { %v4117_v35 = vpop.eup %2818 }
 0x681   :  { %2158 = vadd.xlane.f32.xlu0 %v4112_v6  ;;  %2824 = vpow2.f32 %v2112_v16  ;;  %v1717_v20 = vmul.f32 %v4117_v35, %v4047_v50  ;;  %v4125_v4 = vpop.eup %2820  ;;  %vm1722_vm3 = vweird.f32 %v4117_v35  ;;  %v1725_v16 = vand.u32 2147483647, %v4047_v50 }
 0x682   :  { %v4127_v52 = vpop.eup %2822  ;;  %v1703_v36 = vmul.f32 %v4125_v4, %v4045_v61  ;;  %vm4175_vm8 = vmor %vm1721_vm6, %vm1722_vm3  ;;  %vm1708_vm9 = vweird.f32 %v4125_v4 }
 0x683   :  { %v1718_v42 = vsub.f32 1.0, %v1717_v20  ;;  %vm1726_vm0 = vcmp.eq.f32.partialorder %v1725_v16, 8.507059e+37  ;;  %vm4203_vm12 = vmor %vm1707_vm11, %vm1708_vm9 }
 0x684   :  { %v2049_v55 = vpop.xlane.xlu1 %2048  ;;  %v1567_v40 = vpop.xlane.xlu0 %1566  ;;  %v1704_v15 = vsub.f32 1.0, %v1703_v36 }
 0x685   :  { %v2080_v22 = vsub.f32 %v3973_v0, %v2049_v55  ;;  %2826 = vrcp.f32 %v1567_v40  ;;  %v2089_v0 = vsub.f32 %v3887_v14, %v3997_v33  ;;  %v4138_v32 = vpop.xlane.xlu2 %1554  ;;  %v1719_v25 = vmul.f32 %v4117_v35, %v1718_v42 }
 0x686   :  { %2828 = vpow2.f32 %v1516_v49  ;;  %v1727_v33 = vand.u32 2147483648, %v4047_v50  ;;  %v1705_v39 = vmul.f32 %v4125_v4, %v1704_v15  ;;  %v1739_v45 = vand.u32 2147483647, %v1567_v40 }
 0x687   :  { %v2096_v19 = vmul.f32 1.442695, %v2080_v22  ;;  %v4129_v1 = vpop.eup %2824  ;;  %v2114_v38 = vmul.f32 1.442695, %v2089_v0  ;;  %v1720_v7 = vadd.f32 %v4117_v35, %v1719_v25  ;;  %vm1735_vm5 = vweird.f32 %v1567_v40 }
 0x688   :  { %2144 = vadd.xlane.f32.xlu2 %v4129_v1  ;;  %v1728_v29 = vor.u32 1.1754944e-38, %v1727_v33  ;;  %vm1740_vm10 = vcmp.eq.f32.partialorder %v1739_v45, 8.507059e+37  ;;  %v1706_v0 = vadd.f32 %v4125_v4, %v1705_v39  ;;  %vm1651_vm11 = vweird.f32 %v4138_v32 }
 0x689   :  { %2830 = vpow2.f32 %v2096_v19  ;;  %2152 = vadd.xlane.f32.xlu0 %v4127_v52  ;;  %v2100_v19 = vmul.f32 1.442695, %v2082_v34  ;;  %v1724_v36 = vsel %vm4175_vm8, %v4117_v35, %v1720_v7  ;;  %vm1665_vm8 = vweird.f32 %v4119_v12 }
 0x68a   :  { %2832 = vrcp.f32 %v4099_v2 }
 0x68b   :  { %v2827_v11 = vpop.eup %2826  ;;  %2834 = vrcp.f32 %v4119_v12 }
 0x68c   :  { %v1731_v62 = vmul.f32 %v2827_v11, %v1567_v40  ;;  %v2059_v3 = vpop.xlane.xlu0 %2058  ;;  %v4142_v48 = vpop.eup %2828  ;;  %vm1736_vm4 = vweird.f32 %v2827_v11 }
 0x68d   :  { %v2085_v53 = vsub.f32 %v3983_v18, %v2059_v3  ;;  %v1741_v18 = vand.u32 2147483648, %v1567_v40  ;;  %vm4165_vm7 = vmor %vm1735_vm5, %vm1736_vm4  ;;  %v4182_v42 = vpop.xlane.xlu2 %1552 }
 0x68e   :  { %v1732_v30 = vsub.f32 1.0, %v1731_v62 }
 0x68f   :  { %v4146_v14 = vpop.eup %2830  ;;  %v2106_v59 = vmul.f32 1.442695, %v2085_v53  ;;  %v1742_v20 = vor.u32 1.1754944e-38, %v1741_v18  ;;  %v1711_v53 = vand.u32 2147483647, %v4045_v61 }
 0x690   :  { %v4151_v58 = vpop.eup %2832  ;;  %v1733_v56 = vmul.f32 %v2827_v11, %v1732_v30  ;;  %2128 = vadd.xlane.f32.xlu1 %v4146_v14 }
 0x691   :  { %2836 = vpow2.f32 %v2106_v59  ;;  %1548 = vadd.xlane.f32.xlu0 %v4142_v48  ;;  %v1675_v49 = vmul.f32 %v4151_v58, %v4099_v2  ;;  %v4180_v22 = vpop.eup %2834  ;;  %vm1712_vm13 = vcmp.eq.f32.partialorder %v1711_v53, 8.507059e+37  ;;  %vm1680_vm14 = vweird.f32 %v4151_v58 }
 0x692   :  { %2838 = vpow2.f32 %v2114_v38  ;;  %v1734_v54 = vadd.f32 %v2827_v11, %v1733_v56  ;;  %v1661_v35 = vmul.f32 %v4180_v22, %v4119_v12  ;;  %v1729_v38 = vsel %vm1726_vm0, %v1728_v29, %v1724_v36  ;;  %vm4247_vm3 = vmor %vm1679_vm15, %vm1680_vm14 }
 0x693   :  { %2840 = vrcp.f32 %v4138_v32  ;;  %v1676_v3 = vsub.f32 1.0, %v1675_v49  ;;  %v2084_v56 = vsub.f32 %v3931_v28, %v4072_v44  ;;  %v1810_v7 = vmul.f32 %v3922_v23, %v1729_v38 }
 0x694   :  { %v4169_v55 = vpop.xlane.xlu0 %1560  ;;  %v1738_v40 = vsel %vm4165_vm7, %v2827_v11, %v1734_v54  ;;  %v1713_v11 = vand.u32 2147483648, %v4045_v61  ;;  %v1710_v61 = vsel %vm4203_vm12, %v4125_v4, %v1706_v0  ;;  %v1662_v34 = vsub.f32 1.0, %v1661_v35 }
 0x695   :  { %2842 = vrcp.f32 %v4169_v55  ;;  %v1743_v25 = vsel %vm1740_vm10, %v1742_v20, %v1738_v40  ;;  %v1677_v18 = vmul.f32 %v4151_v58, %v1676_v3  ;;  %v1685_v28 = vand.u32 2147483648, %v4099_v2 }
 0x696   :  { %v1811_v15 = vmul.f32 %v3970_v37, %v1743_v25  ;;  %2844 = vrcp.f32 %v4182_v42  ;;  %v4209_v37 = vpop.xlane.xlu1 %1550  ;;  %v1714_v59 = vor.u32 1.1754944e-38, %v1713_v11  ;;  %v1663_v20 = vmul.f32 %v4180_v22, %v1662_v34 }
 0x697   :  { %v4190_v62 = vpop.eup %2836  ;;  %2846 = vpow2.f32 %v2100_v19  ;;  %v1678_v41 = vadd.f32 %v4151_v58, %v1677_v18  ;;  %v1699_v50 = vand.u32 2147483648, %v4169_v55  ;;  %v2081_v11 = vsub.f32 %v3959_v46, %v4109_v26 }
 0x698   :  { %v4195_v5 = vpop.eup %2838  ;;  %2138 = vadd.xlane.f32.xlu2 %v4190_v62  ;;  %1820 = vmatpush.xpose.msra.mxu1 %v1811_v15  ;;  %2848 = vpow2.f32 %v2110_v13  ;;  %v1715_v54 = vsel %vm1712_vm13, %v1714_v59, %v1710_v61  ;;  %v2104_v13 = vmul.f32 1.442695, %v2084_v56  ;;  %v1683_v3 = vand.u32 2147483647, %v4099_v2 }
 0x699   :  { %v4207_v33 = vpop.eup %2840  ;;  %2146 = vadd.xlane.f32.xlu0 %v4195_v5  ;;  %2850 = vrcp.f32 %v4209_v37  ;;  %v1809_v49 = vmul.f32 %v3928_v47, %v1715_v54  ;;  %v1697_v47 = vand.u32 2147483647, %v4169_v55  ;;  %v1686_v15 = vor.u32 1.1754944e-38, %v1685_v28 }
 0x69a   :  { %v1647_v45 = vmul.f32 %v4207_v33, %v4138_v32  ;;  %2852 = vpow2.f32 %v2104_v13  ;;  %vm1693_vm4 = vweird.f32 %v4169_v55  ;;  %v1682_v35 = vsel %vm4247_vm3, %v4151_v58, %v1678_v41 }
 0x69b   :  { %v2843_v39 = vpop.eup %2842  ;;  %v1700_v30 = vor.u32 1.1754944e-38, %v1699_v50  ;;  %v1664_v46 = vadd.f32 %v4180_v22, %v1663_v20  ;;  %vm1666_vm6 = vweird.f32 %v4180_v22  ;;  %vm1698_vm7 = vcmp.eq.f32.partialorder %v1697_v47, 8.507059e+37 }
 0x69c   :  { %v1689_v4 = vmul.f32 %v2843_v39, %v4169_v55  ;;  %1821 = vmatpush.xpose.msra.mxu1 %v1810_v7  ;;  %v4223_v16 = vpop.eup %2844  ;;  %v1648_v40 = vsub.f32 1.0, %v1647_v45  ;;  %vm1694_vm2 = vweird.f32 %v2843_v39  ;;  %v2098_v55 = vmul.f32 1.442695, %v2081_v11  ;;  %vm4264_vm10 = vmor %vm1665_vm8, %vm1666_vm6 }
 0x69d   :  { %v4226_v44 = vpop.eup %2846  ;;  %v1633_v19 = vmul.f32 %v4223_v16, %v4182_v42  ;;  %vm1695_vm5 = vmor %vm1693_vm4, %vm1694_vm2  ;;  %v1671_v59 = vand.u32 2147483648, %v4119_v12  ;;  %vm1684_vm9 = vcmp.eq.f32.partialorder %v1683_v3, 8.507059e+37  ;;  %v1669_v7 = vand.u32 2147483647, %v4119_v12 }
 0x69e   :  { %v1690_v23 = vsub.f32 1.0, %v1689_v4  ;;  %v4231_v29 = vpop.eup %2848  ;;  %v1649_v38 = vmul.f32 %v4207_v33, %v1648_v40  ;;  %v1687_v45 = vsel %vm1684_vm9, %v1686_v15, %v1682_v35  ;;  %vm1652_vm0 = vweird.f32 %v4207_v33 }
 0x69f   :  { %v4241_v0 = vpop.eup %2850  ;;  %v1634_v26 = vsub.f32 1.0, %v1633_v19  ;;  %2854 = vpow2.f32 %v2098_v55  ;;  %v1672_v13 = vor.u32 1.1754944e-38, %v1671_v59  ;;  %v1657_v12 = vand.u32 2147483648, %v4138_v32  ;;  %vm1653_vm13 = vmor %vm1651_vm11, %vm1652_vm0 }
 0x6a0   :  { %2132 = vadd.xlane.f32.xlu2 %v4226_v44  ;;  %v1691_v36 = vmul.f32 %v2843_v39, %v1690_v23  ;;  %1822 = vmatpush.xpose.msra.mxu1 %v1809_v49  ;;  %v1619_v2 = vmul.f32 %v4241_v0, %v4209_v37  ;;  %v4269_v34 = vpop.eup %2852  ;;  %v1807_v28 = vmul.f32 %v3950_v27, %v1687_v45  ;;  %vm1670_vm12 = vcmp.eq.f32.partialorder %v1669_v7, 8.507059e+37 }
 0x6a1   :  { %2142 = vadd.xlane.f32.xlu0 %v4231_v29  ;;  %v1635_v54 = vmul.f32 %v4223_v16, %v1634_v26  ;;  %vm1638_vm14 = vweird.f32 %v4223_v16  ;;  %v1658_v40 = vor.u32 1.1754944e-38, %v1657_v12  ;;  %v1643_v50 = vand.u32 2147483648, %v4182_v42 }
 0x6a2   :  { %v1692_v53 = vadd.f32 %v2843_v39, %v1691_v36  ;;  %v1620_v4 = vsub.f32 1.0, %v1619_v2  ;;  %vm1637_vm15 = vweird.f32 %v4182_v42  ;;  %vm1624_vm4 = vweird.f32 %v4241_v0 }
 0x6a3   :  { %v1636_v20 = vadd.f32 %v4223_v16, %v1635_v54  ;;  %vm1639_vm3 = vmor %vm1637_vm15, %vm1638_vm14  ;;  %v1644_v11 = vor.u32 1.1754944e-38, %v1643_v50  ;;  %v1629_v25 = vand.u32 2147483648, %v4209_v37 }
 0x6a4   :  { %v1696_v61 = vsel %vm1695_vm5, %v2843_v39, %v1692_v53  ;;  %v1668_v39 = vsel %vm4264_vm10, %v4180_v22, %v1664_v46  ;;  %v1655_v22 = vand.u32 2147483647, %v4138_v32  ;;  %v1621_v49 = vmul.f32 %v4241_v0, %v1620_v4 }
 0x6a5   :  { %v1701_v58 = vsel %vm1698_vm7, %v1700_v30, %v1696_v61  ;;  %v1673_v23 = vsel %vm1670_vm12, %v1672_v13, %v1668_v39  ;;  %v1641_v32 = vand.u32 2147483647, %v4182_v42  ;;  %v4290_v19 = vpop.eup %2854  ;;  %vm1623_vm5 = vweird.f32 %v4209_v37 }
 0x6a6   :  { %v1808_v56 = vmul.f32 %v3991_v24, %v1701_v58  ;;  %v1650_v24 = vadd.f32 %v4207_v33, %v1649_v38  ;;  %v1806_v27 = vmul.f32 %v3964_v57, %v1673_v23  ;;  %vm1656_vm2 = vcmp.eq.f32.partialorder %v1655_v22, 8.507059e+37  ;;  %vm1625_vm7 = vmor %vm1623_vm5, %vm1624_vm4 }
 0x6a7   :  { %v1622_v47 = vadd.f32 %v4241_v0, %v1621_v49  ;;  %vm1642_vm6 = vcmp.eq.f32.partialorder %v1641_v32, 8.507059e+37  ;;  %v1627_v42 = vand.u32 2147483647, %v4209_v37 }
 0x6a8   :  { %1823 = vmatpush.xpose.msra.mxu1 %v1808_v56  ;;  %v1654_v41 = vsel %vm1653_vm13, %v4207_v33, %v1650_v24  ;;  %v1640_v33 = vsel %vm1639_vm3, %v4223_v16, %v1636_v20  ;;  %v1630_v16 = vor.u32 1.1754944e-38, %v1629_v25 }
 0x6a9   :  { %2136 = vadd.xlane.f32.xlu0 %v4269_v34  ;;  %v1659_v36 = vsel %vm1656_vm2, %v1658_v40, %v1654_v41  ;;  %v1645_v3 = vsel %vm1642_vm6, %v1644_v11, %v1640_v33  ;;  %v1626_v15 = vsel %vm1625_vm7, %v4241_v0, %v1622_v47  ;;  %vm1628_vm8 = vcmp.eq.f32.partialorder %v1627_v42, 8.507059e+37 }
 0x6aa   :  { %v1805_v57 = vmul.f32 %v3975_v63, %v1659_v36  ;;  %v1804_v53 = vmul.f32 %v3985_v21, %v1645_v3  ;;  %v1631_v35 = vsel %vm1628_vm8, %v1630_v16, %v1626_v15 }
 0x6ab   :  { %v1803_v38 = vmul.f32 %v3993_v60, %v1631_v35 }
 0x6ac   :  { %1824 = vmatpush.xpose.msra.mxu1 %v1807_v28  ;;  %v4309_v37 = vpop.xlane.xlu1 %2148 }
 0x6b0   :  { %1825 = vmatpush.xpose.msra.mxu1 %v1806_v27 }
 0x6b1   :  { %2130 = vadd.xlane.f32.xlu0 %v4290_v19 }
 0x6b4   :  { %1826 = vmatpush.xpose.msra.mxu1 %v1805_v57  ;;  %v4307_v46 = vpop.xlane.xlu2 %2150  ;;  %v4315_v2 = vpop.xlane.xlu1 %1544 }
 0x6b5   :  { %vm1581_vm0 = vweird.f32 %v4315_v2  ;;  %v1587_v11 = vand.u32 2147483648, %v4315_v2 }
 0x6b8   :  { %1827 = vmatpush.xpose.msra.mxu1 %v1804_v53 }
 0x6bc   :  { %1828 = vmatpush.xpose.msra.mxu1 %v1803_v38  ;;  %v4313_v0 = vpop.xlane.xlu2 %1546 }
 0x6bd   :  { %2856 = vrcp.f32 %v4313_v0  ;;  %v1601_v49 = vand.u32 2147483648, %v4313_v0  ;;  %vm1595_vm11 = vweird.f32 %v4313_v0  ;;  %v1599_v57 = vand.u32 2147483647, %v4313_v0 }
 0x6be   :  { %2858 = vrcp.f32 %v4315_v2 }
 0x6bf   :  { %v1602_v42 = vor.u32 1.1754944e-38, %v1601_v49  ;;  %vm1600_vm4 = vcmp.eq.f32.partialorder %v1599_v57, 8.507059e+37 }
 0x6c3   :  { %v4321_v60 = vpop.eup %2856 }
 0x6c4   :  { %v4325_v55 = vpop.eup %2858  ;;  %v1591_v59 = vmul.f32 %v4321_v60, %v4313_v0  ;;  %vm1596_vm9 = vweird.f32 %v4321_v60 }
 0x6c5   :  { %v1577_v56 = vmul.f32 %v4325_v55, %v4315_v2  ;;  %vm4358_vm13 = vmor %vm1595_vm11, %vm1596_vm9  ;;  %vm1582_vm14 = vweird.f32 %v4325_v55 }
 0x6c6   :  { %v1592_v18 = vsub.f32 1.0, %v1591_v59  ;;  %vm4389_vm6 = vmor %vm1581_vm0, %vm1582_vm14 }
 0x6c7   :  { %v1578_v54 = vsub.f32 1.0, %v1577_v56 }
 0x6c8   :  { %v1593_v24 = vmul.f32 %v4321_v60, %v1592_v18 }
 0x6c9   :  { %v1579_v23 = vmul.f32 %v4325_v55, %v1578_v54  ;;  %v1585_v54 = vand.u32 2147483647, %v4315_v2 }
 0x6ca   :  { %v1594_v50 = vadd.f32 %v4321_v60, %v1593_v24  ;;  %v1588_v24 = vor.u32 1.1754944e-38, %v1587_v11 }
 0x6cb   :  { %v1580_v53 = vadd.f32 %v4325_v55, %v1579_v23  ;;  %vm1586_vm9 = vcmp.eq.f32.partialorder %v1585_v54, 8.507059e+37 }
 0x6cc   :  { %v1598_v16 = vsel %vm4358_vm13, %v4321_v60, %v1594_v50 }
 0x6e3   :  { %v4303_v30 = vpop.xlane.xlu0 %2154 }
 0x6e4   :  { %vm2347_vm13 = vweird.f32 %v4303_v30 }
 0x6ec   :  { %v4305_v63 = vpop.xlane.xlu0 %2156 }
 0x6f4   :  { %v4311_v26 = vpop.xlane.xlu0 %2158 }
 0x6f5   :  { %2860 = vrcp.f32 %v4311_v26  ;;  %vm2375_vm5 = vweird.f32 %v4311_v26 }
 0x6f6   :  { %2862 = vrcp.f32 %v4305_v63 }
 0x6fb   :  { %v4329_v58 = vpop.eup %2860  ;;  %v4406_v49 = vpop.xlane.xlu2 %2144 }
 0x6fc   :  { %v4318_v21 = vpop.xlane.xlu0 %2152  ;;  %v4334_v7 = vpop.eup %2862  ;;  %v2371_v39 = vmul.f32 %v4329_v58, %v4311_v26  ;;  %vm2376_vm3 = vweird.f32 %v4329_v58 }
 0x6fd   :  { %v2357_v12 = vmul.f32 %v4334_v7, %v4305_v63  ;;  %vm4398_vm7 = vmor %vm2375_vm5, %vm2376_vm3  ;;  %vm2362_vm8 = vweird.f32 %v4334_v7  ;;  %v2339_v54 = vand.u32 2147483648, %v4318_v21  ;;  %vm2333_vm3 = vweird.f32 %v4318_v21 }
 0x6fe   :  { %v2372_v22 = vsub.f32 1.0, %v2371_v39  ;;  %v2381_v39 = vand.u32 2147483648, %v4311_v26 }
 0x6ff   :  { %v2358_v27 = vsub.f32 1.0, %v2357_v12  ;;  %v1603_v12 = vsel %vm1600_vm4, %v1602_v42, %v1598_v16 }
 0x700   :  { %v2373_v33 = vmul.f32 %v4329_v58, %v2372_v22  ;;  %v2382_v50 = vor.u32 1.1754944e-38, %v2381_v39 }
 0x702   :  { %v2374_v59 = vadd.f32 %v4329_v58, %v2373_v33 }
 0x704   :  { %v1549_v61 = vpop.xlane.xlu0 %1548 }
 0x705   :  { %2864 = vrcp.f32 %v1549_v61  ;;  %v1615_v40 = vand.u32 2147483648, %v1549_v61  ;;  %v1613_v36 = vand.u32 2147483647, %v1549_v61  ;;  %vm1609_vm12 = vweird.f32 %v1549_v61 }
 0x706   :  { %2866 = vrcp.f32 %v4303_v30 }
 0x707   :  { %2868 = vrcp.f32 %v4318_v21  ;;  %v1616_v3 = vor.u32 1.1754944e-38, %v1615_v40  ;;  %vm1614_vm2 = vcmp.eq.f32.partialorder %v1613_v36, 8.507059e+37  ;;  %v2367_v40 = vand.u32 2147483648, %v4305_v63 }
 0x708   :  { %2870 = vrcp.f32 %v4307_v46 }
 0x709   :  { %2872 = vrcp.f32 %v4309_v37  ;;  %v2368_v16 = vor.u32 1.1754944e-38, %v2367_v40 }
 0x70b   :  { %v2865_v45 = vpop.eup %2864 }
 0x70c   :  { %v1605_v4 = vmul.f32 %v2865_v45, %v1549_v61  ;;  %v4339_v13 = vpop.eup %2866  ;;  %vm1610_vm10 = vweird.f32 %v2865_v45  ;;  %v4364_v15 = vpop.xlane.xlu0 %2146  ;;  %v2359_v61 = vmul.f32 %v4334_v7, %v2358_v27  ;;  %v1801_v27 = vmul.f32 %v4014_v8, %v1603_v12 }
 0x70d   :  { %v2343_v20 = vmul.f32 %v4339_v13, %v4303_v30  ;;  %v4355_v47 = vpop.eup %2868  ;;  %vm1611_vm15 = vmor %vm1609_vm12, %vm1610_vm10  ;;  %2874 = vrcp.f32 %v4364_v15  ;;  %vm2361_vm10 = vweird.f32 %v4305_v63  ;;  %vm2348_vm12 = vweird.f32 %v4339_v13  ;;  %v4465_v12 = vpop.xlane.xlu2 %2138 }
 0x70e   :  { %v1606_v28 = vsub.f32 1.0, %v1605_v4  ;;  %v4371_v35 = vpop.eup %2870  ;;  %v2329_v56 = vmul.f32 %v4355_v47, %v4318_v21  ;;  %2876 = vrcp.f32 %v4406_v49  ;;  %vm4420_vm11 = vmor %vm2361_vm10, %vm2362_vm8 }
 0x70f   :  { %v2344_v38 = vsub.f32 1.0, %v2343_v20  ;;  %v4381_v4 = vpop.eup %2872  ;;  %v2360_v20 = vadd.f32 %v4334_v7, %v2359_v61 }
 0x710   :  { %v1607_v41 = vmul.f32 %v2865_v45, %v1606_v28  ;;  %v2330_v2 = vsub.f32 1.0, %v2329_v56  ;;  %v2301_v36 = vmul.f32 %v4381_v4, %v4309_v37  ;;  %vm2306_vm10 = vweird.f32 %v4381_v4 }
 0x711   :  { %v2345_v22 = vmul.f32 %v4339_v13, %v2344_v38  ;;  %v4436_v38 = vpop.xlane.xlu1 %2140 }
 0x712   :  { %v1608_v32 = vadd.f32 %v2865_v45, %v1607_v41  ;;  %v2378_v41 = vsel %vm4398_vm7, %v4329_v58, %v2374_v59  ;;  %v2331_v8 = vmul.f32 %v4355_v47, %v2330_v2  ;;  %vm2319_vm7 = vweird.f32 %v4307_v46 }
 0x713   :  { %v2346_v57 = vadd.f32 %v4339_v13, %v2345_v22  ;;  %v4432_v42 = vpop.eup %2874  ;;  %v2340_v2 = vor.u32 1.1754944e-38, %v2339_v54 }
 0x714   :  { %v1612_v0 = vsel %vm1611_vm15, %v2865_v45, %v1608_v32  ;;  %v2379_v45 = vand.u32 2147483647, %v4311_v26  ;;  %v1584_v26 = vsel %vm4389_vm6, %v4325_v55, %v1580_v53  ;;  %v2365_v32 = vand.u32 2147483647, %v4305_v63  ;;  %v4425_v25 = vpop.xlane.xlu0 %2142  ;;  %vm4445_vm15 = vmor %vm2347_vm13, %vm2348_vm12  ;;  %v4456_v39 = vpop.eup %2876 }
 0x715   :  { %v1617_v18 = vsel %vm1614_vm2, %v1616_v3, %v1612_v0  ;;  %v1589_v55 = vsel %vm1586_vm9, %v1588_v24, %v1584_v26  ;;  %v2364_v63 = vsel %vm4420_vm11, %v4334_v7, %v2360_v20  ;;  %v2353_v3 = vand.u32 2147483648, %v4303_v30  ;;  %v4538_v54 = vpop.xlane.xlu2 %2132 }
 0x716   :  { %v1802_v60 = vmul.f32 %v4142_v48, %v1617_v18  ;;  %v2315_v48 = vmul.f32 %v4371_v35, %v4307_v46  ;;  %vm2380_vm0 = vcmp.eq.f32.partialorder %v2379_v45, 8.507059e+37  ;;  %v1800_v53 = vmul.f32 %v4006_v10, %v1589_v55 }
 0x717   :  { %v2383_v33 = vsel %vm2380_vm0, %v2382_v50, %v2378_v41  ;;  %vm2366_vm14 = vcmp.eq.f32.partialorder %v2365_v32, 8.507059e+37  ;;  %v2351_v7 = vand.u32 2147483647, %v4303_v30  ;;  %v2302_v0 = vsub.f32 1.0, %v2301_v36 }
 0x718   :  { %1829 = vmatpush.xpose.msra.mxu1 %v1802_v60  ;;  %v2316_v58 = vsub.f32 1.0, %v2315_v48  ;;  %v2399_v61 = vmul.f32 %v4112_v6, %v2383_v33  ;;  %2878 = vrcp.f32 %v4425_v25  ;;  %v2369_v56 = vsel %vm2366_vm14, %v2368_v16, %v2364_v63 }
 0x719   :  { %v2287_v18 = vmul.f32 %v4432_v42, %v4364_v15  ;;  %v2350_v6 = vsel %vm4445_vm15, %v4339_v13, %v2346_v57  ;;  %v2332_v30 = vadd.f32 %v4355_v47, %v2331_v8  ;;  %vm2334_vm2 = vweird.f32 %v4355_v47  ;;  %v4487_v50 = vpop.xlane.xlu1 %2134 }
 0x71a   :  { %v2317_v59 = vmul.f32 %v4371_v35, %v2316_v58  ;;  %2880 = vrcp.f32 %v4436_v38  ;;  %v2354_v60 = vor.u32 1.1754944e-38, %v2353_v3  ;;  %v2398_v24 = vmul.f32 %v4101_v17, %v2369_v56  ;;  %vm4467_vm5 = vmor %vm2333_vm3, %vm2334_vm2 }
 0x71b   :  { %vm2352_vm4 = vcmp.eq.f32.partialorder %v2351_v7, 8.507059e+37  ;;  %v2337_v13 = vand.u32 2147483647, %v4318_v21  ;;  %v2303_v45 = vmul.f32 %v4381_v4, %v2302_v0  ;;  %vm2320_vm6 = vweird.f32 %v4371_v35 }
 0x71c   :  { %1830 = vmatpush.xpose.msra.mxu1 %v1801_v27  ;;  %v2355_v28 = vsel %vm2352_vm4, %v2354_v60, %v2350_v6  ;;  %v2273_v22 = vmul.f32 %v4456_v39, %v4406_v49  ;;  %v2336_v17 = vsel %vm4467_vm5, %v4355_v47, %v2332_v30  ;;  %v2318_v21 = vadd.f32 %v4371_v35, %v2317_v59  ;;  %vm4491_vm9 = vmor %vm2319_vm7, %vm2320_vm6  ;;  %v4500_v36 = vpop.xlane.xlu0 %2136 }
 0x71d   :  { %v2325_v26 = vand.u32 2147483648, %v4307_v46  ;;  %2882 = vrcp.f32 %v4465_v12  ;;  %v2397_v41 = vmul.f32 %v4080_v43, %v2355_v28  ;;  %vm2338_vm8 = vcmp.eq.f32.partialorder %v2337_v13, 8.507059e+37  ;;  %v4804_v28 = vld [vmem:[#allocation13_spill] sm:$0xff] }
 0x71e   :  { %v4478_v23 = vpop.eup %2878  ;;  %v2323_v20 = vand.u32 2147483647, %v4307_v46  ;;  %v2341_v47 = vsel %vm2338_vm8, %v2340_v2, %v2336_v17  ;;  %v2304_v55 = vadd.f32 %v4381_v4, %v2303_v45  ;;  %v2274_v32 = vsub.f32 1.0, %v2273_v22 }
 0x71f   :  { %v2259_v46 = vmul.f32 %v4478_v23, %v4425_v25  ;;  %v2322_v58 = vsel %vm4491_vm9, %v4371_v35, %v2318_v21  ;;  %vm2305_vm0 = vweird.f32 %v4309_v37  ;;  %v2311_v33 = vand.u32 2147483648, %v4309_v37 }
 0x720   :  { %1831 = vmatpush.xpose.msra.mxu1 %v1800_v53  ;;  %v4485_v40 = vpop.eup %2880  ;;  %v2326_v11 = vor.u32 1.1754944e-38, %v2325_v26  ;;  %2884 = vrcp.f32 %v4487_v50  ;;  %v2396_v8 = vmul.f32 %v4127_v52, %v2341_v47  ;;  %vm2324_vm11 = vcmp.eq.f32.partialorder %v2323_v20, 8.507059e+37  ;;  %vm4509_vm12 = vmor %vm2305_vm0, %vm2306_vm10 }
 0x721   :  { %v2309_v57 = vand.u32 2147483647, %v4309_v37  ;;  %v2245_v3 = vmul.f32 %v4485_v40, %v4436_v38  ;;  %2886 = vrcp.f32 %v4500_v36  ;;  %v2308_v16 = vsel %vm4509_vm12, %v4381_v4, %v2304_v55 }
 0x722   :  { %v2327_v35 = vsel %vm2324_vm11, %v2326_v11, %v2322_v58  ;;  %v2275_v52 = vmul.f32 %v4456_v39, %v2274_v32  ;;  %vm2292_vm13 = vweird.f32 %v4432_v42  ;;  %v2312_v37 = vor.u32 1.1754944e-38, %v2311_v33  ;;  %v4578_v58 = vpop.xlane.xlu1 %2128 }
 0x723   :  { %1832 = vmatmul.f32.vlgmr.msra.gmra.mxu1 %v3758_v51  ;;  %v2288_v51 = vsub.f32 1.0, %v2287_v18  ;;  %v4520_v53 = vpop.eup %2882  ;;  %v2297_v0 = vand.u32 2147483648, %v4364_v15  ;;  %vm2291_vm14 = vweird.f32 %v4364_v15  ;;  %v2395_v59 = vmul.f32 %v4008_v9, %v2327_v35 }
 0x724   :  { %2400 = vmatpush.xpose.msrb.mxu1 %v2399_v61  ;;  %v2260_v61 = vsub.f32 1.0, %v2259_v46  ;;  %vm2310_vm15 = vcmp.eq.f32.partialorder %v2309_v57, 8.507059e+37  ;;  %v2295_v4 = vand.u32 2147483647, %v4364_v15  ;;  %v2246_v56 = vsub.f32 1.0, %v2245_v3  ;;  %vm4531_vm2 = vmor %vm2291_vm14, %vm2292_vm13  ;;  %v4559_v2 = vpop.xlane.xlu0 %2130 }
 0x725   :  { %v2289_v43 = vmul.f32 %v4432_v42, %v2288_v51  ;;  %v2231_v10 = vmul.f32 %v4520_v53, %v4465_v12  ;;  %v2313_v18 = vsel %vm2310_vm15, %v2312_v37, %v2308_v16  ;;  %v2276_v15 = vadd.f32 %v4456_v39, %v2275_v52 }
 0x726   :  { %v4535_v30 = vpop.eup %2884  ;;  %v2261_v60 = vmul.f32 %v4478_v23, %v2260_v61  ;;  %vm2278_vm3 = vweird.f32 %v4456_v39  ;;  %v2283_v13 = vand.u32 2147483648, %v4406_v49  ;;  %v2298_v45 = vor.u32 1.1754944e-38, %v2297_v0 }
 0x727   :  { %v2290_v7 = vadd.f32 %v4432_v42, %v2289_v43  ;;  %vm2277_vm4 = vweird.f32 %v4406_v49  ;;  %v2394_v48 = vmul.f32 %v4804_v28, %v2313_v18  ;;  %vm2296_vm5 = vcmp.eq.f32.partialorder %v2295_v4, 8.507059e+37 }
 0x728   :  { %2401 = vmatpush.xpose.msrb.mxu1 %v2398_v24  ;;  %v4545_v24 = vpop.eup %2886  ;;  %v2281_v22 = vand.u32 2147483647, %v4406_v49  ;;  %v2247_v51 = vmul.f32 %v4485_v40, %v2246_v56  ;;  %v2232_v17 = vsub.f32 1.0, %v2231_v10  ;;  %2888 = vrcp.f32 %v4538_v54  ;;  %vm4553_vm6 = vmor %vm2277_vm4, %vm2278_vm3 }
 0x729   :  { %v2294_v9 = vsel %vm4531_vm2, %v4432_v42, %v2290_v7  ;;  %v2217_v26 = vmul.f32 %v4545_v24, %v4500_v36  ;;  %v2280_v49 = vsel %vm4553_vm6, %v4456_v39, %v2276_v15  ;;  %vm2264_vm7 = vweird.f32 %v4478_v23 }
 0x72a   :  { %v2299_v42 = vsel %vm2296_vm5, %v2298_v45, %v2294_v9  ;;  %v2203_v20 = vmul.f32 %v4535_v30, %v4487_v50  ;;  %v2284_v47 = vor.u32 1.1754944e-38, %v2283_v13  ;;  %v2269_v27 = vand.u32 2147483648, %v4425_v25  ;;  %v4813_v13 = vld [vmem:[#allocation14_spill] sm:$0xff] }
 0x72b   :  { %vm2263_vm8 = vweird.f32 %v4425_v25  ;;  %v2393_v55 = vmul.f32 %v4195_v5, %v2299_v42  ;;  %vm2282_vm9 = vcmp.eq.f32.partialorder %v2281_v22, 8.507059e+37  ;;  %v2267_v32 = vand.u32 2147483647, %v4425_v25 }
 0x72c   :  { %2402 = vmatpush.xpose.msrb.mxu1 %v2397_v41  ;;  %v2262_v41 = vadd.f32 %v4478_v23, %v2261_v60  ;;  %v2233_v43 = vmul.f32 %v4520_v53, %v2232_v17  ;;  %2890 = vrcp.f32 %v4559_v2  ;;  %v2285_v39 = vsel %vm2282_vm9, %v2284_v47, %v2280_v49  ;;  %vm4574_vm10 = vmor %vm2263_vm8, %vm2264_vm7 }
 0x72d   :  { %v2218_v33 = vsub.f32 1.0, %v2217_v26  ;;  %v2248_v11 = vadd.f32 %v4485_v40, %v2247_v51  ;;  %vm2250_vm0 = vweird.f32 %v4485_v40  ;;  %vm2249_vm11 = vweird.f32 %v4436_v38 }
 0x72e   :  { %v2266_v5 = vsel %vm4574_vm10, %v4478_v23, %v2262_v41  ;;  %v4585_v25 = vpop.eup %2888  ;;  %v2270_v63 = vor.u32 1.1754944e-38, %v2269_v27  ;;  %v2204_v57 = vsub.f32 1.0, %v2203_v20  ;;  %v2392_v3 = vmul.f32 %v4129_v1, %v2285_v39  ;;  %vm4592_vm13 = vmor %vm2249_vm11, %vm2250_vm0 }
 0x72f   :  { %vm2268_vm12 = vcmp.eq.f32.partialorder %v2267_v32, 8.507059e+37  ;;  %v2253_v35 = vand.u32 2147483647, %v4436_v38  ;;  %2892 = vrcp.f32 %v4578_v58  ;;  %v2234_v52 = vadd.f32 %v4520_v53, %v2233_v43 }
 0x730   :  { %2403 = vmatpush.xpose.msrb.mxu1 %v2396_v8  ;;  %v2255_v8 = vand.u32 2147483648, %v4436_v38  ;;  %v2271_v23 = vsel %vm2268_vm12, %v2270_v63, %v2266_v5  ;;  %vm2236_vm14 = vweird.f32 %v4520_v53  ;;  %v2189_v61 = vmul.f32 %v4585_v25, %v4538_v54 }
 0x731   :  { %v2219_v7 = vmul.f32 %v4545_v24, %v2218_v33  ;;  %v2252_v1 = vsel %vm4592_vm13, %v4485_v40, %v2248_v11  ;;  %vm2235_vm15 = vweird.f32 %v4465_v12  ;;  %v2241_v0 = vand.u32 2147483648, %v4465_v12 }
 0x732   :  { %v4604_v38 = vpop.eup %2890  ;;  %v2256_v37 = vor.u32 1.1754944e-38, %v2255_v8  ;;  %vm2254_vm2 = vcmp.eq.f32.partialorder %v2253_v35, 8.507059e+37  ;;  %vm4609_vm3 = vmor %vm2235_vm15, %vm2236_vm14  ;;  %v2239_v56 = vand.u32 2147483647, %v4465_v12  ;;  %v2205_v10 = vmul.f32 %v4535_v30, %v2204_v57 }
 0x733   :  { %v2238_v40 = vsel %vm4609_vm3, %v4520_v53, %v2234_v52  ;;  %v2190_v6 = vsub.f32 1.0, %v2189_v61  ;;  %v2175_v60 = vmul.f32 %v4604_v38, %v4559_v2  ;;  %vm2222_vm4 = vweird.f32 %v4545_v24 }
 0x734   :  { %2404 = vmatpush.xpose.msrb.mxu1 %v2395_v59  ;;  %v2391_v59 = vmul.f32 %v4231_v29, %v2271_v23  ;;  %v2257_v18 = vsel %vm2254_vm2, %v2256_v37, %v2252_v1  ;;  %v2220_v29 = vadd.f32 %v4545_v24, %v2219_v7  ;;  %v2242_v15 = vor.u32 1.1754944e-38, %v2241_v0  ;;  %v2596_v37 = vld [vmem:[%s4733_s2 + $0x58] sm:$0xff]  ;;  %v2471_v0 = vld [vmem:[%s4734_s3 + $0x8] sm:$0xff] }
 0x735   :  { %v4622_v9 = vpop.eup %2892  ;;  %v2227_v12 = vand.u32 2147483648, %v4500_v36  ;;  %vm2221_vm5 = vweird.f32 %v4500_v36  ;;  %v2390_v45 = vmul.f32 %v4813_v13, %v2257_v18  ;;  %vm2240_vm6 = vcmp.eq.f32.partialorder %v2239_v56, 8.507059e+37  ;;  %v2470_v56 = vld [vmem:[%s4734_s3] sm:$0xff] }
 0x736   :  { %v2225_v53 = vand.u32 2147483647, %v4500_v36  ;;  %v2243_v28 = vsel %vm2240_vm6, %v2242_v15, %v2238_v40  ;;  %vm4628_vm7 = vmor %vm2221_vm5, %vm2222_vm4  ;;  %v2206_v22 = vadd.f32 %v4535_v30, %v2205_v10  ;;  %vm2208_vm8 = vweird.f32 %v4535_v30  ;;  %v2617_v10 = vld [vmem:[%s4733_s2 + $0x60] sm:$0xff]  ;;  %v2473_v40 = vld [vmem:[%s4734_s3 + $0x18] sm:$0xff] }
 0x737   :  { %v2161_v51 = vmul.f32 %v4622_v9, %v4578_v58  ;;  %v2191_v17 = vmul.f32 %v4585_v25, %v2190_v6  ;;  %v2176_v42 = vsub.f32 1.0, %v2175_v60  ;;  %v2224_v36 = vsel %vm4628_vm7, %v4545_v24, %v2220_v29  ;;  %v2618_v6 = vld [vmem:[%s4733_s2 + $0x68] sm:$0xff]  ;;  %v2619_v60 = vld [vmem:[%s4733_s2 + $0x70] sm:$0xff]  ;;  %v2620_v29 = vld [vmem:[%s4733_s2 + $0x78] sm:$0xff] }
 0x738   :  { %2405 = vmatpush.xpose.msrb.mxu1 %v2394_v48  ;;  %vm2207_vm9 = vweird.f32 %v4487_v50  ;;  %v2213_v21 = vand.u32 2147483648, %v4487_v50  ;;  %v2228_v26 = vor.u32 1.1754944e-38, %v2227_v12  ;;  %v2389_v49 = vmul.f32 %v4190_v62, %v2243_v28 }
 0x739   :  { %vm2226_vm10 = vcmp.eq.f32.partialorder %v2225_v53, 8.507059e+37  ;;  %vm4643_vm0 = vmor %vm2207_vm9, %vm2208_vm8  ;;  %v2211_v20 = vand.u32 2147483647, %v4487_v50  ;;  %v2162_v24 = vsub.f32 1.0, %v2161_v51  ;;  %v2192_v32 = vadd.f32 %v4585_v25, %v2191_v17 }
 0x73a   :  { %v2229_v47 = vsel %vm2226_vm10, %v2228_v26, %v2224_v36  ;;  %v2210_v27 = vsel %vm4643_vm0, %v4535_v30, %v2206_v22  ;;  %vm2194_vm11 = vweird.f32 %v4585_v25  ;;  %v2214_v62 = vor.u32 1.1754944e-38, %v2213_v21  ;;  %v4819_v22 = vld [vmem:[#allocation9_spill] sm:$0xff] }
 0x73b   :  { %v2199_v43 = vand.u32 2147483648, %v4538_v54  ;;  %vm2193_vm12 = vweird.f32 %v4538_v54  ;;  %v2388_v50 = vmul.f32 %v4269_v34, %v2229_v47  ;;  %vm2212_vm13 = vcmp.eq.f32.partialorder %v2211_v20, 8.507059e+37 }
 0x73c   :  { %2406 = vmatpush.xpose.msrb.mxu1 %v2393_v55  ;;  %v2177_v55 = vmul.f32 %v4604_v38, %v2176_v42  ;;  %v2197_v39 = vand.u32 2147483647, %v4538_v54  ;;  %v2215_v46 = vsel %vm2212_vm13, %v2214_v62, %v2210_v27  ;;  %vm2195_vm14 = vmor %vm2193_vm12, %vm2194_vm11  ;;  %v2163_v30 = vmul.f32 %v4622_v9, %v2162_v24 }
 0x73d   :  { %v2196_v33 = vsel %vm2195_vm14, %v4585_v25, %v2192_v32  ;;  %vm2180_vm15 = vweird.f32 %v4604_v38  ;;  %v2200_v11 = vor.u32 1.1754944e-38, %v2199_v43  ;;  %v2185_v8 = vand.u32 2147483648, %v4559_v2  ;;  %v4821_v32 = vld [vmem:[#allocation11_spill] sm:$0xff] }
 0x73e   :  { %v2178_v5 = vadd.f32 %v4604_v38, %v2177_v55  ;;  %vm2179_vm2 = vweird.f32 %v4559_v2  ;;  %v2387_v34 = vmul.f32 %v4097_v31, %v2215_v46  ;;  %vm2198_vm3 = vcmp.eq.f32.partialorder %v2197_v39, 8.507059e+37 }
 0x73f   :  { %v2183_v54 = vand.u32 2147483647, %v4559_v2  ;;  %v2201_v63 = vsel %vm2198_vm3, %v2200_v11, %v2196_v33  ;;  %vm2181_vm4 = vmor %vm2179_vm2, %vm2180_vm15  ;;  %v2164_v25 = vadd.f32 %v4622_v9, %v2163_v30  ;;  %vm2166_vm5 = vweird.f32 %v4622_v9  ;;  %v4822_v33 = vld [vmem:[#allocation12_spill] sm:$0xff] }
 0x740   :  { %2407 = vmatpush.xpose.msrb.mxu1 %v2392_v3  ;;  %v2182_v57 = vsel %vm2181_vm4, %v4604_v38, %v2178_v5  ;;  %v2171_v3 = vand.u32 2147483648, %v4578_v58  ;;  %v2186_v35 = vor.u32 1.1754944e-38, %v2185_v8  ;;  %vm2165_vm6 = vweird.f32 %v4578_v58  ;;  %v4818_v38 = vld [vmem:[#allocation8_spill] sm:$0xff] }
 0x741   :  { %v2386_v23 = vmul.f32 %v4226_v44, %v2201_v63  ;;  %vm2184_vm7 = vcmp.eq.f32.partialorder %v2183_v54, 8.507059e+37  ;;  %v2169_v31 = vand.u32 2147483647, %v4578_v58  ;;  %vm2167_vm8 = vmor %vm2165_vm6, %vm2166_vm5  ;;  %v2593_v44 = vld [vmem:[%s4733_s2 + $0x40] sm:$0xff]  ;;  %v2949_v4 = vmov 0  }
 0x742   :  { %v2187_v2 = vsel %vm2184_vm7, %v2186_v35, %v2182_v57  ;;  %v2168_v16 = vsel %vm2167_vm8, %v4622_v9, %v2164_v25  ;;  %v2172_v52 = vor.u32 1.1754944e-38, %v2171_v3  ;;  %2636 = vset.pattern.permute.xlu0 %v2949_v4  ;;  %2637 = vset.pattern.permute.xlu1 %v2949_v4  ;;  %v1249_v9 = vpop.f32.mrf.mxu3 }
 0x743   :  { %v2385_v61 = vmul.f32 %v4290_v19, %v2187_v2  ;;  %vm2170_vm9 = vcmp.eq.f32.partialorder %v2169_v31, 8.507059e+37  ;;  %v2594_v19 = vld [vmem:[%s4733_s2 + $0x48] sm:$0xff]  ;;  %2481 = vperm.xlu0 %2636, %v2471_v0   ;;  %2635 = vset.pattern.permute.xlu2 %v2949_v4  ;;  %v1291_v51 = vadd.f32 %v4819_v22, %v1249_v9 }
 0x744   :  { %2408 = vmatpush.xpose.msrb.mxu1 %v2391_v59  ;;  %v2173_v7 = vsel %vm2170_vm9, %v2172_v52, %v2168_v16  ;;  %v2472_v59 = vld [vmem:[%s4734_s3 + $0x10] sm:$0xff]  ;;  %2476 = vperm.xlu2 %2635, %v2470_v56  }
 0x745   :  { %v2384_v1 = vmul.f32 %v4146_v14, %v2173_v7  ;;  %v2595_v14 = vld [vmem:[%s4733_s2 + $0x50] sm:$0xff]  ;;  %2486 = vperm.xlu1 %2637, %v2472_v59   ;;  %s2950_s2 = smov [#allocation5]  }
 0x746   :  { %s2506_s3 = sshll.u32 %s2950_s2, 4  ;;  %s2507_s3 = int_to_ptr.vmem [resolvable:$true] %s2506_s3 }
 0x748   :  { %2409 = vmatpush.xpose.msrb.mxu1 %v2390_v45 }
 0x74a   :  { %v1252_v15 = vpop.f32.mrf.mxu3 }
 0x74c   :  { %2410 = vmatpush.xpose.msrb.mxu1 %v2389_v49  ;;  %2491 = vperm.xlu2 %2635, %v2473_v40   ;;  %v4820_v49 = vld [vmem:[#allocation10_spill] sm:$0xff] }
 0x74d   :  { %v1294_v41 = vadd.f32 %v4820_v49, %v1252_v15 }
 0x750   :  { %2411 = vmatpush.xpose.msrb.mxu1 %v2388_v50 }
 0x752   :  { %v1255_v12 = vpop.f32.mrf.mxu3 }
 0x753   :  { %v1297_v62 = vadd.f32 %v4821_v32, %v1255_v12 }
 0x754   :  { %2412 = vmatpush.xpose.msrb.mxu1 %v2387_v34 }
 0x758   :  { %2413 = vmatpush.xpose.msrb.mxu1 %v2386_v23 }
 0x75a   :  { %v1258_v13 = vpop.f32.mrf.mxu3 }
 0x75b   :  { %v1300_v5 = vadd.f32 %v4822_v33, %v1258_v13 }
 0x75c   :  { %2414 = vmatpush.xpose.msrb.mxu1 %v2385_v61 }
 0x760   :  { %2415 = vmatpush.xpose.msrb.mxu1 %v2384_v1 }
 0x763   :  { %2416 = vmatmul.f32.vlgmr.msrb.gmra.mxu1 %v4818_v38 }
 0x79e   :  { %v2477_v36 = vpop.permute.xlu2 %2476 }
 0x7a0   :  { %v1833_v58 = vpop.f32.mrf.mxu1 }
 0x7a1   :  { %1868 = vmatpush.msra.mxu3 %v1833_v58 }
 0x7a2   :  { %2597 = vmatmul.msk.f32.vlgmr.msra.gmra.mxu3 %vm191_vm1, %v2593_v44 }
 0x7a6   :  { %v2492_v54 = vpop.permute.xlu2 %2491 }
 0x7aa   :  { %2598 = vmatmul.msk.f32.gmra.mxu3 %vm191_vm1, %v2594_v19 }
 0x7b2   :  { %2599 = vmatmul.msk.f32.gmra.mxu3 %vm191_vm1, %v2595_v14 }
 0x7b5   :  { %v2482_v27 = vpop.permute.xlu0 %2481 }
 0x7b7   :  { %v2487_v39 = vpop.permute.xlu1 %2486 }
 0x7ba   :  { %2600 = vmatmul.msk.f32.gmra.mxu3 %vm191_vm1, %v2596_v37 }
 0x7e0   :  { %v2417_v18 = vpop.f32.mrf.mxu1 }
 0x7e1   :  { %2452 = vmatpush.msrb.mxu3 %v2417_v18 }
 0x7e2   :  { %2621 = vmatmul.msk.f32.vlgmr.msrb.gmra.mxu3 %vm191_vm1, %v2617_v10 }
 0x7ea   :  { %2622 = vmatmul.msk.f32.gmra.mxu3 %vm191_vm1, %v2618_v6 }
 0x7f2   :  { %2623 = vmatmul.msk.f32.gmra.mxu3 %vm191_vm1, %v2619_v60 }
 0x7fa   :  { %2624 = vmatmul.msk.f32.gmra.mxu3 %vm191_vm1, %v2620_v29 }
 0x825   :  { %v1870_v45 = vpop.f32.mrf.mxu3 }
 0x826   :  { %v1882_v17 = vadd.f32 %v1870_v45, %v1291_v51 }
 0x82d   :  { %v1873_v53 = vpop.f32.mrf.mxu3 }
 0x82e   :  { %v1883_v20 = vadd.f32 %v1873_v53, %v1294_v41 }
 0x835   :  { %v1876_v28 = vpop.f32.mrf.mxu3 }
 0x836   :  { %v1884_v43 = vadd.f32 %v1876_v28, %v1297_v62 }
 0x83d   :  { %v1879_v48 = vpop.f32.mrf.mxu3 }
 0x83e   :  { %v1885_v11 = vadd.f32 %v1879_v48, %v1300_v5 }
 0x865   :  { %v2454_v42 = vpop.f32.mrf.mxu3 }
 0x866   :  { %v2466_v21 = vadd.f32 %v2454_v42, %v1882_v17 }
 0x868   :  { %v2494_v26 = vadd.f32 %v2477_v36, %v2466_v21 }
 0x86a   :  { %2498 = vst [vmem:[#allocation5] sm:$0xff] %v2494_v26 }
 0x86d   :  { %v2457_v47 = vpop.f32.mrf.mxu3 }
 0x86e   :  { %v2467_v24 = vadd.f32 %v2457_v47, %v1883_v20 }
 0x870   :  { %v2495_v55 = vadd.f32 %v2482_v27, %v2467_v24 }
 0x872   :  { %2499 = vst [vmem:[#allocation5 + $0x8] sm:$0xff] %v2495_v55 }
 0x875   :  { %v2460_v50 = vpop.f32.mrf.mxu3 }
 0x876   :  { %v2468_v46 = vadd.f32 %v2460_v50, %v1884_v43 }
 0x878   :  { %v2496_v30 = vadd.f32 %v2487_v39, %v2468_v46 }
 0x87a   :  { %2500 = vst [vmem:[#allocation5 + $0x10] sm:$0xff] %v2496_v30 }
 0x87d   :  { %v2463_v8 = vpop.f32.mrf.mxu3 }
 0x87e   :  { %v2469_v34 = vadd.f32 %v2463_v8, %v1885_v11 }
 0x880   :  { %v2497_v63 = vadd.f32 %v2492_v54, %v2469_v34 }
 0x882   :  { %2501 = vst [vmem:[#allocation5 + $0x18] sm:$0xff] %v2497_v63 }
 0x883   :  { %2514 = dma.vmem_to_hbm [thread:$0]  %s2507_s3, 512, %s2509_s20, [#allocation4], %s2947_s23, %s2947_s23, %s2948_s24  }
 0x884   :  { %2944 = dma.done.wait [#allocation4], 512  }
 0x885   :  { %2945 = vsyncadd [#allocation4], 4294966784 }
 0x886   :  { %2519 = vsyncpa [#allocation3], 1 }
 0x887   :  { %2520 = vsyncpa [#allocation4], 1 }

</bundles_post_ra>
